<compile_context>
chip_gen: v5e
topology: v5e:2x2
jax: 0.10.0
libtpu: 0.0.40
codegen_flags: <defaults>
</compile_context>

<pallas_src>
import functools
import math

import jax
import jax.numpy as jnp
from jax import lax
from jax.experimental import pallas as pl
from jax.experimental.pallas import tpu as pltpu


# ---------------------------------------------------------------------------
# Pallas kernel: (Cout, K) @ (K, tm) bf16 matmul + f32 shift + ReLU (lane-dense).
# ---------------------------------------------------------------------------
def _matmul_shift_relu_kernel(w_ref, x_ref, b_ref, o_ref):
    # w_ref: (Cout, K) bf16 (BN scale pre-folded), x_ref: (K, tm) bf16,
    # b_ref: (Cout, 1) f32 (conv bias + BN shift), o_ref: (Cout, tm) f32.
    y = jnp.dot(w_ref[...], x_ref[...], preferred_element_type=jnp.float32)
    o_ref[...] = jnp.maximum(y + b_ref[...], 0.0).astype(o_ref.dtype)


def _round_up(x, m):
    return -(-x // m) * m


def _pick_tm(m, cap=1024):
    """Lane-dim tile: a multiple of 128 (or full M).  Prefer an even split (no
    ragged final block) and >= 2 blocks so both v7x TensorCores get work."""
    if m <= 128:
        return m
    limit = min(cap, _round_up(_round_up(m, 2) // 2, 128))
    for tm in range(limit, 127, -128):
        if m % tm == 0:
            return tm
    return limit


def matmul_shift_relu(wmat, patches, shift):
    """wmat: (Cout, K) bf16, patches: (K, M) bf16, shift: (Cout, 1) f32 -> (Cout, M) f32."""
    cout, k = wmat.shape
    k2, m = patches.shape
    assert k == k2
    tm = _pick_tm(m)
    grid = (pl.cdiv(m, tm),)
    return pl.pallas_call(
        _matmul_shift_relu_kernel,
        out_shape=jax.ShapeDtypeStruct((cout, m), jnp.float32),
        grid=grid,
        in_specs=[
            pl.BlockSpec((cout, k), lambda i: (0, 0)),   # weights stay resident
            pl.BlockSpec((k, tm), lambda i: (0, i)),
            pl.BlockSpec((cout, 1), lambda i: (0, 0)),
        ],
        out_specs=pl.BlockSpec((cout, tm), lambda i: (0, i)),
        compiler_params=pltpu.CompilerParams(
            dimension_semantics=("parallel",),           # shard over TCs on v7x
            vmem_limit_bytes=32 * 1024 * 1024),          # honest budget, safe on v5e/v6e/v7x
    )(wmat, patches, shift)


# ---------------------------------------------------------------------------
# Wrapper-side helpers (XLA, all inside one jit): BN folding, im2col, pooling.
# ---------------------------------------------------------------------------
def _fold_bn(layer):
    """Eval-mode BatchNorm (running stats): fold scale into the weight matrix,
    fold conv bias + BN shift into a per-channel offset."""
    kh, kw, cin, cout = layer["w"].shape
    scale = layer["gamma"] * lax.rsqrt(layer["var"] + 1e-5)              # (cout,)
    shift = layer["beta"] + (layer["b"] - layer["mean"]) * scale          # (cout,)
    wmat = jnp.transpose(layer["w"], (3, 0, 1, 2)).reshape(cout, kh * kw * cin)
    return wmat * scale[:, None], shift.reshape(cout, 1)


def _im2col(x_cnhw, kh, kw, pad):
    """(Cin, N, H, W) -> (kh*kw*Cin, N*Ho*Wo), K ordered (dh, dw, cin)."""
    cin, n, h, w = x_cnhw.shape
    ph, pw = pad
    xp = jnp.pad(x_cnhw, ((0, 0), (0, 0), (ph, ph), (pw, pw)))
    ho = h + 2 * ph - kh + 1
    wo = w + 2 * pw - kw + 1
    cols = [xp[:, :, dh:dh + ho, dw:dw + wo] for dh in range(kh) for dw in range(kw)]
    patches = jnp.concatenate(cols, axis=0).reshape(kh * kw * cin, n * ho * wo)
    return patches, ho, wo


def conv_bn_relu_pallas(x_cnhw, layer, pad):
    """Fused conv + eval-BatchNorm + ReLU via the Pallas matmul kernel."""
    kh, kw, cin, cout = layer["w"].shape
    n = x_cnhw.shape[1]
    patches, ho, wo = _im2col(x_cnhw, kh, kw, pad)
    wmat, shift = _fold_bn(layer)
    # TODO(synk): layer 1 (cin=1, K=9) could skip im2col/MXU and run as 9 shifted
    #             multiply-adds on the VPU; kept on the shared matmul path here.
    y = matmul_shift_relu(wmat.astype(jnp.bfloat16),
                          patches.astype(jnp.bfloat16), shift)
    return y.reshape(cout, n, ho, wo)


def conv_bn_relu_ref(x_cnhw, layer, pad):
    """Pure-JAX (lax.conv, f32 HIGHEST) reference for the same block."""
    ph, pw = pad
    x = jnp.transpose(x_cnhw, (1, 2, 3, 0))                              # NHWC
    y = lax.conv_general_dilated(
        x, layer["w"], window_strides=(1, 1), padding=((ph, ph), (pw, pw)),
        dimension_numbers=("NHWC", "HWIO", "NHWC"),
        precision=lax.Precision.HIGHEST)
    scale = layer["gamma"] * lax.rsqrt(layer["var"] + 1e-5)
    shift = layer["beta"] + (layer["b"] - layer["mean"]) * scale
    y = jnp.maximum(y * scale + shift, 0.0)
    return jnp.transpose(y, (3, 0, 1, 2))                                # back to (C,N,H,W)


def _adaptive_bounds(in_size, out_size):
    return [(int(math.floor(i * in_size / out_size)),
             int(math.ceil((i + 1) * in_size / out_size))) for i in range(out_size)]


def adaptive_max_pool2d(x, out_hw):
    """x: (C, N, H, W) -> (C, N, OH, OW); matches F.adaptive_max_pool2d (max is
    separable over H then W)."""
    _, _, h, w = x.shape
    oh, ow = out_hw
    if h == 2 * oh:
        # Exact 2:1 pooling on H (always the case for 48->24, 24->12, 12->6).
        xh = jnp.maximum(x[:, :, 0::2, :], x[:, :, 1::2, :])
    else:
        hb = _adaptive_bounds(h, oh)
        xh = jnp.stack([jnp.max(x[:, :, h0:h1, :], axis=2) for h0, h1 in hb], axis=2)
    wb = _adaptive_bounds(w, ow)
    return jnp.stack([jnp.max(xh[:, :, :, w0:w1], axis=3) for w0, w1 in wb], axis=3)


# ---------------------------------------------------------------------------
# AdaptCNN + Framewise forward (eval mode), fully jitted.
# ---------------------------------------------------------------------------
POOL_1, POOL_2, POOL_3 = (24, 7), (12, 5), (6, 3)
PADS = ((1, 1), (1, 1), (1, 1), (1, 1), (1, 1), (1, 0))     # conv6: pad (1, 0)


def adaptcnn_forward(frames_cnhw, params, conv_fn):
    """frames_cnhw: (1, N, 48, 15) -> (N, 64 * pool_3[0]) = (N, 384)."""
    h = conv_fn(frames_cnhw, params[0], PADS[0])      # (16, N, 48, 15)
    h = adaptive_max_pool2d(h, POOL_1)                # (16, N, 24, 7)
    h = conv_fn(h, params[1], PADS[1])                # (32, N, 24, 7)
    h = adaptive_max_pool2d(h, POOL_2)                # (32, N, 12, 5)
    h = conv_fn(h, params[2], PADS[2])                # (64, N, 12, 5)
    h = conv_fn(h, params[3], PADS[3])                # (64, N, 12, 5)
    h = adaptive_max_pool2d(h, POOL_3)                # (64, N, 6, 3)
    h = conv_fn(h, params[4], PADS[4])                # (64, N, 6, 3)
    h = conv_fn(h, params[5], PADS[5])                # (64, N, 6, 1)
    # torch: x.view(-1, 64 * pool_3[0]) on NCHW -> flatten in (C, H, W) order.
    n = h.shape[1]
    return jnp.transpose(h, (1, 0, 2, 3)).reshape(n, -1)   # (N, 384)


def _framewise_forward(x, n_wins, params, total_length, conv_fn):
    """x: (bs, length, 1, 48, 15), n_wins: (bs,) -> (bs, total_length, 384)."""
    bs, length, channels, height, width = x.shape
    assert channels == 1
    frames = jnp.transpose(x.reshape(bs * length, channels, height, width),
                           (1, 0, 2, 3))                    # (1, bs*length, 48, 15)
    # TODO(synk): for ragged batches, gather only the sum(n_wins) valid frames
    #             (packed-sequence semantics) instead of computing + masking all.
    feats = adaptcnn_forward(frames, params, conv_fn)       # (bs*length, 384)
    feats = feats.reshape(bs, length, -1)[:, :total_length]
    mask = jnp.arange(total_length)[None, :] < n_wins[:, None]   # pack/pad semantics
    return jnp.where(mask[:, :, None], feats, 0.0)


@functools.partial(jax.jit, static_argnames=("total_length",))
def framewise_forward_pallas(x, n_wins, params, *, total_length):
    return _framewise_forward(x, n_wins, params, total_length, conv_bn_relu_pallas)


@functools.partial(jax.jit, static_argnames=("total_length",))
def framewise_forward_ref(x, n_wins, params, *, total_length):
    return _framewise_forward(x, n_wins, params, total_length, conv_bn_relu_ref)


# ---------------------------------------------------------------------------
# Deterministic example parameters (fresh-module eval semantics).
# ---------------------------------------------------------------------------
def init_adaptcnn_params(key):
    # (kh, kw, cin, cout) -- conv6 uses kernel (3, pool_3[1]=3).
    layer_defs = [
        (3, 3, 1, 16),
        (3, 3, 16, 32),
        (3, 3, 32, 64),
        (3, 3, 64, 64),
        (3, 3, 64, 64),
        (3, 3, 64, 64),
    ]
    params = []
    for kh, kw, cin, cout in layer_defs:
        key, k1, k2, k3, k4 = jax.random.split(key, 5)
        params.append(dict(
            w=jax.random.normal(k1, (kh, kw, cin, cout), jnp.float32)
              / math.sqrt(kh * kw * cin),
            b=0.01 * jax.random.normal(k2, (cout,), jnp.float32),
            gamma=1.0 + 0.1 * jax.random.normal(k3, (cout,), jnp.float32),
            beta=0.1 * jax.random.normal(k4, (cout,), jnp.float32),
            mean=jnp.zeros((cout,), jnp.float32),
            var=jnp.ones((cout,), jnp.float32),
        ))
    return params


if __name__ == "__main__":
    BS, LENGTH, CH, H, W = 2, 4, 1, 48, 15            # ms_n_mels=48, ms_seg_length=15

    key = jax.random.PRNGKey(0)
    kx, kp = jax.random.split(key)
    x = jax.random.normal(kx, (BS, LENGTH, CH, H, W), dtype=jnp.float32)
    n_wins_list = [4, 3]
    n_wins = jnp.array(n_wins_list, dtype=jnp.int32)
    total_length = max(n_wins_list)                    # static -> no device->host sync
    params = init_adaptcnn_params(kp)

    out = framewise_forward_pallas(x, n_wins, params, total_length=total_length)
    out = jax.block_until_ready(out)

    # Pure-JAX reference (f32 HIGHEST lax.conv) for the whole forward.
    ref = framewise_forward_ref(x, n_wins, params, total_length=total_length)
    ref = jax.block_until_ready(ref)

    assert out.shape == (BS, total_length, 64 * POOL_3[0]), out.shape
    assert out.dtype == jnp.float32
    assert bool(jnp.all(out[1, 3] == 0.0))             # padded window is zeroed
    max_err = float(jnp.max(jnp.abs(out - ref)))
    assert bool(jnp.allclose(out, ref, atol=5e-2, rtol=5e-2)), max_err

    print("KERNEL_OK")
</pallas_src>

<mosaic_0001>
module attributes {stable_mosaic.version = 11 : i64} {
  func.func @_matmul_shift_relu_kernel(%arg0: i32, %arg1: memref<16x9xbf16, #tpu.memory_space<vmem>>, %arg2: memref<9x640xbf16, #tpu.memory_space<vmem>>, %arg3: memref<16x1xf32, #tpu.memory_space<vmem>>, %arg4: memref<16x640xf32, #tpu.memory_space<vmem>>) attributes {dimension_semantics = [#tpu.dimension_semantics<parallel>], iteration_bounds = array<i64: 9>, scalar_prefetch = 0 : i64, scratch_operands = 0 : i64, tpu.core_type = #tpu.core_type<tc>, window_params = [{pipeline_mode = #tpu.pipeline_mode<synchronous>, transform_indices = @transform_0, window_bounds = array<i64: 16, 9>}, {transform_indices = @transform_1, window_bounds = array<i64: 9, 640>}, {pipeline_mode = #tpu.pipeline_mode<synchronous>, transform_indices = @transform_2, window_bounds = array<i64: 16, 1>}, {transform_indices = @transform_3, window_bounds = array<i64: 16, 640>}]} {
    %c0 = arith.constant 0 : index
    %c0_0 = arith.constant 0 : index
    %0 = vector.load %arg1[%c0, %c0_0] : memref<16x9xbf16, #tpu.memory_space<vmem>>, vector<16x9xbf16>
    %c0_1 = arith.constant 0 : index
    %c0_2 = arith.constant 0 : index
    %1 = vector.load %arg2[%c0_1, %c0_2] : memref<9x640xbf16, #tpu.memory_space<vmem>>, vector<9x640xbf16>
    %cst = arith.constant dense<0.000000e+00> : vector<16x640xf32>
    %2 = tpu.matmul %0, %1, %cst {dimension_numbers = #tpu.dot_dimension_numbers<[1], [0], [0], [1], [0, 0, 1, 1], [], []>} : vector<16x9xbf16>, vector<9x640xbf16>, vector<16x640xf32> -> vector<16x640xf32>
    %c0_3 = arith.constant 0 : index
    %c0_4 = arith.constant 0 : index
    %3 = vector.load %arg3[%c0_3, %c0_4] : memref<16x1xf32, #tpu.memory_space<vmem>>, vector<16x1xf32>
    %4 = vector.broadcast %3 : vector<16x1xf32> to vector<16x640xf32>
    %5 = arith.addf %2, %4 : vector<16x640xf32>
    %cst_5 = arith.constant 0.000000e+00 : f32
    %6 = vector.broadcast %cst_5 : f32 to vector<16x640xf32>
    %7 = arith.maximumf %5, %6 : vector<16x640xf32>
    %c0_6 = arith.constant 0 : index
    %c0_7 = arith.constant 0 : index
    %8 = vector.load %arg4[%c0_6, %c0_7] : memref<16x640xf32, #tpu.memory_space<vmem>>, vector<16x640xf32>
    tpu.vector_store %arg4[%c0_6, %c0_7], %7 {strides = array<i32>} : memref<16x640xf32, #tpu.memory_space<vmem>>, vector<16x640xf32>,
    return
  }
  func.func @transform_0(%arg0: i32) -> (i32, i32) {
    %c0_i32 = arith.constant 0 : i32
    %c0_i32_0 = arith.constant 0 : i32
    %c0_i32_1 = arith.constant 0 : i32
    return %c0_i32, %c0_i32_0 : i32, i32
  }
  func.func @transform_1(%arg0: i32) -> (i32, i32) {
    %c0_i32 = arith.constant 0 : i32
    %c0_i32_0 = arith.constant 0 : i32
    return %c0_i32, %arg0 : i32, i32
  }
  func.func @transform_2(%arg0: i32) -> (i32, i32) {
    %c0_i32 = arith.constant 0 : i32
    %c0_i32_0 = arith.constant 0 : i32
    %c0_i32_1 = arith.constant 0 : i32
    return %c0_i32, %c0_i32_0 : i32, i32
  }
  func.func @transform_3(%arg0: i32) -> (i32, i32) {
    %c0_i32 = arith.constant 0 : i32
    %c0_i32_0 = arith.constant 0 : i32
    return %c0_i32, %arg0 : i32, i32
  }
}

module attributes {stable_mosaic.version = 11 : i64} {
  func.func @_matmul_shift_relu_kernel(%arg0: i32, %arg1: memref<32x144xbf16, #tpu.memory_space<vmem>>, %arg2: memref<144x768xbf16, #tpu.memory_space<vmem>>, %arg3: memref<32x1xf32, #tpu.memory_space<vmem>>, %arg4: memref<32x768xf32, #tpu.memory_space<vmem>>) attributes {dimension_semantics = [#tpu.dimension_semantics<parallel>], iteration_bounds = array<i64: 2>, scalar_prefetch = 0 : i64, scratch_operands = 0 : i64, tpu.core_type = #tpu.core_type<tc>, window_params = [{pipeline_mode = #tpu.pipeline_mode<synchronous>, transform_indices = @transform_0, window_bounds = array<i64: 32, 144>}, {transform_indices = @transform_1, window_bounds = array<i64: 144, 768>}, {pipeline_mode = #tpu.pipeline_mode<synchronous>, transform_indices = @transform_2, window_bounds = array<i64: 32, 1>}, {transform_indices = @transform_3, window_bounds = array<i64: 32, 768>}]} {
    %c0 = arith.constant 0 : index
    %c0_0 = arith.constant 0 : index
    %0 = vector.load %arg1[%c0, %c0_0] : memref<32x144xbf16, #tpu.memory_space<vmem>>, vector<32x144xbf16>
    %c0_1 = arith.constant 0 : index
    %c0_2 = arith.constant 0 : index
    %1 = vector.load %arg2[%c0_1, %c0_2] : memref<144x768xbf16, #tpu.memory_space<vmem>>, vector<144x768xbf16>
    %cst = arith.constant dense<0.000000e+00> : vector<32x768xf32>
    %2 = tpu.matmul %0, %1, %cst {dimension_numbers = #tpu.dot_dimension_numbers<[1], [0], [0], [1], [0, 0, 1, 1], [], []>} : vector<32x144xbf16>, vector<144x768xbf16>, vector<32x768xf32> -> vector<32x768xf32>
    %c0_3 = arith.constant 0 : index
    %c0_4 = arith.constant 0 : index
    %3 = vector.load %arg3[%c0_3, %c0_4] : memref<32x1xf32, #tpu.memory_space<vmem>>, vector<32x1xf32>
    %4 = vector.broadcast %3 : vector<32x1xf32> to vector<32x768xf32>
    %5 = arith.addf %2, %4 : vector<32x768xf32>
    %cst_5 = arith.constant 0.000000e+00 : f32
    %6 = vector.broadcast %cst_5 : f32 to vector<32x768xf32>
    %7 = arith.maximumf %5, %6 : vector<32x768xf32>
    %c0_6 = arith.constant 0 : index
    %c0_7 = arith.constant 0 : index
    %8 = vector.load %arg4[%c0_6, %c0_7] : memref<32x768xf32, #tpu.memory_space<vmem>>, vector<32x768xf32>
    tpu.vector_store %arg4[%c0_6, %c0_7], %7 {strides = array<i32>} : memref<32x768xf32, #tpu.memory_space<vmem>>, vector<32x768xf32>,
    return
  }
  func.func @transform_0(%arg0: i32) -> (i32, i32) {
    %c0_i32 = arith.constant 0 : i32
    %c0_i32_0 = arith.constant 0 : i32
    %c0_i32_1 = arith.constant 0 : i32
    return %c0_i32, %c0_i32_0 : i32, i32
  }
  func.func @transform_1(%arg0: i32) -> (i32, i32) {
    %c0_i32 = arith.constant 0 : i32
    %c0_i32_0 = arith.constant 0 : i32
    return %c0_i32, %arg0 : i32, i32
  }
  func.func @transform_2(%arg0: i32) -> (i32, i32) {
    %c0_i32 = arith.constant 0 : i32
    %c0_i32_0 = arith.constant 0 : i32
    %c0_i32_1 = arith.constant 0 : i32
    return %c0_i32, %c0_i32_0 : i32, i32
  }
  func.func @transform_3(%arg0: i32) -> (i32, i32) {
    %c0_i32 = arith.constant 0 : i32
    %c0_i32_0 = arith.constant 0 : i32
    return %c0_i32, %arg0 : i32, i32
  }
}

module attributes {stable_mosaic.version = 11 : i64} {
  func.func @_matmul_shift_relu_kernel(%arg0: i32, %arg1: memref<64x288xbf16, #tpu.memory_space<vmem>>, %arg2: memref<288x256xbf16, #tpu.memory_space<vmem>>, %arg3: memref<64x1xf32, #tpu.memory_space<vmem>>, %arg4: memref<64x256xf32, #tpu.memory_space<vmem>>) attributes {dimension_semantics = [#tpu.dimension_semantics<parallel>], iteration_bounds = array<i64: 2>, scalar_prefetch = 0 : i64, scratch_operands = 0 : i64, tpu.core_type = #tpu.core_type<tc>, window_params = [{pipeline_mode = #tpu.pipeline_mode<synchronous>, transform_indices = @transform_0, window_bounds = array<i64: 64, 288>}, {transform_indices = @transform_1, window_bounds = array<i64: 288, 256>}, {pipeline_mode = #tpu.pipeline_mode<synchronous>, transform_indices = @transform_2, window_bounds = array<i64: 64, 1>}, {transform_indices = @transform_3, window_bounds = array<i64: 64, 256>}]} {
    %c0 = arith.constant 0 : index
    %c0_0 = arith.constant 0 : index
    %0 = vector.load %arg1[%c0, %c0_0] : memref<64x288xbf16, #tpu.memory_space<vmem>>, vector<64x288xbf16>
    %c0_1 = arith.constant 0 : index
    %c0_2 = arith.constant 0 : index
    %1 = vector.load %arg2[%c0_1, %c0_2] : memref<288x256xbf16, #tpu.memory_space<vmem>>, vector<288x256xbf16>
    %cst = arith.constant dense<0.000000e+00> : vector<64x256xf32>
    %2 = tpu.matmul %0, %1, %cst {dimension_numbers = #tpu.dot_dimension_numbers<[1], [0], [0], [1], [0, 0, 1, 1], [], []>} : vector<64x288xbf16>, vector<288x256xbf16>, vector<64x256xf32> -> vector<64x256xf32>
    %c0_3 = arith.constant 0 : index
    %c0_4 = arith.constant 0 : index
    %3 = vector.load %arg3[%c0_3, %c0_4] : memref<64x1xf32, #tpu.memory_space<vmem>>, vector<64x1xf32>
    %4 = vector.broadcast %3 : vector<64x1xf32> to vector<64x256xf32>
    %5 = arith.addf %2, %4 : vector<64x256xf32>
    %cst_5 = arith.constant 0.000000e+00 : f32
    %6 = vector.broadcast %cst_5 : f32 to vector<64x256xf32>
    %7 = arith.maximumf %5, %6 : vector<64x256xf32>
    %c0_6 = arith.constant 0 : index
    %c0_7 = arith.constant 0 : index
    %8 = vector.load %arg4[%c0_6, %c0_7] : memref<64x256xf32, #tpu.memory_space<vmem>>, vector<64x256xf32>
    tpu.vector_store %arg4[%c0_6, %c0_7], %7 {strides = array<i32>} : memref<64x256xf32, #tpu.memory_space<vmem>>, vector<64x256xf32>,
    return
  }
  func.func @transform_0(%arg0: i32) -> (i32, i32) {
    %c0_i32 = arith.constant 0 : i32
    %c0_i32_0 = arith.constant 0 : i32
    %c0_i32_1 = arith.constant 0 : i32
    return %c0_i32, %c0_i32_0 : i32, i32
  }
  func.func @transform_1(%arg0: i32) -> (i32, i32) {
    %c0_i32 = arith.constant 0 : i32
    %c0_i32_0 = arith.constant 0 : i32
    return %c0_i32, %arg0 : i32, i32
  }
  func.func @transform_2(%arg0: i32) -> (i32, i32) {
    %c0_i32 = arith.constant 0 : i32
    %c0_i32_0 = arith.constant 0 : i32
    %c0_i32_1 = arith.constant 0 : i32
    return %c0_i32, %c0_i32_0 : i32, i32
  }
  func.func @transform_3(%arg0: i32) -> (i32, i32) {
    %c0_i32 = arith.constant 0 : i32
    %c0_i32_0 = arith.constant 0 : i32
    return %c0_i32, %arg0 : i32, i32
  }
}

module attributes {stable_mosaic.version = 11 : i64} {
  func.func @_matmul_shift_relu_kernel(%arg0: i32, %arg1: memref<64x576xbf16, #tpu.memory_space<vmem>>, %arg2: memref<576x256xbf16, #tpu.memory_space<vmem>>, %arg3: memref<64x1xf32, #tpu.memory_space<vmem>>, %arg4: memref<64x256xf32, #tpu.memory_space<vmem>>) attributes {dimension_semantics = [#tpu.dimension_semantics<parallel>], iteration_bounds = array<i64: 2>, scalar_prefetch = 0 : i64, scratch_operands = 0 : i64, tpu.core_type = #tpu.core_type<tc>, window_params = [{pipeline_mode = #tpu.pipeline_mode<synchronous>, transform_indices = @transform_0, window_bounds = array<i64: 64, 576>}, {transform_indices = @transform_1, window_bounds = array<i64: 576, 256>}, {pipeline_mode = #tpu.pipeline_mode<synchronous>, transform_indices = @transform_2, window_bounds = array<i64: 64, 1>}, {transform_indices = @transform_3, window_bounds = array<i64: 64, 256>}]} {
    %c0 = arith.constant 0 : index
    %c0_0 = arith.constant 0 : index
    %0 = vector.load %arg1[%c0, %c0_0] : memref<64x576xbf16, #tpu.memory_space<vmem>>, vector<64x576xbf16>
    %c0_1 = arith.constant 0 : index
    %c0_2 = arith.constant 0 : index
    %1 = vector.load %arg2[%c0_1, %c0_2] : memref<576x256xbf16, #tpu.memory_space<vmem>>, vector<576x256xbf16>
    %cst = arith.constant dense<0.000000e+00> : vector<64x256xf32>
    %2 = tpu.matmul %0, %1, %cst {dimension_numbers = #tpu.dot_dimension_numbers<[1], [0], [0], [1], [0, 0, 1, 1], [], []>} : vector<64x576xbf16>, vector<576x256xbf16>, vector<64x256xf32> -> vector<64x256xf32>
    %c0_3 = arith.constant 0 : index
    %c0_4 = arith.constant 0 : index
    %3 = vector.load %arg3[%c0_3, %c0_4] : memref<64x1xf32, #tpu.memory_space<vmem>>, vector<64x1xf32>
    %4 = vector.broadcast %3 : vector<64x1xf32> to vector<64x256xf32>
    %5 = arith.addf %2, %4 : vector<64x256xf32>
    %cst_5 = arith.constant 0.000000e+00 : f32
    %6 = vector.broadcast %cst_5 : f32 to vector<64x256xf32>
    %7 = arith.maximumf %5, %6 : vector<64x256xf32>
    %c0_6 = arith.constant 0 : index
    %c0_7 = arith.constant 0 : index
    %8 = vector.load %arg4[%c0_6, %c0_7] : memref<64x256xf32, #tpu.memory_space<vmem>>, vector<64x256xf32>
    tpu.vector_store %arg4[%c0_6, %c0_7], %7 {strides = array<i32>} : memref<64x256xf32, #tpu.memory_space<vmem>>, vector<64x256xf32>,
    return
  }
  func.func @transform_0(%arg0: i32) -> (i32, i32) {
    %c0_i32 = arith.constant 0 : i32
    %c0_i32_0 = arith.constant 0 : i32
    %c0_i32_1 = arith.constant 0 : i32
    return %c0_i32, %c0_i32_0 : i32, i32
  }
  func.func @transform_1(%arg0: i32) -> (i32, i32) {
    %c0_i32 = arith.constant 0 : i32
    %c0_i32_0 = arith.constant 0 : i32
    return %c0_i32, %arg0 : i32, i32
  }
  func.func @transform_2(%arg0: i32) -> (i32, i32) {
    %c0_i32 = arith.constant 0 : i32
    %c0_i32_0 = arith.constant 0 : i32
    %c0_i32_1 = arith.constant 0 : i32
    return %c0_i32, %c0_i32_0 : i32, i32
  }
  func.func @transform_3(%arg0: i32) -> (i32, i32) {
    %c0_i32 = arith.constant 0 : i32
    %c0_i32_0 = arith.constant 0 : i32
    return %c0_i32, %arg0 : i32, i32
  }
}

module attributes {stable_mosaic.version = 11 : i64} {
  func.func @_matmul_shift_relu_kernel(%arg0: i32, %arg1: memref<64x576xbf16, #tpu.memory_space<vmem>>, %arg2: memref<576x128xbf16, #tpu.memory_space<vmem>>, %arg3: memref<64x1xf32, #tpu.memory_space<vmem>>, %arg4: memref<64x128xf32, #tpu.memory_space<vmem>>) attributes {dimension_semantics = [#tpu.dimension_semantics<parallel>], iteration_bounds = array<i64: 2>, scalar_prefetch = 0 : i64, scratch_operands = 0 : i64, tpu.core_type = #tpu.core_type<tc>, window_params = [{pipeline_mode = #tpu.pipeline_mode<synchronous>, transform_indices = @transform_0, window_bounds = array<i64: 64, 576>}, {transform_indices = @transform_1, window_bounds = array<i64: 576, 128>}, {pipeline_mode = #tpu.pipeline_mode<synchronous>, transform_indices = @transform_2, window_bounds = array<i64: 64, 1>}, {transform_indices = @transform_3, window_bounds = array<i64: 64, 128>}]} {
    %c0 = arith.constant 0 : index
    %c0_0 = arith.constant 0 : index
    %0 = vector.load %arg1[%c0, %c0_0] : memref<64x576xbf16, #tpu.memory_space<vmem>>, vector<64x576xbf16>
    %c0_1 = arith.constant 0 : index
    %c0_2 = arith.constant 0 : index
    %1 = vector.load %arg2[%c0_1, %c0_2] : memref<576x128xbf16, #tpu.memory_space<vmem>>, vector<576x128xbf16>
    %cst = arith.constant dense<0.000000e+00> : vector<64x128xf32>
    %2 = tpu.matmul %0, %1, %cst {dimension_numbers = #tpu.dot_dimension_numbers<[1], [0], [0], [1], [0, 0, 1, 1], [], []>} : vector<64x576xbf16>, vector<576x128xbf16>, vector<64x128xf32> -> vector<64x128xf32>
    %c0_3 = arith.constant 0 : index
    %c0_4 = arith.constant 0 : index
    %3 = vector.load %arg3[%c0_3, %c0_4] : memref<64x1xf32, #tpu.memory_space<vmem>>, vector<64x1xf32>
    %4 = vector.broadcast %3 : vector<64x1xf32> to vector<64x128xf32>
    %5 = arith.addf %2, %4 : vector<64x128xf32>
    %cst_5 = arith.constant 0.000000e+00 : f32
    %6 = vector.broadcast %cst_5 : f32 to vector<64x128xf32>
    %7 = arith.maximumf %5, %6 : vector<64x128xf32>
    %c0_6 = arith.constant 0 : index
    %c0_7 = arith.constant 0 : index
    %8 = vector.load %arg4[%c0_6, %c0_7] : memref<64x128xf32, #tpu.memory_space<vmem>>, vector<64x128xf32>
    tpu.vector_store %arg4[%c0_6, %c0_7], %7 {strides = array<i32>} : memref<64x128xf32, #tpu.memory_space<vmem>>, vector<64x128xf32>,
    return
  }
  func.func @transform_0(%arg0: i32) -> (i32, i32) {
    %c0_i32 = arith.constant 0 : i32
    %c0_i32_0 = arith.constant 0 : i32
    %c0_i32_1 = arith.constant 0 : i32
    return %c0_i32, %c0_i32_0 : i32, i32
  }
  func.func @transform_1(%arg0: i32) -> (i32, i32) {
    %c0_i32 = arith.constant 0 : i32
    %c0_i32_0 = arith.constant 0 : i32
    return %c0_i32, %arg0 : i32, i32
  }
  func.func @transform_2(%arg0: i32) -> (i32, i32) {
    %c0_i32 = arith.constant 0 : i32
    %c0_i32_0 = arith.constant 0 : i32
    %c0_i32_1 = arith.constant 0 : i32
    return %c0_i32, %c0_i32_0 : i32, i32
  }
  func.func @transform_3(%arg0: i32) -> (i32, i32) {
    %c0_i32 = arith.constant 0 : i32
    %c0_i32_0 = arith.constant 0 : i32
    return %c0_i32, %arg0 : i32, i32
  }
}

module attributes {stable_mosaic.version = 11 : i64} {
  func.func @_matmul_shift_relu_kernel(%arg0: i32, %arg1: memref<64x576xbf16, #tpu.memory_space<vmem>>, %arg2: memref<576x48xbf16, #tpu.memory_space<vmem>>, %arg3: memref<64x1xf32, #tpu.memory_space<vmem>>, %arg4: memref<64x48xf32, #tpu.memory_space<vmem>>) attributes {dimension_semantics = [#tpu.dimension_semantics<parallel>], iteration_bounds = array<i64: 1>, scalar_prefetch = 0 : i64, scratch_operands = 0 : i64, tpu.core_type = #tpu.core_type<tc>, window_params = [{pipeline_mode = #tpu.pipeline_mode<synchronous>, transform_indices = @transform_0, window_bounds = array<i64: 64, 576>}, {transform_indices = @transform_1, window_bounds = array<i64: 576, 48>}, {pipeline_mode = #tpu.pipeline_mode<synchronous>, transform_indices = @transform_2, window_bounds = array<i64: 64, 1>}, {transform_indices = @transform_3, window_bounds = array<i64: 64, 48>}]} {
    %c0 = arith.constant 0 : index
    %c0_0 = arith.constant 0 : index
    %0 = vector.load %arg1[%c0, %c0_0] : memref<64x576xbf16, #tpu.memory_space<vmem>>, vector<64x576xbf16>
    %c0_1 = arith.constant 0 : index
    %c0_2 = arith.constant 0 : index
    %1 = vector.load %arg2[%c0_1, %c0_2] : memref<576x48xbf16, #tpu.memory_space<vmem>>, vector<576x48xbf16>
    %cst = arith.constant dense<0.000000e+00> : vector<64x48xf32>
    %2 = tpu.matmul %0, %1, %cst {dimension_numbers = #tpu.dot_dimension_numbers<[1], [0], [0], [1], [0, 0, 1, 1], [], []>} : vector<64x576xbf16>, vector<576x48xbf16>, vector<64x48xf32> -> vector<64x48xf32>
    %c0_3 = arith.constant 0 : index
    %c0_4 = arith.constant 0 : index
    %3 = vector.load %arg3[%c0_3, %c0_4] : memref<64x1xf32, #tpu.memory_space<vmem>>, vector<64x1xf32>
    %4 = vector.broadcast %3 : vector<64x1xf32> to vector<64x48xf32>
    %5 = arith.addf %2, %4 : vector<64x48xf32>
    %cst_5 = arith.constant 0.000000e+00 : f32
    %6 = vector.broadcast %cst_5 : f32 to vector<64x48xf32>
    %7 = arith.maximumf %5, %6 : vector<64x48xf32>
    %c0_6 = arith.constant 0 : index
    %c0_7 = arith.constant 0 : index
    %8 = vector.load %arg4[%c0_6, %c0_7] : memref<64x48xf32, #tpu.memory_space<vmem>>, vector<64x48xf32>
    tpu.vector_store %arg4[%c0_6, %c0_7], %7 {strides = array<i32>} : memref<64x48xf32, #tpu.memory_space<vmem>>, vector<64x48xf32>,
    return
  }
  func.func @transform_0(%arg0: i32) -> (i32, i32) {
    %c0_i32 = arith.constant 0 : i32
    %c0_i32_0 = arith.constant 0 : i32
    %c0_i32_1 = arith.constant 0 : i32
    return %c0_i32, %c0_i32_0 : i32, i32
  }
  func.func @transform_1(%arg0: i32) -> (i32, i32) {
    %c0_i32 = arith.constant 0 : i32
    %c0_i32_0 = arith.constant 0 : i32
    return %c0_i32, %arg0 : i32, i32
  }
  func.func @transform_2(%arg0: i32) -> (i32, i32) {
    %c0_i32 = arith.constant 0 : i32
    %c0_i32_0 = arith.constant 0 : i32
    %c0_i32_1 = arith.constant 0 : i32
    return %c0_i32, %c0_i32_0 : i32, i32
  }
  func.func @transform_3(%arg0: i32) -> (i32, i32) {
    %c0_i32 = arith.constant 0 : i32
    %c0_i32_0 = arith.constant 0 : i32
    return %c0_i32, %arg0 : i32, i32
  }
}

</mosaic_0001>

<bundles_post_ra>
// kernel: framewise_forward_pallas.6
= control target key start
LH: loop header
LB: loop body
LE: loop exit
PB: predicated region body
PF: predicated region fallthrough
CT: control target
= control target key end

     0   :  { %s598_s12 = smov 0   ;;  %s600_s13 = smov 0   ;;  %s693_s0 = inlined_call_operand.vmem [shape: bf16[16,9], index: 0, kind: input, shape index: {}]   ;;  %s694_s1 = inlined_call_operand.vmem [shape: bf16[9,5760], index: 1, kind: input, shape index: {}]   ;;  %s695_s2 = inlined_call_operand.vmem [shape: f32[16,1], index: 2, kind: input, shape index: {}]   ;;  %s696_s3 = inlined_call_operand.vmem [shape: f32[16,5760], index: 3, kind: output, shape index: {}]  }
   0x1   :  { %s602_s14 = smov 0  }
   0x2 LB: > { %s472_s15 = sadd.s32 4294967295, %s574_s14   ;;  %s615_s16 = sadd.s32 1, %s574_s14   ;;  %s574_s14 = sphi %s602_s14, %s700_s14   ;;  %s570_s13 = sphi %s600_s13, %s699_s13   ;;  %s566_s12 = sphi %s598_s12, %s698_s12  }
   0x3   : > { %s38_s17 = ssub.s32 %s574_s14, %s615_s16  ;;  %s41_s18 = sadd.s32 1, %s570_s13 }
   0x4   : > { %p39_p0 = scmp.eq.s32.totalorder %s38_s17, 0  ;;  %p48_p1 = scmp.ne.s32.totalorder %s570_s13, %s566_s12 }
   0x5   : > { %p49_p2 = scmp.eq.s32.totalorder %s574_s14, 0  ;;  %p99_p3 = scmp.eq.s32.totalorder %s472_s15, 8 }
   0x6   : > { %s626_s19 = scalar_select %p39_p0, %s570_s13, %s41_s18  }
   0x7   : > { %p50_p4 = por %p49_p2, %p48_p1  ;;  %p628_p5 = por %p99_p3, %p48_p1 }
   0x8   : > { %p475_p6 = scmp.ge.s32.totalorder %s574_s14, 9 }
   0xa   : > { %127 = sbr.rel (%p475_p6) target bundleno = 26 (0x1a), region = 24 }
   0xf   : > { %130 = sbr.rel (!%p50_p4) target bundleno = 26 (0x1a), region = 28  ;;  %s132_s21 = sand.u32 (%p50_p4), 1, %s570_s13  }
  0x10   : > { %s514_s22 = smul.u32 (%p50_p4), 20, %s574_s14 }
  0x11   : > { %s522_s23 = smul.u32 (%p50_p4), 40, %s132_s21 }
  0x12   : > { %s137_s26 = scalar_lea.vmem (%p50_p4), %s694_s1, %s514_s22 }
  0x13   : > { %v152_v0 = vld [vmem:[%s137_s26] sm:$0xff] (%p50_p4)  ;;  %v154_v1 = vld [vmem:[%s137_s26 + $0x8] sm:$0xff] (%p50_p4)  ;;  %v156_v2 = vld [vmem:[%s137_s26 + $0xb4] sm:$0xff] (%p50_p4)  ;;  %s134_s27 = scalar_lea.vmem (%p50_p4), [#allocation2], %s522_s23 }
  0x14   : > { %153 = vst [vmem:[%s134_s27] sm:$0xff] %v152_v0  ;;  %v158_v3 = vld [vmem:[%s137_s26 + $0xbc] sm:$0xff]  ;;  %v477_v4 = vld [vmem:[%s137_s26 + $0x10] sm:$0xf]  ;;  %v479_v5 = vld [vmem:[%s137_s26 + $0xc4] sm:$0xf] }
  0x15   : > { %155 = vst [vmem:[%s134_s27 + $0x8] sm:$0xff] %v154_v1 }
  0x16   : > { %157 = vst [vmem:[%s134_s27 + $0x14] sm:$0xff] %v156_v2 }
  0x17   : > { %159 = vst [vmem:[%s134_s27 + $0x1c] sm:$0xff] %v158_v3 }
  0x18   : > { %478 = vst [vmem:[%s134_s27 + $0x10] sm:$0xf] %v477_v4 }
  0x19   : > { %480 = vst [vmem:[%s134_s27 + $0x24] sm:$0xf] %v479_v5 }
  0x1a PF: > { %p481_p7 = scmp.ge.s32.totalorder %s574_s14, 1  ;;  %p176_p8 = scmp.lt.s32.totalorder %s574_s14, 10 }
  0x1c   : > { %p177_p9 = pnand %p481_p7, %p176_p8 }
  0x1d   : > { %s183_s28 = sand.u32 (!%p177_p9), 1, %s566_s12  }
  0x1e   : > { %180 = sbr.rel (%p177_p9) target bundleno = 207 (0xcf), region = 54 }
  0x1f   : > { %s523_s29 = smul.u32 (!%p177_p9), 40, %s183_s28 }
  0x20   : > { %s524_s10 = smul.u32 (!%p177_p9), 80, %s183_s28 }
  0x21   : > { %s185_s5 = scalar_lea.vmem (!%p177_p9), [#allocation2], %s523_s29 }
  0x22   : > { %s654_s11 = scalar_lea.vmem (!%p177_p9), [#allocation3], %s524_s10 }
  0x23   : > { %vm258_vm0 = vcmask 1043456   ;;  %vm259_vm1 = vcmask 1044480   ;;  %v576_v6 = vmov 65535   ;;  %v216_v8 = vld [vmem:[%s695_s2] sm:$0xff]  ;;  %v577_v9 = vmov 0   ;;  %v217_v30 = vld [vmem:[%s695_s2 + $0x8] sm:$0xff] }
  0x24   : > { %v260_v7 = vsel %vm258_vm0, 4294967295, %v576_v6  ;;  %551 = vset.pattern.permute.xlu0 %v577_v9  ;;  %v488_v11 = vld [vmem:[%s185_s5] sm:$0xf]  ;;  %v518_v12 = vld [vmem:[%s185_s5 + $0x10] sm:$0x10]  ;;  %vm254_vm2 = vcmask 72704  }
  0x25   : > { %v261_v10 = vsel %vm259_vm1, %v260_v7, 0  ;;  %220 = vperm.xlu0 %551, %v216_v8   ;;  %v496_v13 = vld [vmem:[%s185_s5 + $0x8] sm:$0xf]  ;;  %v489_v14 = vor.u32 %v518_v12, %v488_v11  ;;  %v519_v15 = vld [vmem:[%s185_s5 + $0x18] sm:$0x10]  ;;  %s521_s12 = smul.u32 (%p628_p5), 40, %s472_s15 }
  0x26   : > { %v517_v16 = vld [vmem:[%s185_s5 + $0xc] sm:$0xf]  ;;  %v498_v17 = vld [vmem:[%s185_s5 + $0x1c] sm:$0x10]  ;;  %v497_v18 = vor.u32 %v519_v15, %v496_v13  ;;  %v504_v20 = vld [vmem:[%s185_s5 + $0x10] sm:$0xf] }
  0x27   : > { %v501_v19 = vor.u32 %v517_v16, %v498_v17  ;;  %v520_v21 = vld [vmem:[%s185_s5 + $0x20] sm:$0x10]  ;;  %v263_v23 = vand.u32 %v489_v14, %v261_v10  ;;  %v490_v25 = vld [vmem:[%s185_s5 + $0x14] sm:$0x10]  ;;  %s376_s20 = scalar_lea.vmem (%p628_p5), %s696_s3, %s521_s12 }
  0x28   : > { %v516_v22 = vld [vmem:[%s185_s5 + $0x4] sm:$0xf]  ;;  %v505_v24 = vor.u32 %v520_v21, %v504_v20  ;;  %v269_v26 = vand.u32 %v497_v18, %v261_v10 }
  0x29   : > { %v272_v27 = vand.u32 %v501_v19, %v261_v10  ;;  %v515_v28 = vld [vmem:[%s693_s0] sm:$0xff]  ;;  %v493_v29 = vor.u32 %v516_v22, %v490_v25  ;;  %284 = vmatpush.bf16.msra.mxu0 %v263_v23 }
  0x2a   : > { %v275_v31 = vand.u32 %v505_v24, %v261_v10  ;;  %312 = vmatpush.bf16.msra.mxu2 %v269_v26 }
  0x2b   : > { %326 = vmatpush.bf16.msra.mxu3 %v272_v27  ;;  %v266_v32 = vand.u32 %v493_v29, %v261_v10 }
  0x2c   : > { %506 = vmatmul.msk.bf16.vlgmr.msra.gmra.mxu0 %vm254_vm2, %v515_v28 }
  0x2d   : > { %340 = vmatpush.bf16.msrb.mxu0 %v275_v31  ;;  %225 = vperm.xlu0 %551, %v217_v30  }
  0x2e   : > { %298 = vmatpush.bf16.msra.mxu1 %v266_v32  ;;  %508 = vmatmul.msk.bf16.vlgmr.msra.gmra.mxu2 %vm254_vm2, %v515_v28 }
  0x2f   : > { %509 = vmatmul.msk.bf16.vlgmr.msra.gmra.mxu3 %vm254_vm2, %v515_v28 }
  0x31   : > { %507 = vmatmul.msk.bf16.vlgmr.msra.gmra.mxu1 %vm254_vm2, %v515_v28 }
  0x3c   : > { %510 = vmatmul.msk.bf16.vlgmr.msrb.gmra.mxu0 %vm254_vm2, %v515_v28 }
  0x97   : > { %v221_v33 = vpop.permute.xlu0 %220 }
  0x9f   : > { %v226_v39 = vpop.permute.xlu0 %225 }
  0xa9   : > { %v286_v34 = vpop.f32.mrf.mxu0 }
  0xaa   : > { %v287_v35 = vadd.f32 %v286_v34, %v221_v33 }
  0xac   : > { %v347_v36 = vmax.f32 %v287_v35, 0.0 }
  0xae   : > { %v300_v37 = vpop.f32.mrf.mxu1  ;;  %357 = vst [vmem:[%s654_s11] sm:$0xff] %v347_v36 }
  0xaf   : > { %v301_v38 = vadd.f32 %v300_v37, %v221_v33 }
  0xb1   : > { %v348_v40 = vmax.f32 %v301_v38, 0.0  ;;  %v314_v41 = vpop.f32.mrf.mxu2  ;;  %v288_v43 = vpop.f32.mrf.mxu0 }
  0xb2   : > { %v328_v42 = vpop.f32.mrf.mxu3  ;;  %v315_v44 = vadd.f32 %v314_v41, %v221_v33  ;;  %v289_v46 = vadd.f32 %v288_v43, %v226_v39 }
  0xb3   : > { %358 = vst [vmem:[%s654_s11 + $0x8] sm:$0xff] %v348_v40  ;;  %v329_v45 = vadd.f32 %v328_v42, %v221_v33 }
  0xb4   : > { %v349_v47 = vmax.f32 %v315_v44, 0.0  ;;  %v352_v49 = vmax.f32 %v289_v46, 0.0 }
  0xb5   : > { %v350_v48 = vmax.f32 %v329_v45, 0.0  ;;  %v389_v1 = vld [vmem:[%s654_s11] sm:$0xff] (%p628_p5) }
  0xb6   : > { %v302_v50 = vpop.f32.mrf.mxu1  ;;  %359 = vst [vmem:[%s654_s11 + $0x10] sm:$0xff] %v349_v47 }
  0xb7   : > { %v303_v51 = vadd.f32 %v302_v50, %v226_v39  ;;  %362 = vst [vmem:[%s654_s11 + $0x28] sm:$0xff] %v352_v49 }
  0xb8   : > { %360 = vst [vmem:[%s654_s11 + $0x18] sm:$0xff] %v350_v48 }
  0xb9   : > { %v353_v52 = vmax.f32 %v303_v51, 0.0  ;;  %v316_v53 = vpop.f32.mrf.mxu2  ;;  %v342_v57 = vpop.f32.mrf.mxu0  ;;  %390 = vst [vmem:[%s376_s20] sm:$0xff] (%p628_p5), %v389_v1 }
  0xba   : > { %v330_v54 = vpop.f32.mrf.mxu3  ;;  %v317_v55 = vadd.f32 %v316_v53, %v226_v39  ;;  %v343_v58 = vadd.f32 %v342_v57, %v221_v33  ;;  %v391_v2 = vld [vmem:[%s654_s11 + $0x8] sm:$0xff] (%p628_p5) }
  0xbb   : > { %363 = vst [vmem:[%s654_s11 + $0x30] sm:$0xff] %v353_v52  ;;  %v331_v56 = vadd.f32 %v330_v54, %v226_v39 }
  0xbc   : > { %v354_v59 = vmax.f32 %v317_v55, 0.0  ;;  %v351_v61 = vmax.f32 %v343_v58, 0.0  ;;  %392 = vst [vmem:[%s376_s20 + $0x8] sm:$0xff] (%p628_p5), %v391_v2 }
  0xbd   : > { %v355_v60 = vmax.f32 %v331_v56, 0.0  ;;  %v393_v3 = vld [vmem:[%s654_s11 + $0x10] sm:$0xff] (%p628_p5) }
  0xbe   : > { %364 = vst [vmem:[%s654_s11 + $0x38] sm:$0xff] %v354_v59  ;;  %v399_v6 = vld [vmem:[%s654_s11 + $0x28] sm:$0xff] (%p628_p5) }
  0xbf   : > { %365 = vst [vmem:[%s654_s11 + $0x40] sm:$0xff] %v355_v60  ;;  %v395_v4 = vld [vmem:[%s654_s11 + $0x18] sm:$0xff] (%p628_p5) }
  0xc0   : > { %361 = vst [vmem:[%s654_s11 + $0x20] sm:$0xff] %v351_v61 }
  0xc1   : > { %v344_v62 = vpop.f32.mrf.mxu0  ;;  %394 = vst [vmem:[%s376_s20 + $0x10] sm:$0xff] (%p628_p5), %v393_v3 }
  0xc2   : > { %v345_v63 = vadd.f32 %v344_v62, %v226_v39  ;;  %373 = sbr.rel (!%p628_p5) target bundleno = 207 (0xcf), region = 62  ;;  %396 = vst [vmem:[%s376_s20 + $0x18] sm:$0xff] (%p628_p5), %v395_v4  ;;  %v401_v7 = vld [vmem:[%s654_s11 + $0x30] sm:$0xff] (%p628_p5) }
  0xc3   : > { %400 = vst [vmem:[%s376_s20 + $0x168] sm:$0xff] (%p628_p5), %v399_v6 }
  0xc4   : > { %v356_v0 = vmax.f32 %v345_v63, 0.0  ;;  %402 = vst [vmem:[%s376_s20 + $0x170] sm:$0xff] (%p628_p5), %v401_v7 }
  0xc5   : > { %v403_v8 = vld [vmem:[%s654_s11 + $0x38] sm:$0xff] (%p628_p5) }
  0xc6   : > { %366 = vst [vmem:[%s654_s11 + $0x48] sm:$0xff] %v356_v0  ;;  %v405_v9 = vld [vmem:[%s654_s11 + $0x40] sm:$0xff] (%p628_p5) }
  0xc7   : > { %v397_v5 = vld [vmem:[%s654_s11 + $0x20] sm:$0xff]  ;;  %404 = vst [vmem:[%s376_s20 + $0x178] sm:$0xff] %v403_v8 }
  0xc8   : > { %398 = vst [vmem:[%s376_s20 + $0x20] sm:$0xff] %v397_v5 }
  0xc9   : > { %406 = vst [vmem:[%s376_s20 + $0x180] sm:$0xff] %v405_v9 }
  0xcd   : > { %v407_v10 = vld [vmem:[%s654_s11 + $0x48] sm:$0xff] }
  0xce   : > { %408 = vst [vmem:[%s376_s20 + $0x188] sm:$0xff] %v407_v10 }
  0xcf PF: > { %p10_p10 = scmp.ge.s32.totalorder %s615_s16, 11   ;;  %s698_s12 = smov %s570_s13 }
  0xd0   : > { %s699_s13 = smov %s626_s19  ;;  %s700_s14 = smov %s615_s16 }
  0xd1   :  { %12 = sbr.rel (!%p10_p10) target bundleno = 2 (0x2), region = 122 }

// kernel: framewise_forward_pallas.7
= control target key start
LH: loop header
LB: loop body
LE: loop exit
PB: predicated region body
PF: predicated region fallthrough
CT: control target
= control target key end

     0   :  { %s2758_s12 = smov 0   ;;  %s2760_s13 = smov 0   ;;  %s3971_s0 = inlined_call_operand.vmem [shape: bf16[32,144], index: 0, kind: input, shape index: {}]   ;;  %s3972_s1 = inlined_call_operand.vmem [shape: bf16[144,1344], index: 1, kind: input, shape index: {}]   ;;  %s3973_s2 = inlined_call_operand.vmem [shape: f32[32,1], index: 2, kind: input, shape index: {}]   ;;  %s3974_s3 = inlined_call_operand.vmem [shape: f32[32,1344], index: 3, kind: output, shape index: {}]  }
   0x1   :  { %s2762_s14 = smov 0  }
   0x2 LB: > { %s2774_s15 = sadd.s32 4294967295, %s2603_s14   ;;  %s2777_s16 = sadd.s32 1, %s2603_s14   ;;  %s2603_s14 = sphi %s2762_s14, %s4013_s14   ;;  %s2599_s13 = sphi %s2760_s13, %s4012_s13   ;;  %s2595_s12 = sphi %s2758_s12, %s4011_s12  }
   0x3   : > { %s38_s17 = ssub.s32 %s2603_s14, %s2777_s16  ;;  %s41_s18 = sadd.s32 1, %s2599_s13 }
   0x4   : > { %p39_p0 = scmp.eq.s32.totalorder %s38_s17, 0  ;;  %p48_p1 = scmp.ne.s32.totalorder %s2599_s13, %s2595_s12 }
   0x5   : > { %p49_p2 = scmp.eq.s32.totalorder %s2603_s14, 0  ;;  %p99_p3 = scmp.eq.s32.totalorder %s2774_s15, 1 }
   0x6   : > { %s2787_s19 = scalar_select %p39_p0, %s2599_s13, %s41_s18  }
   0x7   : > { %p50_p4 = por %p49_p2, %p48_p1  ;;  %p2789_p5 = por %p99_p3, %p48_p1 }
   0x8   : > { %p1785_p6 = scmp.ge.s32.totalorder %s2603_s14, 2 }
   0xa   : > { %127 = sbr.rel (%p1785_p6) target bundleno = 234 (0xea), region = 24 }
   0xf   : > { %130 = sbr.rel (!%p50_p4) target bundleno = 234 (0xea), region = 28  ;;  %s132_s21 = sand.u32 (%p50_p4), 1, %s2599_s13  }
  0x10   : > { %s135_s22 = smul.u32 (%p50_p4), 6, %s2603_s14 }
  0x11   : > { %s2163_s23 = smul.u32 (%p50_p4), 432, %s132_s21 }
  0x12   : > { %s136_s24 = ssub.s32 (%p50_p4), 11, %s135_s22  ;;  %s2086_s25 = smul.u32 (%p50_p4), 24, %s2603_s14 }
  0x13   : > { %p137_p7 = scmp.lt.s32.totalorder (%p50_p4), %s136_s24, 6  ;;  %s2804_s4 = scalar_lea.vmem (%p50_p4), [#allocation2], %s2163_s23  }
  0x14   : > { %s2800_s28 = scalar_lea.vmem %s3972_s1, %s2086_s25  }
  0x15   : > { %s4015_s24 = smov (!%p137_p7, %s136_s24), 6 }
  0x16   : > { %s139_s29 = smul.u32 72, %s4015_s24  ;;  %s2802_s30 = sshll.u32 %s4015_s24, 2 }
  0x18   : > { %p1789_p8 = scmp.eq.s32.totalorder %s139_s29, 0 }
  0x19   : > { %p147_p9 = scmp.lt.u32.totalorder (!%p1789_p8), %s2802_s30, 8 }
  0x1a   : > { %146 = sbr.rel (%p1789_p8) target bundleno = 234 (0xea), region = 32 }
  0x1f   : > { %150 = sbr.rel (%p147_p9) target bundleno = 208 (0xd0), region = 36  ;;  %s2808_s5 = sand.u32 (!%p147_p9), 7, %s2802_s30  }
  0x20   : > { %p201_p10 = scmp.eq.s32.totalorder (!%p147_p9), %s2808_s5, 0  ;;  %p1790_p11 = scmp.ne.s32.totalorder (!%p147_p9), %s2808_s5, 0 }
  0x24   : > { %204 = sbr.rel (%p1790_p11) target bundleno = 111 (0x6f), region = 51  ;;  %s205_s6 = sshrl.u32 (!%p1790_p11), %s2802_s30, 3 }
  0x25   : > { %s2815_s7 = sshrl.u32 (!%p1790_p11), %s205_s6, 1 }
  0x26   : > { %p1791_p12 = scmp.le.s32.totalorder (!%p1790_p11), %s2815_s7, 0 }
  0x29   : > { %1655 = sbr.rel (%p1791_p12) target bundleno = 83 (0x53), region = 229  ;;  %s3976_s8 = smov (!%p1791_p12), %s2804_s4 }
  0x2a   : > { %s3977_s9 = smov (!%p1791_p12), %s2800_s28  ;;  %s2824_s10 = smov (!%p1791_p12), 0  }
  0x2b   : > { %s2826_s11 = smov (!%p1791_p12), 0  }
  0x2e LB: >> { %v216_v0 = vld [vmem:[%s2611_s9] sm:$0xff]  ;;  %v218_v1 = vld [vmem:[%s2611_s9 + $0x8] sm:$0xff]  ;;  %s288_s17 = sadd.s32 1, %s2615_s10  ;;  %v222_v3 = vld [vmem:[%s2611_s9 + $0x34] sm:$0xff]  ;;  %s210_s11 = sadd.s32 1, %s2619_s11   ;;  %s2619_s11 = sphi %s2826_s11, %s210_s11   ;;  %s2615_s10 = sphi %s2824_s10, %s3980_s10   ;;  %s2611_s9 = sphi %s3977_s9, %s3979_s9   ;;  %s2607_s8 = sphi %s3976_s8, %s3978_s8  }
  0x2f   : >> { %v220_v2 = vld [vmem:[%s2611_s9 + $0x2c] sm:$0xff]  ;;  %217 = vst [vmem:[%s2607_s8] sm:$0xff] %v216_v0  ;;  %p289_p13 = scmp.ge.s32.totalorder %s288_s17, %s2815_s7  ;;  %v224_v4 = vld [vmem:[%s2611_s9 + $0x58] sm:$0xff]  ;;  %v226_v5 = vld [vmem:[%s2611_s9 + $0x60] sm:$0xff]  ;;  %p209_p0 = scmp.ge.s32.totalorder %s210_s11, %s2815_s7 }
  0x30   : >> { %219 = vst [vmem:[%s2607_s8 + $0x8] sm:$0xff] %v218_v1  ;;  %v228_v6 = vld [vmem:[%s2611_s9 + $0x84] sm:$0xff]  ;;  %v230_v7 = vld [vmem:[%s2611_s9 + $0x8c] sm:$0xff]  ;;  %v234_v9 = vld [vmem:[%s2611_s9 + $0xb8] sm:$0xff] }
  0x31   : >> { %221 = vst [vmem:[%s2607_s8 + $0x18] sm:$0xff] %v220_v2  ;;  %s4017_s17 = smov (%p289_p13, %s288_s17), 0  ;;  %v232_v8 = vld [vmem:[%s2611_s9 + $0xb0] sm:$0xff]  ;;  %v236_v10 = vld [vmem:[%s2611_s9 + $0xdc] sm:$0xff]  ;;  %v238_v11 = vld [vmem:[%s2611_s9 + $0xe4] sm:$0xff] }
  0x32   : >> { %223 = vst [vmem:[%s2607_s8 + $0x20] sm:$0xff] %v222_v3  ;;  %s1792_s18 = sshll.u32 %s4017_s17, 4  ;;  %v240_v12 = vld [vmem:[%s2611_s9 + $0x108] sm:$0xff]  ;;  %v242_v13 = vld [vmem:[%s2611_s9 + $0x110] sm:$0xff]  ;;  %v246_v15 = vld [vmem:[%s2611_s9 + $0x13c] sm:$0xff]  ;;  %s3980_s10 = smov %s4017_s17 }
  0x33   : >> { %225 = vst [vmem:[%s2607_s8 + $0x30] sm:$0xff] %v224_v4  ;;  %s2858_s21 = scalar_lea.vmem %s2800_s28, %s1792_s18   ;;  %s2861_s22 = scalar_lea.vmem %s2804_s4, %s1792_s18 [#allocation2]   ;;  %v244_v14 = vld [vmem:[%s2611_s9 + $0x134] sm:$0xff]  ;;  %v248_v16 = vld [vmem:[%s2611_s9 + $0x160] sm:$0xff]  ;;  %v250_v17 = vld [vmem:[%s2611_s9 + $0x168] sm:$0xff] }
  0x34   : >> { %227 = vst [vmem:[%s2607_s8 + $0x38] sm:$0xff] %v226_v5  ;;  %v252_v18 = vld [vmem:[%s2611_s9 + $0x18c] sm:$0xff]  ;;  %v254_v19 = vld [vmem:[%s2611_s9 + $0x194] sm:$0xff]  ;;  %v258_v21 = vld [vmem:[%s2611_s9 + $0x1c0] sm:$0xff] }
  0x35   : >> { %229 = vst [vmem:[%s2607_s8 + $0x48] sm:$0xff] %v228_v6  ;;  %v256_v20 = vld [vmem:[%s2611_s9 + $0x1b8] sm:$0xff]  ;;  %v260_v22 = vld [vmem:[%s2611_s9 + $0x1e4] sm:$0xff]  ;;  %v262_v23 = vld [vmem:[%s2611_s9 + $0x1ec] sm:$0xff] }
  0x36   : >> { %231 = vst [vmem:[%s2607_s8 + $0x50] sm:$0xff] %v230_v7  ;;  %v264_v24 = vld [vmem:[%s2611_s9 + $0x210] sm:$0xff]  ;;  %v266_v25 = vld [vmem:[%s2611_s9 + $0x218] sm:$0xff]  ;;  %v270_v27 = vld [vmem:[%s2611_s9 + $0x244] sm:$0xff] }
  0x37   : >> { %233 = vst [vmem:[%s2607_s8 + $0x60] sm:$0xff] %v232_v8  ;;  %v268_v26 = vld [vmem:[%s2611_s9 + $0x23c] sm:$0xff]  ;;  %v272_v28 = vld [vmem:[%s2611_s9 + $0x268] sm:$0xff]  ;;  %v274_v29 = vld [vmem:[%s2611_s9 + $0x270] sm:$0xff] }
  0x38   : >> { %235 = vst [vmem:[%s2607_s8 + $0x68] sm:$0xff] %v234_v9  ;;  %v276_v30 = vld [vmem:[%s2611_s9 + $0x294] sm:$0xff]  ;;  %v278_v31 = vld [vmem:[%s2611_s9 + $0x29c] sm:$0xff]  ;;  %v282_v33 = vld [vmem:[%s2611_s9 + $0x2c8] sm:$0xff] }
  0x39   : >> { %237 = vst [vmem:[%s2607_s8 + $0x78] sm:$0xff] %v236_v10  ;;  %v280_v32 = vld [vmem:[%s2611_s9 + $0x2c0] sm:$0xff]  ;;  %v284_v34 = vld [vmem:[%s2611_s9 + $0x2ec] sm:$0xff]  ;;  %v286_v35 = vld [vmem:[%s2611_s9 + $0x2f4] sm:$0xff]  ;;  %s3979_s9 = smov %s2858_s21 }
  0x3a   : >> { %239 = vst [vmem:[%s2607_s8 + $0x80] sm:$0xff] %v238_v11 }
  0x3b   : >> { %241 = vst [vmem:[%s2607_s8 + $0x90] sm:$0xff] %v240_v12 }
  0x3c   : >> { %243 = vst [vmem:[%s2607_s8 + $0x98] sm:$0xff] %v242_v13 }
  0x3d   : >> { %245 = vst [vmem:[%s2607_s8 + $0xa8] sm:$0xff] %v244_v14 }
  0x3e   : >> { %247 = vst [vmem:[%s2607_s8 + $0xb0] sm:$0xff] %v246_v15 }
  0x3f   : >> { %249 = vst [vmem:[%s2607_s8 + $0xc0] sm:$0xff] %v248_v16 }
  0x40   : >> { %251 = vst [vmem:[%s2607_s8 + $0xc8] sm:$0xff] %v250_v17 }
  0x41   : >> { %253 = vst [vmem:[%s2607_s8 + $0xd8] sm:$0xff] %v252_v18 }
  0x42   : >> { %255 = vst [vmem:[%s2607_s8 + $0xe0] sm:$0xff] %v254_v19 }
  0x43   : >> { %257 = vst [vmem:[%s2607_s8 + $0xf0] sm:$0xff] %v256_v20 }
  0x44   : >> { %259 = vst [vmem:[%s2607_s8 + $0xf8] sm:$0xff] %v258_v21 }
  0x45   : >> { %261 = vst [vmem:[%s2607_s8 + $0x108] sm:$0xff] %v260_v22 }
  0x46   : >> { %263 = vst [vmem:[%s2607_s8 + $0x110] sm:$0xff] %v262_v23 }
  0x47   : >> { %265 = vst [vmem:[%s2607_s8 + $0x120] sm:$0xff] %v264_v24 }
  0x48   : >> { %267 = vst [vmem:[%s2607_s8 + $0x128] sm:$0xff] %v266_v25 }
  0x49   : >> { %269 = vst [vmem:[%s2607_s8 + $0x138] sm:$0xff] %v268_v26 }
  0x4a   : >> { %271 = vst [vmem:[%s2607_s8 + $0x140] sm:$0xff] %v270_v27 }
  0x4b   : >> { %273 = vst [vmem:[%s2607_s8 + $0x150] sm:$0xff] %v272_v28 }
  0x4c   : >> { %275 = vst [vmem:[%s2607_s8 + $0x158] sm:$0xff] %v274_v29 }
  0x4d   : >> { %277 = vst [vmem:[%s2607_s8 + $0x168] sm:$0xff] %v276_v30 }
  0x4e   : >> { %279 = vst [vmem:[%s2607_s8 + $0x170] sm:$0xff] %v278_v31  ;;  %212 = sbr.rel (!%p209_p0) target bundleno = 46 (0x2e), region = 235 }
  0x4f   : >> { %281 = vst [vmem:[%s2607_s8 + $0x180] sm:$0xff] %v280_v32 }
  0x50   : >> { %283 = vst [vmem:[%s2607_s8 + $0x188] sm:$0xff] %v282_v33 }
  0x51   : >> { %285 = vst [vmem:[%s2607_s8 + $0x198] sm:$0xff] %v284_v34 }
  0x52   : >> { %287 = vst [vmem:[%s2607_s8 + $0x1a0] sm:$0xff] %v286_v35  ;;  %s3978_s8 = smov %s2861_s22 }
  0x53 PF: > { %s2935_s23 = sand.u32 1, %s205_s6   ;;  %s2087_s24 = sshll.u32 %s2815_s7, 4 }
  0x54   : > { %s2939_s25 = scalar_lea.vmem %s2800_s28, %s2087_s24   ;;  %s2942_s26 = scalar_lea.vmem %s2804_s4, %s2087_s24 [#allocation2]  }
  0x55   : > { %p1797_p1 = scmp.le.s32.totalorder %s2935_s23, 0 }
  0x56   : > { %s3981_s27 = smov (!%p1797_p1), %s2942_s26  ;;  %s3982_s29 = smov (!%p1797_p1), %s2939_s25 }
  0x57   : > { %1669 = sbr.rel (%p1797_p1) target bundleno = 111 (0x6f), region = 240  ;;  %s2951_s8 = smov (!%p1797_p1), 0  }
  0x58   : > { %s2953_s9 = smov (!%p1797_p1), 0  }
  0x5c LB: >> { %v311_v36 = vld [vmem:[%s2627_s29] sm:$0xff]  ;;  %v313_v37 = vld [vmem:[%s2627_s29 + $0x2c] sm:$0xff]  ;;  %v315_v38 = vld [vmem:[%s2627_s29 + $0x58] sm:$0xff]  ;;  %s347_s6 = sadd.s32 1, %s2631_s8  ;;  %s305_s9 = sadd.s32 1, %s2635_s9   ;;  %s2635_s9 = sphi %s2953_s9, %s305_s9   ;;  %s2631_s8 = sphi %s2951_s8, %s3985_s8   ;;  %s2627_s29 = sphi %s3982_s29, %s3984_s29   ;;  %s2623_s27 = sphi %s3981_s27, %s3983_s27  }
  0x5d   : >> { %312 = vst [vmem:[%s2623_s27] sm:$0xff] %v311_v36  ;;  %v317_v39 = vld [vmem:[%s2627_s29 + $0x84] sm:$0xff]  ;;  %p348_p2 = scmp.ge.s32.totalorder %s347_s6, %s2935_s23  ;;  %v319_v40 = vld [vmem:[%s2627_s29 + $0xb0] sm:$0xff]  ;;  %v321_v41 = vld [vmem:[%s2627_s29 + $0xdc] sm:$0xff]  ;;  %p304_p3 = scmp.ge.s32.totalorder %s305_s9, %s2935_s23 }
  0x5e   : >> { %314 = vst [vmem:[%s2623_s27 + $0x18] sm:$0xff] %v313_v37  ;;  %v323_v42 = vld [vmem:[%s2627_s29 + $0x108] sm:$0xff]  ;;  %v325_v43 = vld [vmem:[%s2627_s29 + $0x134] sm:$0xff]  ;;  %v327_v44 = vld [vmem:[%s2627_s29 + $0x160] sm:$0xff] }
  0x5f   : >> { %316 = vst [vmem:[%s2623_s27 + $0x30] sm:$0xff] %v315_v38  ;;  %s4019_s6 = smov (%p348_p2, %s347_s6), 0  ;;  %v329_v45 = vld [vmem:[%s2627_s29 + $0x18c] sm:$0xff]  ;;  %v331_v46 = vld [vmem:[%s2627_s29 + $0x1b8] sm:$0xff]  ;;  %v333_v47 = vld [vmem:[%s2627_s29 + $0x1e4] sm:$0xff] }
  0x60   : >> { %318 = vst [vmem:[%s2623_s27 + $0x48] sm:$0xff] %v317_v39  ;;  %s1798_s7 = sshll.u32 %s4019_s6, 3  ;;  %v335_v48 = vld [vmem:[%s2627_s29 + $0x210] sm:$0xff]  ;;  %v337_v49 = vld [vmem:[%s2627_s29 + $0x23c] sm:$0xff]  ;;  %v339_v50 = vld [vmem:[%s2627_s29 + $0x268] sm:$0xff]  ;;  %s3985_s8 = smov %s4019_s6 }
  0x61   : >> { %320 = vst [vmem:[%s2623_s27 + $0x60] sm:$0xff] %v319_v40  ;;  %s352_s10 = scalar_lea.vmem %s2939_s25, %s1798_s7   ;;  %s353_s11 = scalar_lea.vmem %s2942_s26, %s1798_s7 [#allocation2]   ;;  %v341_v51 = vld [vmem:[%s2627_s29 + $0x294] sm:$0xff]  ;;  %v343_v52 = vld [vmem:[%s2627_s29 + $0x2c0] sm:$0xff]  ;;  %v345_v53 = vld [vmem:[%s2627_s29 + $0x2ec] sm:$0xff] }
  0x62   : >> { %322 = vst [vmem:[%s2623_s27 + $0x78] sm:$0xff] %v321_v41  ;;  %s3984_s29 = smov %s352_s10 }
  0x63   : >> { %324 = vst [vmem:[%s2623_s27 + $0x90] sm:$0xff] %v323_v42 }
  0x64   : >> { %326 = vst [vmem:[%s2623_s27 + $0xa8] sm:$0xff] %v325_v43 }
  0x65   : >> { %328 = vst [vmem:[%s2623_s27 + $0xc0] sm:$0xff] %v327_v44 }
  0x66   : >> { %330 = vst [vmem:[%s2623_s27 + $0xd8] sm:$0xff] %v329_v45 }
  0x67   : >> { %332 = vst [vmem:[%s2623_s27 + $0xf0] sm:$0xff] %v331_v46 }
  0x68   : >> { %334 = vst [vmem:[%s2623_s27 + $0x108] sm:$0xff] %v333_v47 }
  0x69   : >> { %336 = vst [vmem:[%s2623_s27 + $0x120] sm:$0xff] %v335_v48 }
  0x6a   : >> { %338 = vst [vmem:[%s2623_s27 + $0x138] sm:$0xff] %v337_v49  ;;  %307 = sbr.rel (!%p304_p3) target bundleno = 92 (0x5c), region = 246 }
  0x6b   : >> { %340 = vst [vmem:[%s2623_s27 + $0x150] sm:$0xff] %v339_v50 }
  0x6c   : >> { %342 = vst [vmem:[%s2623_s27 + $0x168] sm:$0xff] %v341_v51 }
  0x6d   : >> { %344 = vst [vmem:[%s2623_s27 + $0x180] sm:$0xff] %v343_v52 }
  0x6e   : >> { %346 = vst [vmem:[%s2623_s27 + $0x198] sm:$0xff] %v345_v53  ;;  %s3983_s27 = smov %s353_s11 }
  0x6f PF: > { %356 = sbr.rel (%p201_p10) target bundleno = 208 (0xd0), region = 69  ;;  %s358_s17 = ssub.s32 (!%p201_p10), %s2802_s30, %s2808_s5 }
  0x70   : > { %s362_s18 = sshrl.u32 (!%p201_p10), %s2802_s30, 3  ;;  %s3024_s21 = scalar_lea.vmem (!%p201_p10), %s2800_s28, %s358_s17 }
  0x71   : > { %s3027_s22 = scalar_lea.vmem (!%p201_p10), %s2804_s4, %s358_s17 [#allocation2]  ;;  %s3031_s24 = sshrl.u32 (!%p201_p10), %s362_s18, 1 }
  0x72   : > { %p1800_p4 = scmp.le.s32.totalorder (!%p201_p10), %s3031_s24, 0 }
  0x74   : > { %1683 = sbr.rel (%p1800_p4) target bundleno = 158 (0x9e), region = 251  ;;  %s3986_s23 = smov (!%p1800_p4), %s2804_s4 }
  0x75   : > { %s3987_s25 = smov (!%p1800_p4), %s2800_s28  ;;  %s3040_s26 = smov (!%p1800_p4), 0  }
  0x76   : > { %s3042_s27 = smov (!%p1800_p4), 0  }
  0x79 LB: >> { %v373_v54 = vld [vmem:[%s2643_s25] sm:$0xff]  ;;  %v375_v55 = vld [vmem:[%s2643_s25 + $0x8] sm:$0xff]  ;;  %s445_s29 = sadd.s32 1, %s2647_s26  ;;  %v379_v57 = vld [vmem:[%s2643_s25 + $0x34] sm:$0xff]  ;;  %s367_s27 = sadd.s32 1, %s2651_s27   ;;  %s2651_s27 = sphi %s3042_s27, %s367_s27   ;;  %s2647_s26 = sphi %s3040_s26, %s3990_s26   ;;  %s2643_s25 = sphi %s3987_s25, %s3989_s25   ;;  %s2639_s23 = sphi %s3986_s23, %s3988_s23  }
  0x7a   : >> { %v377_v56 = vld [vmem:[%s2643_s25 + $0x2c] sm:$0xff]  ;;  %374 = vst [vmem:[%s2639_s23] sm:$0xff] %v373_v54  ;;  %p446_p6 = scmp.ge.s32.totalorder %s445_s29, %s3031_s24  ;;  %v381_v58 = vld [vmem:[%s2643_s25 + $0x58] sm:$0xff]  ;;  %v383_v59 = vld [vmem:[%s2643_s25 + $0x60] sm:$0xff]  ;;  %p366_p7 = scmp.ge.s32.totalorder %s367_s27, %s3031_s24 }
  0x7b   : >> { %376 = vst [vmem:[%s2639_s23 + $0x8] sm:$0xff] %v375_v55  ;;  %v385_v60 = vld [vmem:[%s2643_s25 + $0x84] sm:$0xff]  ;;  %v387_v61 = vld [vmem:[%s2643_s25 + $0x8c] sm:$0xff]  ;;  %v391_v63 = vld [vmem:[%s2643_s25 + $0xb8] sm:$0xff] }
  0x7c   : >> { %378 = vst [vmem:[%s2639_s23 + $0x18] sm:$0xff] %v377_v56  ;;  %s4021_s29 = smov (%p446_p6, %s445_s29), 0  ;;  %v389_v62 = vld [vmem:[%s2643_s25 + $0xb0] sm:$0xff]  ;;  %v393_v0 = vld [vmem:[%s2643_s25 + $0xdc] sm:$0xff]  ;;  %v395_v1 = vld [vmem:[%s2643_s25 + $0xe4] sm:$0xff] }
  0x7d   : >> { %380 = vst [vmem:[%s2639_s23 + $0x20] sm:$0xff] %v379_v57  ;;  %s1801_s8 = sshll.u32 %s4021_s29, 4  ;;  %v397_v2 = vld [vmem:[%s2643_s25 + $0x108] sm:$0xff]  ;;  %v399_v3 = vld [vmem:[%s2643_s25 + $0x110] sm:$0xff]  ;;  %v403_v5 = vld [vmem:[%s2643_s25 + $0x13c] sm:$0xff]  ;;  %s3990_s26 = smov %s4021_s29 }
  0x7e   : >> { %382 = vst [vmem:[%s2639_s23 + $0x30] sm:$0xff] %v381_v58  ;;  %s3074_s9 = scalar_lea.vmem %s2800_s28, %s1801_s8   ;;  %s3077_s6 = scalar_lea.vmem %s2804_s4, %s1801_s8 [#allocation2]   ;;  %v401_v4 = vld [vmem:[%s2643_s25 + $0x134] sm:$0xff]  ;;  %v405_v6 = vld [vmem:[%s2643_s25 + $0x160] sm:$0xff]  ;;  %v407_v7 = vld [vmem:[%s2643_s25 + $0x168] sm:$0xff] }
  0x7f   : >> { %384 = vst [vmem:[%s2639_s23 + $0x38] sm:$0xff] %v383_v59  ;;  %v409_v8 = vld [vmem:[%s2643_s25 + $0x18c] sm:$0xff]  ;;  %v411_v9 = vld [vmem:[%s2643_s25 + $0x194] sm:$0xff]  ;;  %v415_v11 = vld [vmem:[%s2643_s25 + $0x1c0] sm:$0xff] }
  0x80   : >> { %386 = vst [vmem:[%s2639_s23 + $0x48] sm:$0xff] %v385_v60  ;;  %v413_v10 = vld [vmem:[%s2643_s25 + $0x1b8] sm:$0xff]  ;;  %v417_v12 = vld [vmem:[%s2643_s25 + $0x1e4] sm:$0xff]  ;;  %v419_v13 = vld [vmem:[%s2643_s25 + $0x1ec] sm:$0xff] }
  0x81   : >> { %388 = vst [vmem:[%s2639_s23 + $0x50] sm:$0xff] %v387_v61  ;;  %v421_v14 = vld [vmem:[%s2643_s25 + $0x210] sm:$0xff]  ;;  %v423_v15 = vld [vmem:[%s2643_s25 + $0x218] sm:$0xff]  ;;  %v427_v17 = vld [vmem:[%s2643_s25 + $0x244] sm:$0xff] }
  0x82   : >> { %390 = vst [vmem:[%s2639_s23 + $0x60] sm:$0xff] %v389_v62  ;;  %v425_v16 = vld [vmem:[%s2643_s25 + $0x23c] sm:$0xff]  ;;  %v429_v18 = vld [vmem:[%s2643_s25 + $0x268] sm:$0xff]  ;;  %v431_v19 = vld [vmem:[%s2643_s25 + $0x270] sm:$0xff] }
  0x83   : >> { %392 = vst [vmem:[%s2639_s23 + $0x68] sm:$0xff] %v391_v63  ;;  %v433_v20 = vld [vmem:[%s2643_s25 + $0x294] sm:$0xff]  ;;  %v435_v21 = vld [vmem:[%s2643_s25 + $0x29c] sm:$0xff]  ;;  %v439_v23 = vld [vmem:[%s2643_s25 + $0x2c8] sm:$0xff] }
  0x84   : >> { %394 = vst [vmem:[%s2639_s23 + $0x78] sm:$0xff] %v393_v0  ;;  %v437_v22 = vld [vmem:[%s2643_s25 + $0x2c0] sm:$0xff]  ;;  %v441_v24 = vld [vmem:[%s2643_s25 + $0x2ec] sm:$0xff]  ;;  %v443_v25 = vld [vmem:[%s2643_s25 + $0x2f4] sm:$0xff]  ;;  %s3989_s25 = smov %s3074_s9 }
  0x85   : >> { %396 = vst [vmem:[%s2639_s23 + $0x80] sm:$0xff] %v395_v1 }
  0x86   : >> { %398 = vst [vmem:[%s2639_s23 + $0x90] sm:$0xff] %v397_v2 }
  0x87   : >> { %400 = vst [vmem:[%s2639_s23 + $0x98] sm:$0xff] %v399_v3 }
  0x88   : >> { %402 = vst [vmem:[%s2639_s23 + $0xa8] sm:$0xff] %v401_v4 }
  0x89   : >> { %404 = vst [vmem:[%s2639_s23 + $0xb0] sm:$0xff] %v403_v5 }
  0x8a   : >> { %406 = vst [vmem:[%s2639_s23 + $0xc0] sm:$0xff] %v405_v6 }
  0x8b   : >> { %408 = vst [vmem:[%s2639_s23 + $0xc8] sm:$0xff] %v407_v7 }
  0x8c   : >> { %410 = vst [vmem:[%s2639_s23 + $0xd8] sm:$0xff] %v409_v8 }
  0x8d   : >> { %412 = vst [vmem:[%s2639_s23 + $0xe0] sm:$0xff] %v411_v9 }
  0x8e   : >> { %414 = vst [vmem:[%s2639_s23 + $0xf0] sm:$0xff] %v413_v10 }
  0x8f   : >> { %416 = vst [vmem:[%s2639_s23 + $0xf8] sm:$0xff] %v415_v11 }
  0x90   : >> { %418 = vst [vmem:[%s2639_s23 + $0x108] sm:$0xff] %v417_v12 }
  0x91   : >> { %420 = vst [vmem:[%s2639_s23 + $0x110] sm:$0xff] %v419_v13 }
  0x92   : >> { %422 = vst [vmem:[%s2639_s23 + $0x120] sm:$0xff] %v421_v14 }
  0x93   : >> { %424 = vst [vmem:[%s2639_s23 + $0x128] sm:$0xff] %v423_v15 }
  0x94   : >> { %426 = vst [vmem:[%s2639_s23 + $0x138] sm:$0xff] %v425_v16 }
  0x95   : >> { %428 = vst [vmem:[%s2639_s23 + $0x140] sm:$0xff] %v427_v17 }
  0x96   : >> { %430 = vst [vmem:[%s2639_s23 + $0x150] sm:$0xff] %v429_v18 }
  0x97   : >> { %432 = vst [vmem:[%s2639_s23 + $0x158] sm:$0xff] %v431_v19 }
  0x98   : >> { %434 = vst [vmem:[%s2639_s23 + $0x168] sm:$0xff] %v433_v20 }
  0x99   : >> { %436 = vst [vmem:[%s2639_s23 + $0x170] sm:$0xff] %v435_v21  ;;  %369 = sbr.rel (!%p366_p7) target bundleno = 121 (0x79), region = 257 }
  0x9a   : >> { %438 = vst [vmem:[%s2639_s23 + $0x180] sm:$0xff] %v437_v22 }
  0x9b   : >> { %440 = vst [vmem:[%s2639_s23 + $0x188] sm:$0xff] %v439_v23 }
  0x9c   : >> { %442 = vst [vmem:[%s2639_s23 + $0x198] sm:$0xff] %v441_v24 }
  0x9d   : >> { %444 = vst [vmem:[%s2639_s23 + $0x1a0] sm:$0xff] %v443_v25  ;;  %s3988_s23 = smov %s3077_s6 }
  0x9e PF: > { %s3151_s7 = sand.u32 1, %s362_s18   ;;  %s2089_s10 = sshll.u32 %s3031_s24, 4 }
  0x9f   : > { %s3155_s11 = scalar_lea.vmem %s2800_s28, %s2089_s10   ;;  %s3158_s17 = scalar_lea.vmem %s2804_s4, %s2089_s10 [#allocation2]  }
  0xa0   : > { %p1806_p8 = scmp.le.s32.totalorder %s3151_s7, 0 }
  0xa1   : > { %s3991_s27 = smov (!%p1806_p8), %s3158_s17  ;;  %s3992_s23 = smov (!%p1806_p8), %s3155_s11 }
  0xa2   : > { %1697 = sbr.rel (%p1806_p8) target bundleno = 186 (0xba), region = 262  ;;  %s3167_s25 = smov (!%p1806_p8), 0  }
  0xa3   : > { %s3169_s26 = smov (!%p1806_p8), 0  }
  0xa7 LB: >> { %v468_v26 = vld [vmem:[%s2659_s23] sm:$0xff]  ;;  %v470_v27 = vld [vmem:[%s2659_s23 + $0x2c] sm:$0xff]  ;;  %v472_v28 = vld [vmem:[%s2659_s23 + $0x58] sm:$0xff]  ;;  %s504_s18 = sadd.s32 1, %s2663_s25  ;;  %s462_s26 = sadd.s32 1, %s2667_s26   ;;  %s2667_s26 = sphi %s3169_s26, %s462_s26   ;;  %s2663_s25 = sphi %s3167_s25, %s3995_s25   ;;  %s2659_s23 = sphi %s3992_s23, %s3994_s23   ;;  %s2655_s27 = sphi %s3991_s27, %s3993_s27  }
  0xa8   : >> { %469 = vst [vmem:[%s2655_s27] sm:$0xff] %v468_v26  ;;  %v474_v29 = vld [vmem:[%s2659_s23 + $0x84] sm:$0xff]  ;;  %p505_p9 = scmp.ge.s32.totalorder %s504_s18, %s3151_s7  ;;  %v476_v30 = vld [vmem:[%s2659_s23 + $0xb0] sm:$0xff]  ;;  %v478_v31 = vld [vmem:[%s2659_s23 + $0xdc] sm:$0xff]  ;;  %p461_p10 = scmp.ge.s32.totalorder %s462_s26, %s3151_s7 }
  0xa9   : >> { %471 = vst [vmem:[%s2655_s27 + $0x18] sm:$0xff] %v470_v27  ;;  %v480_v32 = vld [vmem:[%s2659_s23 + $0x108] sm:$0xff]  ;;  %v482_v33 = vld [vmem:[%s2659_s23 + $0x134] sm:$0xff]  ;;  %v484_v34 = vld [vmem:[%s2659_s23 + $0x160] sm:$0xff] }
  0xaa   : >> { %473 = vst [vmem:[%s2655_s27 + $0x30] sm:$0xff] %v472_v28  ;;  %s4023_s18 = smov (%p505_p9, %s504_s18), 0  ;;  %v486_v35 = vld [vmem:[%s2659_s23 + $0x18c] sm:$0xff]  ;;  %v488_v36 = vld [vmem:[%s2659_s23 + $0x1b8] sm:$0xff]  ;;  %v490_v37 = vld [vmem:[%s2659_s23 + $0x1e4] sm:$0xff] }
  0xab   : >> { %475 = vst [vmem:[%s2655_s27 + $0x48] sm:$0xff] %v474_v29  ;;  %s1807_s24 = sshll.u32 %s4023_s18, 3  ;;  %v492_v38 = vld [vmem:[%s2659_s23 + $0x210] sm:$0xff]  ;;  %v494_v39 = vld [vmem:[%s2659_s23 + $0x23c] sm:$0xff]  ;;  %v496_v40 = vld [vmem:[%s2659_s23 + $0x268] sm:$0xff]  ;;  %s3995_s25 = smov %s4023_s18 }
  0xac   : >> { %477 = vst [vmem:[%s2655_s27 + $0x60] sm:$0xff] %v476_v30  ;;  %s509_s29 = scalar_lea.vmem %s3155_s11, %s1807_s24   ;;  %s510_s8 = scalar_lea.vmem %s3158_s17, %s1807_s24 [#allocation2]   ;;  %v498_v41 = vld [vmem:[%s2659_s23 + $0x294] sm:$0xff]  ;;  %v500_v42 = vld [vmem:[%s2659_s23 + $0x2c0] sm:$0xff]  ;;  %v502_v43 = vld [vmem:[%s2659_s23 + $0x2ec] sm:$0xff] }
  0xad   : >> { %479 = vst [vmem:[%s2655_s27 + $0x78] sm:$0xff] %v478_v31  ;;  %s3994_s23 = smov %s509_s29 }
  0xae   : >> { %481 = vst [vmem:[%s2655_s27 + $0x90] sm:$0xff] %v480_v32 }
  0xaf   : >> { %483 = vst [vmem:[%s2655_s27 + $0xa8] sm:$0xff] %v482_v33 }
  0xb0   : >> { %485 = vst [vmem:[%s2655_s27 + $0xc0] sm:$0xff] %v484_v34 }
  0xb1   : >> { %487 = vst [vmem:[%s2655_s27 + $0xd8] sm:$0xff] %v486_v35 }
  0xb2   : >> { %489 = vst [vmem:[%s2655_s27 + $0xf0] sm:$0xff] %v488_v36 }
  0xb3   : >> { %491 = vst [vmem:[%s2655_s27 + $0x108] sm:$0xff] %v490_v37 }
  0xb4   : >> { %493 = vst [vmem:[%s2655_s27 + $0x120] sm:$0xff] %v492_v38 }
  0xb5   : >> { %495 = vst [vmem:[%s2655_s27 + $0x138] sm:$0xff] %v494_v39  ;;  %464 = sbr.rel (!%p461_p10) target bundleno = 167 (0xa7), region = 268 }
  0xb6   : >> { %497 = vst [vmem:[%s2655_s27 + $0x150] sm:$0xff] %v496_v40 }
  0xb7   : >> { %499 = vst [vmem:[%s2655_s27 + $0x168] sm:$0xff] %v498_v41 }
  0xb8   : >> { %501 = vst [vmem:[%s2655_s27 + $0x180] sm:$0xff] %v500_v42 }
  0xb9   : >> { %503 = vst [vmem:[%s2655_s27 + $0x198] sm:$0xff] %v502_v43  ;;  %s3993_s27 = smov %s510_s8 }
  0xba PF: > { %s2733_s9 = smov 1  }
  0xbb   : > { %s511_s6 = sshll.u32 %s2733_s9, %s2808_s5 }
  0xbc   : > { %s3235_s10 = sadd.s32 4294967295, %s511_s6 }
  0xbd   : > { %v521_v44 = vld [vmem:[%s3024_s21] sm:%s3235_s10]  ;;  %v523_v45 = vld [vmem:[%s3024_s21 + $0x2c] sm:%s3235_s10] }
  0xbe   : > { %522 = vst [vmem:[%s3027_s22] sm:%s3235_s10] %v521_v44  ;;  %v525_v46 = vld [vmem:[%s3024_s21 + $0x58] sm:%s3235_s10] }
  0xbf   : > { %524 = vst [vmem:[%s3027_s22 + $0x18] sm:%s3235_s10] %v523_v45  ;;  %v527_v47 = vld [vmem:[%s3024_s21 + $0x84] sm:%s3235_s10] }
  0xc0   : > { %526 = vst [vmem:[%s3027_s22 + $0x30] sm:%s3235_s10] %v525_v46  ;;  %v529_v48 = vld [vmem:[%s3024_s21 + $0xb0] sm:%s3235_s10] }
  0xc1   : > { %528 = vst [vmem:[%s3027_s22 + $0x48] sm:%s3235_s10] %v527_v47  ;;  %v531_v49 = vld [vmem:[%s3024_s21 + $0xdc] sm:%s3235_s10] }
  0xc2   : > { %530 = vst [vmem:[%s3027_s22 + $0x60] sm:%s3235_s10] %v529_v48  ;;  %v533_v50 = vld [vmem:[%s3024_s21 + $0x108] sm:%s3235_s10] }
  0xc3   : > { %532 = vst [vmem:[%s3027_s22 + $0x78] sm:%s3235_s10] %v531_v49  ;;  %v535_v51 = vld [vmem:[%s3024_s21 + $0x134] sm:%s3235_s10] }
  0xc4   : > { %534 = vst [vmem:[%s3027_s22 + $0x90] sm:%s3235_s10] %v533_v50  ;;  %v537_v52 = vld [vmem:[%s3024_s21 + $0x160] sm:%s3235_s10] }
  0xc5   : > { %536 = vst [vmem:[%s3027_s22 + $0xa8] sm:%s3235_s10] %v535_v51  ;;  %v539_v53 = vld [vmem:[%s3024_s21 + $0x18c] sm:%s3235_s10] }
  0xc6   : > { %538 = vst [vmem:[%s3027_s22 + $0xc0] sm:%s3235_s10] %v537_v52  ;;  %v541_v54 = vld [vmem:[%s3024_s21 + $0x1b8] sm:%s3235_s10] }
  0xc7   : > { %540 = vst [vmem:[%s3027_s22 + $0xd8] sm:%s3235_s10] %v539_v53  ;;  %v543_v55 = vld [vmem:[%s3024_s21 + $0x1e4] sm:%s3235_s10] }
  0xc8   : > { %542 = vst [vmem:[%s3027_s22 + $0xf0] sm:%s3235_s10] %v541_v54  ;;  %v545_v56 = vld [vmem:[%s3024_s21 + $0x210] sm:%s3235_s10] }
  0xc9   : > { %544 = vst [vmem:[%s3027_s22 + $0x108] sm:%s3235_s10] %v543_v55  ;;  %v547_v57 = vld [vmem:[%s3024_s21 + $0x23c] sm:%s3235_s10] }
  0xca   : > { %546 = vst [vmem:[%s3027_s22 + $0x120] sm:%s3235_s10] %v545_v56  ;;  %v549_v58 = vld [vmem:[%s3024_s21 + $0x268] sm:%s3235_s10] }
  0xcb   : > { %548 = vst [vmem:[%s3027_s22 + $0x138] sm:%s3235_s10] %v547_v57  ;;  %v551_v59 = vld [vmem:[%s3024_s21 + $0x294] sm:%s3235_s10] }
  0xcc   : > { %550 = vst [vmem:[%s3027_s22 + $0x150] sm:%s3235_s10] %v549_v58  ;;  %v553_v60 = vld [vmem:[%s3024_s21 + $0x2c0] sm:%s3235_s10] }
  0xcd   : > { %552 = vst [vmem:[%s3027_s22 + $0x168] sm:%s3235_s10] %v551_v59  ;;  %v555_v61 = vld [vmem:[%s3024_s21 + $0x2ec] sm:%s3235_s10] }
  0xce   : > { %554 = vst [vmem:[%s3027_s22 + $0x180] sm:%s3235_s10] %v553_v60 }
  0xcf   : > { %556 = vst [vmem:[%s3027_s22 + $0x198] sm:%s3235_s10] %v555_v61 }
  0xd0 PF: > { %p1810_p11 = scmp.ge.u32.totalorder %s2802_s30, 8 }
  0xd1   : > { %s2734_s5 = smov (!%p1810_p11), 1  }
  0xd2   : > { %153 = sbr.rel (%p1810_p11) target bundleno = 234 (0xea), region = 40  ;;  %s154_s21 = sshll.u32 (!%p1810_p11), %s2734_s5, %s2802_s30 }
  0xd3   : > { %s3311_s22 = sadd.s32 (!%p1810_p11), 4294967295, %s154_s21 }
  0xd7   : > { %v164_v62 = vld [vmem:[%s2800_s28] sm:%s3311_s22]  ;;  %v166_v63 = vld [vmem:[%s2800_s28 + $0x2c] sm:%s3311_s22] }
  0xd8   : > { %165 = vst [vmem:[%s2804_s4] sm:%s3311_s22] %v164_v62  ;;  %v168_v0 = vld [vmem:[%s2800_s28 + $0x58] sm:%s3311_s22] }
  0xd9   : > { %167 = vst [vmem:[%s2804_s4 + $0x18] sm:%s3311_s22] %v166_v63  ;;  %v170_v1 = vld [vmem:[%s2800_s28 + $0x84] sm:%s3311_s22] }
  0xda   : > { %169 = vst [vmem:[%s2804_s4 + $0x30] sm:%s3311_s22] %v168_v0  ;;  %v172_v2 = vld [vmem:[%s2800_s28 + $0xb0] sm:%s3311_s22] }
  0xdb   : > { %171 = vst [vmem:[%s2804_s4 + $0x48] sm:%s3311_s22] %v170_v1  ;;  %v174_v3 = vld [vmem:[%s2800_s28 + $0xdc] sm:%s3311_s22] }
  0xdc   : > { %173 = vst [vmem:[%s2804_s4 + $0x60] sm:%s3311_s22] %v172_v2  ;;  %v176_v4 = vld [vmem:[%s2800_s28 + $0x108] sm:%s3311_s22] }
  0xdd   : > { %175 = vst [vmem:[%s2804_s4 + $0x78] sm:%s3311_s22] %v174_v3  ;;  %v178_v5 = vld [vmem:[%s2800_s28 + $0x134] sm:%s3311_s22] }
  0xde   : > { %177 = vst [vmem:[%s2804_s4 + $0x90] sm:%s3311_s22] %v176_v4  ;;  %v180_v6 = vld [vmem:[%s2800_s28 + $0x160] sm:%s3311_s22] }
  0xdf   : > { %179 = vst [vmem:[%s2804_s4 + $0xa8] sm:%s3311_s22] %v178_v5  ;;  %v182_v7 = vld [vmem:[%s2800_s28 + $0x18c] sm:%s3311_s22] }
  0xe0   : > { %181 = vst [vmem:[%s2804_s4 + $0xc0] sm:%s3311_s22] %v180_v6  ;;  %v184_v8 = vld [vmem:[%s2800_s28 + $0x1b8] sm:%s3311_s22] }
  0xe1   : > { %183 = vst [vmem:[%s2804_s4 + $0xd8] sm:%s3311_s22] %v182_v7  ;;  %v186_v9 = vld [vmem:[%s2800_s28 + $0x1e4] sm:%s3311_s22] }
  0xe2   : > { %185 = vst [vmem:[%s2804_s4 + $0xf0] sm:%s3311_s22] %v184_v8  ;;  %v188_v10 = vld [vmem:[%s2800_s28 + $0x210] sm:%s3311_s22] }
  0xe3   : > { %187 = vst [vmem:[%s2804_s4 + $0x108] sm:%s3311_s22] %v186_v9  ;;  %v190_v11 = vld [vmem:[%s2800_s28 + $0x23c] sm:%s3311_s22] }
  0xe4   : > { %189 = vst [vmem:[%s2804_s4 + $0x120] sm:%s3311_s22] %v188_v10  ;;  %v192_v12 = vld [vmem:[%s2800_s28 + $0x268] sm:%s3311_s22] }
  0xe5   : > { %191 = vst [vmem:[%s2804_s4 + $0x138] sm:%s3311_s22] %v190_v11  ;;  %v194_v13 = vld [vmem:[%s2800_s28 + $0x294] sm:%s3311_s22] }
  0xe6   : > { %193 = vst [vmem:[%s2804_s4 + $0x150] sm:%s3311_s22] %v192_v12  ;;  %v196_v14 = vld [vmem:[%s2800_s28 + $0x2c0] sm:%s3311_s22] }
  0xe7   : > { %195 = vst [vmem:[%s2804_s4 + $0x168] sm:%s3311_s22] %v194_v13  ;;  %v198_v15 = vld [vmem:[%s2800_s28 + $0x2ec] sm:%s3311_s22] }
  0xe8   : > { %197 = vst [vmem:[%s2804_s4 + $0x180] sm:%s3311_s22] %v196_v14 }
  0xe9   : > { %199 = vst [vmem:[%s2804_s4 + $0x198] sm:%s3311_s22] %v198_v15 }
  0xea PF: > { %p1812_p12 = scmp.ge.s32.totalorder %s2603_s14, 1  ;;  %p559_p13 = scmp.lt.s32.totalorder %s2603_s14, 3 }
  0xec   : > { %p560_p0 = pnand %p1812_p12, %p559_p13 }
  0xed   : > { %s566_s30 = sand.u32 (!%p560_p0), 1, %s2595_s12  }
  0xee   : > { %563 = sbr.rel (%p560_p0) target bundleno = 647 (0x287), region = 94 }
  0xef   : > { %s2164_s7 = smul.u32 (!%p560_p0), 432, %s566_s30 }
  0xf1   : > { %s3396_s27 = scalar_lea.vmem (!%p560_p0), [#allocation2], %s2164_s7 }
  0xf3   : > { %v2091_v16 = vld [vmem:[%s3971_s0 + $0x4] sm:$0xf]  ;;  %v1817_v17 = vld [vmem:[%s3971_s0 + $0x8] sm:$0xf0]  ;;  %vm969_vm0 = vcmask 130048   ;;  %s1259_s12 = smul.u32 (%p2789_p5), 6, %s2774_s15 }
  0xf4   : > { %v1999_v18 = vld [vmem:[%s3396_s27 + $0x150] sm:$0xf]  ;;  %v2140_v19 = vld [vmem:[%s3396_s27 + $0x164] sm:$0xf0]  ;;  %v2023_v20 = vld [vmem:[%s3396_s27 + $0x180] sm:$0xf]  ;;  %v3407_v31 = vor.u32 %v2091_v16, %v1817_v17 }
  0xf5   : > { %v2000_v21 = vor.u32 %v2140_v19, %v1999_v18  ;;  %v2146_v22 = vld [vmem:[%s3396_s27 + $0x194] sm:$0xf0]  ;;  %v2137_v23 = vld [vmem:[%s3396_s27 + $0x154] sm:$0xf]  ;;  %v2001_v24 = vld [vmem:[%s3396_s27 + $0x168] sm:$0xf0] }
  0xf6   : > { %v2024_v25 = vor.u32 %v2146_v22, %v2023_v20  ;;  %v2004_v26 = vor.u32 %v2137_v23, %v2001_v24  ;;  %v2143_v27 = vld [vmem:[%s3396_s27 + $0x184] sm:$0xf]  ;;  %v2025_v28 = vld [vmem:[%s3396_s27 + $0x198] sm:$0xf0]  ;;  %v2031_v29 = vld [vmem:[%s3396_s27 + $0x188] sm:$0xf] }
  0xf7   : > { %976 = vmatpush.bf16.msra.mxu0 %v2000_v21  ;;  %v2028_v30 = vor.u32 %v2143_v27, %v2025_v28  ;;  %v2147_v32 = vld [vmem:[%s3396_s27 + $0x19c] sm:$0xf0]  ;;  %v2134_v34 = vld [vmem:[%s3396_s27 + $0x134] sm:$0xf0]  ;;  %v2131_v37 = vld [vmem:[%s3396_s27 + $0x124] sm:$0xf] }
  0xf8   : > { %v1975_v33 = vld [vmem:[%s3396_s27 + $0x120] sm:$0xf]  ;;  %1002 = vmatpush.bf16.msra.mxu1 %v2024_v25  ;;  %1014 = vmatpush.bf16.msra.mxu2 %v2004_v26  ;;  %v2032_v35 = vor.u32 %v2147_v32, %v2031_v29  ;;  %v1977_v38 = vld [vmem:[%s3396_s27 + $0x138] sm:$0xf0]  ;;  %v2007_v39 = vld [vmem:[%s3396_s27 + $0x158] sm:$0xf] }
  0xf9   : > { %v1976_v36 = vor.u32 %v2134_v34, %v1975_v33  ;;  %1040 = vmatpush.bf16.msra.mxu3 %v2028_v30  ;;  %v1980_v40 = vor.u32 %v2131_v37, %v1977_v38  ;;  %v2141_v41 = vld [vmem:[%s3396_s27 + $0x16c] sm:$0xf0]  ;;  %v2128_v43 = vld [vmem:[%s3396_s27 + $0x104] sm:$0xf0]  ;;  %v2125_v45 = vld [vmem:[%s3396_s27 + $0xf4] sm:$0xf] }
  0xfa   : > { %v1951_v42 = vld [vmem:[%s3396_s27 + $0xf0] sm:$0xf]  ;;  %v2008_v44 = vor.u32 %v2141_v41, %v2007_v39  ;;  %v1953_v46 = vld [vmem:[%s3396_s27 + $0x108] sm:$0xf0]  ;;  %v1983_v47 = vld [vmem:[%s3396_s27 + $0x128] sm:$0xf] }
  0xfb   : > { %2045 = vmatmul.msk.bf16.vlgmr.msra.gmra.mxu1 %vm969_vm0, %v3407_v31  ;;  %977 = vmatpush.bf16.msra.mxu0 %v1976_v36  ;;  %v1952_v48 = vor.u32 %v2128_v43, %v1951_v42  ;;  %v2135_v49 = vld [vmem:[%s3396_s27 + $0x13c] sm:$0xf0]  ;;  %v1956_v50 = vor.u32 %v2125_v45, %v1953_v46  ;;  %v2122_v52 = vld [vmem:[%s3396_s27 + $0xd4] sm:$0xf0]  ;;  %v2119_v54 = vld [vmem:[%s3396_s27 + $0xc4] sm:$0xf] }
  0xfc   : > { %2047 = vmatmul.msk.bf16.vlgmr.msra.gmra.mxu3 %vm969_vm0, %v3407_v31  ;;  %1015 = vmatpush.bf16.msra.mxu2 %v1980_v40  ;;  %v1927_v51 = vld [vmem:[%s3396_s27 + $0xc0] sm:$0xf]  ;;  %v1984_v53 = vor.u32 %v2135_v49, %v1983_v47  ;;  %v1929_v55 = vld [vmem:[%s3396_s27 + $0xd8] sm:$0xf0]  ;;  %v1959_v56 = vld [vmem:[%s3396_s27 + $0xf8] sm:$0xf] }
  0xfd   : > { %1078 = vmatpush.bf16.msrb.mxu3 %v2032_v35  ;;  %1052 = vmatpush.bf16.msrb.mxu1 %v2008_v44  ;;  %v2129_v57 = vld [vmem:[%s3396_s27 + $0x10c] sm:$0xf0]  ;;  %v1928_v58 = vor.u32 %v2122_v52, %v1927_v51  ;;  %v1932_v59 = vor.u32 %v2119_v54, %v1929_v55  ;;  %v2116_v61 = vld [vmem:[%s3396_s27 + $0xa4] sm:$0xf0]  ;;  %v2113_v63 = vld [vmem:[%s3396_s27 + $0x94] sm:$0xf] }
  0xfe   : > { %v1903_v60 = vld [vmem:[%s3396_s27 + $0x90] sm:$0xf]  ;;  %v1960_v62 = vor.u32 %v2129_v57, %v1959_v56  ;;  %v1905_v0 = vld [vmem:[%s3396_s27 + $0xa8] sm:$0xf0]  ;;  %v1935_v1 = vld [vmem:[%s3396_s27 + $0xc8] sm:$0xf] }
  0xff   : > { %978 = vmatpush.bf16.msra.mxu0 %v1952_v48  ;;  %v2123_v2 = vld [vmem:[%s3396_s27 + $0xdc] sm:$0xf0]  ;;  %v1904_v3 = vor.u32 %v2116_v61, %v1903_v60  ;;  %v2093_v4 = vld [vmem:[%s3971_s0 + $0x14] sm:$0xf]  ;;  %v1908_v5 = vor.u32 %v2113_v63, %v1905_v0  ;;  %v1825_v6 = vld [vmem:[%s3971_s0 + $0x18] sm:$0xf0] }
 0x100   : > { %1016 = vmatpush.bf16.msra.mxu2 %v1956_v50  ;;  %v1879_v7 = vld [vmem:[%s3396_s27 + $0x60] sm:$0xf]  ;;  %v2110_v8 = vld [vmem:[%s3396_s27 + $0x74] sm:$0xf0]  ;;  %v1936_v9 = vor.u32 %v2123_v2, %v1935_v1  ;;  %v2107_v10 = vld [vmem:[%s3396_s27 + $0x64] sm:$0xf]  ;;  %v3450_v14 = vor.u32 %v2093_v4, %v1825_v6 }
 0x101   : > { %1053 = vmatpush.bf16.msrb.mxu1 %v1984_v53  ;;  %v1881_v11 = vld [vmem:[%s3396_s27 + $0x78] sm:$0xf0]  ;;  %v1911_v12 = vld [vmem:[%s3396_s27 + $0x98] sm:$0xf]  ;;  %v2117_v13 = vld [vmem:[%s3396_s27 + $0xac] sm:$0xf0]  ;;  %v1880_v15 = vor.u32 %v2110_v8, %v1879_v7 }
 0x102   : > { %v2144_v16 = vld [vmem:[%s3396_s27 + $0x18c] sm:$0xf]  ;;  %v2033_v17 = vld [vmem:[%s3396_s27 + $0x1a0] sm:$0xf0]  ;;  %v1884_v18 = vor.u32 %v2107_v10, %v1881_v11  ;;  %v1855_v19 = vld [vmem:[%s3396_s27 + $0x30] sm:$0xf]  ;;  %v1912_v22 = vor.u32 %v2117_v13, %v1911_v12 }
 0x103   : > { %979 = vmatpush.bf16.msra.mxu0 %v1928_v58  ;;  %v2104_v20 = vld [vmem:[%s3396_s27 + $0x44] sm:$0xf0]  ;;  %v2036_v21 = vor.u32 %v2144_v16, %v2033_v17  ;;  %v2101_v23 = vld [vmem:[%s3396_s27 + $0x34] sm:$0xf]  ;;  %v1857_v24 = vld [vmem:[%s3396_s27 + $0x48] sm:$0xf0] }
 0x104   : > { %1017 = vmatpush.bf16.msra.mxu2 %v1932_v59  ;;  %v1887_v25 = vld [vmem:[%s3396_s27 + $0x68] sm:$0xf]  ;;  %v2111_v26 = vld [vmem:[%s3396_s27 + $0x7c] sm:$0xf0]  ;;  %v1856_v27 = vor.u32 %v2104_v20, %v1855_v19  ;;  %v1860_v29 = vor.u32 %v2101_v23, %v1857_v24  ;;  %v2098_v32 = vld [vmem:[%s3396_s27 + $0x14] sm:$0xf0] }
 0x105   : > { %1054 = vmatpush.bf16.msrb.mxu1 %v1960_v62  ;;  %2154 = vmatpush.bf16.msra.mxu3 %v2036_v21  ;;  %v657_v28 = vld [vmem:[%s3973_s2] sm:$0xff]  ;;  %v1888_v34 = vor.u32 %v2111_v26, %v1887_v25  ;;  %v1833_v35 = vld [vmem:[%s3396_s27 + $0x18] sm:$0xf0]  ;;  %v2735_v38 = vmov 0   ;;  %v1863_v39 = vld [vmem:[%s3396_s27 + $0x38] sm:$0xf] }
 0x106   : > { %v1831_v30 = vld [vmem:[%s3396_s27] sm:$0xf]  ;;  %v2095_v33 = vld [vmem:[%s3396_s27 + $0x4] sm:$0xf]  ;;  %v2138_v36 = vld [vmem:[%s3396_s27 + $0x15c] sm:$0xf]  ;;  %2451 = vset.pattern.permute.xlu0 %v2735_v38  ;;  %2452 = vset.pattern.permute.xlu1 %v2735_v38 }
 0x107   : > { %980 = vmatpush.bf16.msra.mxu0 %v1904_v3  ;;  %v2009_v37 = vld [vmem:[%s3396_s27 + $0x170] sm:$0xf0]  ;;  %v2105_v40 = vld [vmem:[%s3396_s27 + $0x4c] sm:$0xf0]  ;;  %663 = vperm.xlu0 %2451, %v657_v28   ;;  %v1832_v41 = vor.u32 %v2098_v32, %v1831_v30  ;;  %v2092_v43 = vld [vmem:[%s3971_s0 + $0x4] sm:$0xf0]  ;;  %v1836_v44 = vor.u32 %v2095_v33, %v1833_v35 }
 0x108   : > { %1018 = vmatpush.bf16.msra.mxu2 %v1908_v5  ;;  %v1815_v42 = vld [vmem:[%s3971_s0] sm:$0xf]  ;;  %v2012_v45 = vor.u32 %v2138_v36, %v2009_v37  ;;  %v1864_v46 = vor.u32 %v2105_v40, %v1863_v39  ;;  %v2132_v47 = vld [vmem:[%s3396_s27 + $0x12c] sm:$0xf]  ;;  %v1985_v48 = vld [vmem:[%s3396_s27 + $0x140] sm:$0xf0] }
 0x109   : > { %1055 = vmatpush.bf16.msrb.mxu1 %v1936_v9  ;;  %v659_v49 = vld [vmem:[%s3973_s2 + $0x10] sm:$0xff]  ;;  %v3486_v50 = vor.u32 %v2092_v43, %v1815_v42  ;;  %v1839_v51 = vld [vmem:[%s3396_s27 + $0x8] sm:$0xf]  ;;  %v2142_v54 = vld [vmem:[%s3396_s27 + $0x174] sm:$0xf0]  ;;  %v1988_v56 = vor.u32 %v2132_v47, %v1985_v48  ;;  %s1260_s25 = ssub.s32 (%p2789_p5), 11, %s1259_s12 }
 0x10a   : > { %v2099_v52 = vld [vmem:[%s3396_s27 + $0x1c] sm:$0xf0]  ;;  %673 = vperm.xlu1 %2452, %v659_v49   ;;  %v658_v55 = vld [vmem:[%s3973_s2 + $0x8] sm:$0xff]  ;;  %v1961_v60 = vld [vmem:[%s3396_s27 + $0x110] sm:$0xf0]  ;;  %p1261_p1 = scmp.lt.s32.totalorder (%p2789_p5), %s1260_s25, 6 }
 0x10b   : > { %2046 = vmatmul.msk.bf16.gmra.mxu1 %vm969_vm0, %v3450_v14  ;;  %981 = vmatpush.bf16.msra.mxu0 %v1880_v15  ;;  %v2015_v53 = vld [vmem:[%s3396_s27 + $0x160] sm:$0xf]  ;;  %v1840_v57 = vor.u32 %v2099_v52, %v1839_v51  ;;  %v2126_v59 = vld [vmem:[%s3396_s27 + $0xfc] sm:$0xf]  ;;  %v1991_v61 = vld [vmem:[%s3396_s27 + $0x130] sm:$0xf] }
 0x10c   : > { %2048 = vmatmul.msk.bf16.gmra.mxu3 %vm969_vm0, %v3450_v14  ;;  %1019 = vmatpush.bf16.msra.mxu2 %v1884_v18  ;;  %v2016_v58 = vor.u32 %v2142_v54, %v2015_v53  ;;  %v2136_v62 = vld [vmem:[%s3396_s27 + $0x144] sm:$0xf0]  ;;  %v1964_v0 = vor.u32 %v2126_v59, %v1961_v60  ;;  %v2120_v2 = vld [vmem:[%s3396_s27 + $0xcc] sm:$0xf]  ;;  %v1937_v3 = vld [vmem:[%s3396_s27 + $0xe0] sm:$0xf0] }
 0x10d   : > { %1056 = vmatpush.bf16.msrb.mxu1 %v1912_v22  ;;  %v660_v63 = vld [vmem:[%s3973_s2 + $0x18] sm:$0xff]  ;;  %v1992_v1 = vor.u32 %v2136_v62, %v1991_v61  ;;  %v1967_v4 = vld [vmem:[%s3396_s27 + $0x100] sm:$0xf]  ;;  %v2039_v6 = vld [vmem:[%s3396_s27 + $0x190] sm:$0xf]  ;;  %v1940_v9 = vor.u32 %v2120_v2, %v1937_v3 }
 0x10e   : > { %v2130_v5 = vld [vmem:[%s3396_s27 + $0x114] sm:$0xf0]  ;;  %v2148_v7 = vld [vmem:[%s3396_s27 + $0x1a4] sm:$0xf0]  ;;  %v2145_v8 = vld [vmem:[%s3396_s27 + $0x194] sm:$0xf] }
 0x10f   : > { %982 = vmatpush.bf16.msra.mxu0 %v1856_v27  ;;  %668 = vperm.xlu0 %2451, %v658_v55   ;;  %v2040_v10 = vor.u32 %v2148_v7, %v2039_v6  ;;  %v2041_v11 = vld [vmem:[%s3396_s27 + $0x1a8] sm:$0xf0]  ;;  %v1968_v12 = vor.u32 %v2130_v5, %v1967_v4  ;;  %v1823_v13 = vld [vmem:[%s3971_s0 + $0x10] sm:$0xf]  ;;  %v2114_v15 = vld [vmem:[%s3396_s27 + $0x9c] sm:$0xf] }
 0x110   : > { %1020 = vmatpush.bf16.msra.mxu2 %v1860_v29  ;;  %v1913_v16 = vld [vmem:[%s3396_s27 + $0xb0] sm:$0xf0]  ;;  %v2044_v17 = vor.u32 %v2145_v8, %v2041_v11  ;;  %v2094_v18 = vld [vmem:[%s3971_s0 + $0x14] sm:$0xf0]  ;;  %v1943_v19 = vld [vmem:[%s3396_s27 + $0xd0] sm:$0xf] }
 0x111   : > { %1057 = vmatpush.bf16.msrb.mxu1 %v1888_v34  ;;  %v2124_v20 = vld [vmem:[%s3396_s27 + $0xe4] sm:$0xf0]  ;;  %v3525_v22 = vor.u32 %v2094_v18, %v1823_v13  ;;  %v2108_v24 = vld [vmem:[%s3396_s27 + $0x6c] sm:$0xf]  ;;  %v1889_v25 = vld [vmem:[%s3396_s27 + $0x80] sm:$0xf0] }
 0x112   : > { %678 = vperm.xlu1 %2452, %v660_v63   ;;  %v1944_v23 = vor.u32 %v2124_v20, %v1943_v19  ;;  %v1919_v26 = vld [vmem:[%s3396_s27 + $0xa0] sm:$0xf]  ;;  %v2118_v27 = vld [vmem:[%s3396_s27 + $0xb4] sm:$0xf0]  ;;  %v1892_v28 = vor.u32 %v2108_v24, %v1889_v25  ;;  %v2102_v30 = vld [vmem:[%s3396_s27 + $0x3c] sm:$0xf] }
 0x113   : > { %983 = vmatpush.bf16.msra.mxu0 %v1832_v41  ;;  %v1920_v29 = vor.u32 %v2118_v27, %v1919_v26  ;;  %v1865_v32 = vld [vmem:[%s3396_s27 + $0x50] sm:$0xf0]  ;;  %v1895_v33 = vld [vmem:[%s3396_s27 + $0x70] sm:$0xf]  ;;  %v2112_v34 = vld [vmem:[%s3396_s27 + $0x84] sm:$0xf0] }
 0x114   : > { %1021 = vmatpush.bf16.msra.mxu2 %v1836_v44  ;;  %v1868_v35 = vor.u32 %v2102_v30, %v1865_v32  ;;  %v1896_v36 = vor.u32 %v2112_v34, %v1895_v33  ;;  %v2096_v37 = vld [vmem:[%s3396_s27 + $0xc] sm:$0xf]  ;;  %v1841_v38 = vld [vmem:[%s3396_s27 + $0x20] sm:$0xf0]  ;;  %v1871_v39 = vld [vmem:[%s3396_s27 + $0x40] sm:$0xf] }
 0x115   : > { %1058 = vmatpush.bf16.msrb.mxu1 %v1864_v46  ;;  %v2106_v40 = vld [vmem:[%s3396_s27 + $0x54] sm:$0xf0]  ;;  %v2139_v41 = vld [vmem:[%s3396_s27 + $0x164] sm:$0xf]  ;;  %v2017_v42 = vld [vmem:[%s3396_s27 + $0x178] sm:$0xf0]  ;;  %v1844_v43 = vor.u32 %v2096_v37, %v1841_v38 }
 0x116   : > { %984 = vmatmul.bf16.vlgmr.msra.gmra.mxu0 %v3486_v50  ;;  %v1872_v44 = vor.u32 %v2106_v40, %v1871_v39  ;;  %v1847_v46 = vld [vmem:[%s3396_s27 + $0x10] sm:$0xf]  ;;  %v2100_v47 = vld [vmem:[%s3396_s27 + $0x24] sm:$0xf0]  ;;  %v2133_v48 = vld [vmem:[%s3396_s27 + $0x134] sm:$0xf] }
 0x117   : > { %1090 = vmatpush.bf16.msrb.mxu0 %v2012_v45  ;;  %1022 = vmatmul.bf16.vlgmr.msra.gmra.mxu2 %v3486_v50  ;;  %v2020_v45 = vor.u32 %v2139_v41, %v2017_v42  ;;  %v1993_v49 = vld [vmem:[%s3396_s27 + $0x148] sm:$0xf0]  ;;  %v1848_v51 = vor.u32 %v2100_v47, %v1847_v46  ;;  %v2127_v53 = vld [vmem:[%s3396_s27 + $0x104] sm:$0xf]  ;;  %v1969_v54 = vld [vmem:[%s3396_s27 + $0x118] sm:$0xf0] }
 0x118   : > { %1116 = vmatpush.bf16.msrb.mxu2 %v2036_v21  ;;  %v1916_v21 = vor.u32 %v2114_v15, %v1913_v16  ;;  %v1996_v52 = vor.u32 %v2133_v48, %v1993_v49  ;;  %v1972_v55 = vor.u32 %v2127_v53, %v1969_v54  ;;  %v2115_v59 = vld [vmem:[%s3396_s27 + $0xa4] sm:$0xf]  ;;  %v1921_v60 = vld [vmem:[%s3396_s27 + $0xb8] sm:$0xf0]  ;;  %v2109_v62 = vld [vmem:[%s3396_s27 + $0x74] sm:$0xf] }
 0x119   : > { %1059 = vmatpush.bf16.msrb.mxu1 %v1840_v57  ;;  %v1945_v57 = vld [vmem:[%s3396_s27 + $0xe8] sm:$0xf0]  ;;  %v1924_v61 = vor.u32 %v2115_v59, %v1921_v60  ;;  %v1873_v2 = vld [vmem:[%s3396_s27 + $0x58] sm:$0xf0]  ;;  %v2097_v4 = vld [vmem:[%s3396_s27 + $0x14] sm:$0xf] }
 0x11a   : > { %v1897_v63 = vld [vmem:[%s3396_s27 + $0x88] sm:$0xf0] }
 0x11b   : > { %1091 = vmatpush.bf16.msrb.mxu0 %v1988_v56  ;;  %v2121_v56 = vld [vmem:[%s3396_s27 + $0xd4] sm:$0xf]  ;;  %v1849_v5 = vld [vmem:[%s3396_s27 + $0x28] sm:$0xf0] }
 0x11c   : > { %1060 = vmatmul.bf16.vlgmr.msrb.gmra.mxu1 %v3486_v50  ;;  %2049 = vmatmul.msk.bf16.vlgmr.msrb.gmra.mxu3 %vm969_vm0, %v3407_v31  ;;  %v1852_v6 = vor.u32 %v2097_v4, %v1849_v5 }
 0x11d   : > { %1128 = vmatpush.bf16.msra.mxu1 %v2016_v58  ;;  %1154 = vmatpush.bf16.msrb.mxu3 %v2040_v10  ;;  %v1948_v58 = vor.u32 %v2121_v56, %v1945_v57 }
 0x11e   : > { %1192 = vmatpush.bf16.msra.mxu2 %v2044_v17 }
 0x11f   : > { %1092 = vmatpush.bf16.msrb.mxu0 %v1964_v0  ;;  %v1900_v0 = vor.u32 %v2109_v62, %v1897_v63 }
 0x121   : > { %1129 = vmatpush.bf16.msra.mxu1 %v1992_v1  ;;  %v2103_v1 = vld [vmem:[%s3396_s27 + $0x44] sm:$0xf]  ;;  %s2165_s27 = smul.u32 192, %s566_s30 }
 0x122   : > { %v1876_v3 = vor.u32 %v2103_v1, %v1873_v2  ;;  %s2149_s30 = smul.u32 (%p2789_p5), 48, %s2774_s15 }
 0x123   : > { %1093 = vmatpush.bf16.msrb.mxu0 %v1940_v9  ;;  %s3587_s23 = scalar_lea.vmem [#allocation3], %s2165_s27  }
 0x124   : > { %s3647_s24 = scalar_lea.vmem (%p2789_p5), %s3974_s3, %s2149_s30  }
 0x125   : > { %1130 = vmatpush.bf16.msra.mxu1 %v1968_v12 }
 0x126   : > { %989 = vmatmul.bf16.gmra.mxu0 %v3525_v22 }
 0x127   : > { %1094 = vmatpush.bf16.msrb.mxu0 %v1916_v21  ;;  %1027 = vmatmul.bf16.gmra.mxu2 %v3525_v22 }
 0x129   : > { %1131 = vmatpush.bf16.msra.mxu1 %v1944_v23 }
 0x12b   : > { %1095 = vmatpush.bf16.msrb.mxu0 %v1892_v28 }
 0x12c   : > { %1065 = vmatmul.bf16.gmra.mxu1 %v3525_v22  ;;  %2050 = vmatmul.msk.bf16.gmra.mxu3 %vm969_vm0, %v3450_v14 }
 0x12d   : > { %1132 = vmatpush.bf16.msra.mxu1 %v1920_v29 }
 0x12f   : > { %1096 = vmatpush.bf16.msrb.mxu0 %v1868_v35 }
 0x131   : > { %1133 = vmatpush.bf16.msra.mxu1 %v1896_v36 }
 0x133   : > { %1097 = vmatpush.bf16.msrb.mxu0 %v1844_v43 }
 0x135   : > { %1134 = vmatpush.bf16.msra.mxu1 %v1872_v44 }
 0x136   : > { %1098 = vmatmul.bf16.vlgmr.msrb.gmra.mxu0 %v3486_v50 }
 0x137   : > { %1166 = vmatpush.bf16.msra.mxu0 %v2020_v45  ;;  %2051 = vmatmul.msk.bf16.vlgmr.msrb.gmra.mxu2 %vm969_vm0, %v3407_v31 }
 0x139   : > { %1135 = vmatpush.bf16.msra.mxu1 %v1848_v51 }
 0x13b   : > { %1167 = vmatpush.bf16.msra.mxu0 %v1996_v52 }
 0x13c   : > { %2052 = vmatmul.msk.bf16.vlgmr.msra.gmra.mxu3 %vm969_vm0, %v3450_v14  ;;  %1136 = vmatmul.bf16.vlgmr.msra.gmra.mxu1 %v3486_v50 }
 0x13d   : > { %2155 = vmatpush.bf16.msrb.mxu1 %v2020_v45 }
 0x13f   : > { %1168 = vmatpush.bf16.msra.mxu0 %v1972_v55 }
 0x141   : > { %2156 = vmatpush.bf16.msrb.mxu1 %v1996_v52 }
 0x143   : > { %1169 = vmatpush.bf16.msra.mxu0 %v1948_v58 }
 0x145   : > { %2157 = vmatpush.bf16.msrb.mxu1 %v1972_v55 }
 0x146   : > { %1103 = vmatmul.bf16.gmra.mxu0 %v3525_v22 }
 0x147   : > { %1170 = vmatpush.bf16.msra.mxu0 %v1924_v61  ;;  %2055 = vmatmul.msk.bf16.vlgmr.msra.gmra.mxu2 %vm969_vm0, %v3407_v31 }
 0x149   : > { %2158 = vmatpush.bf16.msrb.mxu1 %v1948_v58 }
 0x14b   : > { %1171 = vmatpush.bf16.msra.mxu0 %v1900_v0 }
 0x14c   : > { %1141 = vmatmul.bf16.gmra.mxu1 %v3525_v22  ;;  %2053 = vmatmul.msk.bf16.vlgmr.msrb.gmra.mxu3 %vm969_vm0, %v3407_v31 }
 0x14d   : > { %2159 = vmatpush.bf16.msrb.mxu1 %v1924_v61 }
 0x14f   : > { %1172 = vmatpush.bf16.msra.mxu0 %v1876_v3 }
 0x151   : > { %2160 = vmatpush.bf16.msrb.mxu1 %v1900_v0 }
 0x153   : > { %1173 = vmatpush.bf16.msra.mxu0 %v1852_v6 }
 0x155   : > { %2161 = vmatpush.bf16.msrb.mxu1 %v1876_v3 }
 0x156   : > { %1174 = vmatmul.bf16.vlgmr.msra.gmra.mxu0 %v3486_v50 }
 0x157   : > { %2056 = vmatmul.msk.bf16.gmra.mxu2 %vm969_vm0, %v3450_v14 }
 0x159   : > { %2162 = vmatpush.bf16.msrb.mxu1 %v1852_v6 }
 0x15c   : > { %2054 = vmatmul.msk.bf16.gmra.mxu3 %vm969_vm0, %v3450_v14  ;;  %1179 = vmatmul.bf16.vlgmr.msrb.gmra.mxu1 %v3525_v22 }
 0x178   : > { %v1004_v7 = vpop.f32.mrf.mxu1 }
 0x179   : > { %v3580_v12 = vpop.permute.xlu0 %663 }
 0x17c   : > { %v3593_v29 = vpop.permute.xlu1 %673 }
 0x17f   : > { %v1042_v8 = vpop.f32.mrf.mxu3 }
 0x180   : > { %v1006_v9 = vpop.f32.mrf.mxu1 }
 0x181   : > { %v3585_v19 = vpop.permute.xlu0 %668 }
 0x184   : > { %v3602_v47 = vpop.permute.xlu1 %678 }
 0x187   : > { %v1044_v31 = vpop.f32.mrf.mxu3 }
 0x188   : > { %v1009_v10 = vpop.f32.mrf.mxu1 }
 0x18f   : > { %v1047_v11 = vpop.f32.mrf.mxu3 }
 0x190   : > { %v1011_v13 = vpop.f32.mrf.mxu1 }
 0x193   : > { %v985_v50 = vpop.f32.mrf.mxu0 }
 0x194   : > { %v986_v15 = vadd.f32 %v985_v50, %v3580_v12 }
 0x196   : > { %v1005_v16 = vadd.f32 %v1004_v7, %v986_v15 }
 0x197   : > { %v1049_v17 = vpop.f32.mrf.mxu3 }
 0x198   : > { %v1204_v18 = vmax.f32 %v1005_v16, 0.0 }
 0x199   : > { %v1061_v14 = vpop.f32.mrf.mxu1 }
 0x19a   : > { %1228 = vst [vmem:[%s3587_s23] sm:$0xff] %v1204_v18  ;;  %v1023_v20 = vpop.f32.mrf.mxu2  ;;  %v1062_v23 = vadd.f32 %v1061_v14, %v3580_v12 }
 0x19b   : > { %v1024_v21 = vadd.f32 %v1023_v20, %v3580_v12  ;;  %v987_v22 = vpop.f32.mrf.mxu0 }
 0x19c   : > { %v988_v24 = vadd.f32 %v987_v22, %v3585_v19 }
 0x19d   : > { %v1043_v25 = vadd.f32 %v1042_v8, %v1024_v21 }
 0x19e   : > { %v1007_v26 = vadd.f32 %v1006_v9, %v988_v24 }
 0x19f   : > { %v1205_v27 = vmax.f32 %v1043_v25, 0.0  ;;  %v1080_v28 = vpop.f32.mrf.mxu3 }
 0x1a0   : > { %v1210_v30 = vmax.f32 %v1007_v26, 0.0  ;;  %v1081_v32 = vadd.f32 %v1080_v28, %v1062_v23 }
 0x1a1   : > { %1229 = vst [vmem:[%s3587_s23 + $0x8] sm:$0xff] %v1205_v27  ;;  %v1063_v33 = vpop.f32.mrf.mxu1 }
 0x1a2   : > { %1234 = vst [vmem:[%s3587_s23 + $0x30] sm:$0xff] %v1210_v30  ;;  %v1206_v34 = vmax.f32 %v1081_v32, 0.0  ;;  %v1025_v35 = vpop.f32.mrf.mxu2  ;;  %v1064_v40 = vadd.f32 %v1063_v33, %v3585_v19 }
 0x1a3   : > { %v1026_v36 = vadd.f32 %v1025_v35, %v3585_v19  ;;  %v990_v37 = vpop.f32.mrf.mxu0 }
 0x1a4   : > { %1230 = vst [vmem:[%s3587_s23 + $0x10] sm:$0xff] %v1206_v34  ;;  %v991_v38 = vadd.f32 %v990_v37, %v3593_v29 }
 0x1a5   : > { %v1045_v39 = vadd.f32 %v1044_v31, %v1026_v36 }
 0x1a6   : > { %v1010_v41 = vadd.f32 %v1009_v10, %v991_v38 }
 0x1a7   : > { %v1211_v42 = vmax.f32 %v1045_v39, 0.0  ;;  %v1082_v43 = vpop.f32.mrf.mxu3 }
 0x1a8   : > { %v1216_v44 = vmax.f32 %v1010_v41, 0.0  ;;  %v1083_v45 = vadd.f32 %v1082_v43, %v1064_v40 }
 0x1a9   : > { %1235 = vst [vmem:[%s3587_s23 + $0x38] sm:$0xff] %v1211_v42  ;;  %v1066_v46 = vpop.f32.mrf.mxu1 }
 0x1aa   : > { %1240 = vst [vmem:[%s3587_s23 + $0x60] sm:$0xff] %v1216_v44  ;;  %v1212_v48 = vmax.f32 %v1083_v45, 0.0  ;;  %v1028_v49 = vpop.f32.mrf.mxu2  ;;  %v1067_v53 = vadd.f32 %v1066_v46, %v3593_v29 }
 0x1ab   : > { %v1029_v51 = vadd.f32 %v1028_v49, %v3593_v29  ;;  %v992_v52 = vpop.f32.mrf.mxu0 }
 0x1ac   : > { %1236 = vst [vmem:[%s3587_s23 + $0x40] sm:$0xff] %v1212_v48  ;;  %v993_v54 = vadd.f32 %v992_v52, %v3602_v47 }
 0x1ad   : > { %v1048_v55 = vadd.f32 %v1047_v11, %v1029_v51 }
 0x1ae   : > { %v1012_v56 = vadd.f32 %v1011_v13, %v993_v54 }
 0x1af   : > { %v1217_v57 = vmax.f32 %v1048_v55, 0.0  ;;  %v1085_v58 = vpop.f32.mrf.mxu3 }
 0x1b0   : > { %v1222_v59 = vmax.f32 %v1012_v56, 0.0  ;;  %v1086_v60 = vadd.f32 %v1085_v58, %v1067_v53 }
 0x1b1   : > { %1241 = vst [vmem:[%s3587_s23 + $0x68] sm:$0xff] %v1217_v57  ;;  %v1068_v61 = vpop.f32.mrf.mxu1 }
 0x1b2   : > { %1246 = vst [vmem:[%s3587_s23 + $0x90] sm:$0xff] %v1222_v59  ;;  %v1218_v62 = vmax.f32 %v1086_v60, 0.0  ;;  %v1030_v63 = vpop.f32.mrf.mxu2  ;;  %v1069_v3 = vadd.f32 %v1068_v61, %v3602_v47 }
 0x1b3   : > { %v1031_v0 = vadd.f32 %v1030_v63, %v3602_v47  ;;  %v1099_v1 = vpop.f32.mrf.mxu0 }
 0x1b4   : > { %1242 = vst [vmem:[%s3587_s23 + $0x70] sm:$0xff] %v1218_v62  ;;  %v1100_v5 = vadd.f32 %v1099_v1, %v3580_v12 }
 0x1b5   : > { %v1050_v2 = vadd.f32 %v1049_v17, %v1031_v0 }
 0x1b7   : > { %v1223_v4 = vmax.f32 %v1050_v2, 0.0  ;;  %v1087_v6 = vpop.f32.mrf.mxu3 }
 0x1b8   : > { %v1088_v7 = vadd.f32 %v1087_v6, %v1069_v3 }
 0x1b9   : > { %1247 = vst [vmem:[%s3587_s23 + $0x98] sm:$0xff] %v1223_v4  ;;  %v1137_v8 = vpop.f32.mrf.mxu1 }
 0x1ba   : > { %v1224_v9 = vmax.f32 %v1088_v7, 0.0  ;;  %v1118_v31 = vpop.f32.mrf.mxu2  ;;  %v1138_v30 = vadd.f32 %v1137_v8, %v3580_v12 }
 0x1bb   : > { %v1119_v10 = vadd.f32 %v1118_v31, %v1100_v5  ;;  %v1101_v11 = vpop.f32.mrf.mxu0 }
 0x1bc   : > { %1248 = vst [vmem:[%s3587_s23 + $0xa0] sm:$0xff] %v1224_v9  ;;  %v1102_v15 = vadd.f32 %v1101_v11, %v3585_v19 }
 0x1bd   : > { %v1207_v13 = vmax.f32 %v1119_v10, 0.0 }
 0x1bf   : > { %1231 = vst [vmem:[%s3587_s23 + $0x18] sm:$0xff] %v1207_v13  ;;  %v1123_v50 = vpop.f32.mrf.mxu3 }
 0x1c1   : > { %v1139_v16 = vpop.f32.mrf.mxu1 }
 0x1c2   : > { %v1120_v17 = vpop.f32.mrf.mxu2  ;;  %v1140_v41 = vadd.f32 %v1139_v16, %v3585_v19 }
 0x1c3   : > { %v1121_v18 = vadd.f32 %v1120_v17, %v1102_v15  ;;  %v1104_v14 = vpop.f32.mrf.mxu0 }
 0x1c4   : > { %v1105_v20 = vadd.f32 %v1104_v14, %v3593_v29 }
 0x1c5   : > { %v1213_v21 = vmax.f32 %v1121_v18, 0.0 }
 0x1c6   : > { %v1124_v22 = vadd.f32 %v1123_v50, %v1105_v20 }
 0x1c7   : > { %1237 = vst [vmem:[%s3587_s23 + $0x48] sm:$0xff] %v1213_v21  ;;  %v1125_v23 = vpop.f32.mrf.mxu3 }
 0x1c8   : > { %v1219_v24 = vmax.f32 %v1124_v22, 0.0 }
 0x1c9   : > { %v1142_v25 = vpop.f32.mrf.mxu1 }
 0x1ca   : > { %1243 = vst [vmem:[%s3587_s23 + $0x78] sm:$0xff] %v1219_v24  ;;  %v1194_v26 = vpop.f32.mrf.mxu2  ;;  %v1143_v54 = vadd.f32 %v1142_v25, %v3593_v29 }
 0x1cb   : > { %v1106_v27 = vpop.f32.mrf.mxu0 }
 0x1cc   : > { %v1107_v28 = vadd.f32 %v1106_v27, %v3602_v47 }
 0x1ce   : > { %v1126_v32 = vadd.f32 %v1125_v23, %v1107_v28 }
 0x1cf   : > { %v1156_v33 = vpop.f32.mrf.mxu3 }
 0x1d0   : > { %v1225_v34 = vmax.f32 %v1126_v32, 0.0  ;;  %v1157_v35 = vadd.f32 %v1156_v33, %v1138_v30 }
 0x1d1   : > { %v1144_v36 = vpop.f32.mrf.mxu1 }
 0x1d2   : > { %1249 = vst [vmem:[%s3587_s23 + $0xa8] sm:$0xff] %v1225_v34  ;;  %v1208_v37 = vmax.f32 %v1157_v35, 0.0  ;;  %v1196_v38 = vpop.f32.mrf.mxu2 }
 0x1d3   : > { %v1175_v39 = vpop.f32.mrf.mxu0 }
 0x1d4   : > { %1232 = vst [vmem:[%s3587_s23 + $0x20] sm:$0xff] %v1208_v37  ;;  %v1176_v40 = vadd.f32 %v1175_v39, %v3580_v12 }
 0x1d6   : > { %v1195_v42 = vadd.f32 %v1194_v26, %v1176_v40 }
 0x1d7   : > { %v1158_v43 = vpop.f32.mrf.mxu3 }
 0x1d8   : > { %v1209_v44 = vmax.f32 %v1195_v42, 0.0  ;;  %v1159_v45 = vadd.f32 %v1158_v43, %v1140_v41 }
 0x1d9   : > { %v1180_v46 = vpop.f32.mrf.mxu1 }
 0x1da   : > { %1233 = vst [vmem:[%s3587_s23 + $0x28] sm:$0xff] %v1209_v44  ;;  %v1214_v48 = vmax.f32 %v1159_v45, 0.0  ;;  %v1181_v49 = vadd.f32 %v1180_v46, %v3593_v29  ;;  %v1199_v51 = vpop.f32.mrf.mxu2 }
 0x1db   : > { %v1177_v52 = vpop.f32.mrf.mxu0 }
 0x1dc   : > { %1238 = vst [vmem:[%s3587_s23 + $0x50] sm:$0xff] %v1214_v48  ;;  %v1200_v53 = vadd.f32 %v1199_v51, %v1181_v49  ;;  %v1178_v12 = vadd.f32 %v1177_v52, %v3585_v19  ;;  %v1145_v19 = vadd.f32 %v1144_v36, %v3602_v47 }
 0x1de   : > { %v1221_v55 = vmax.f32 %v1200_v53, 0.0  ;;  %v1197_v56 = vadd.f32 %v1196_v38, %v1178_v12 }
 0x1df   : > { %v1161_v57 = vpop.f32.mrf.mxu3 }
 0x1e0   : > { %1245 = vst [vmem:[%s3587_s23 + $0x88] sm:$0xff] %v1221_v55  ;;  %v1215_v58 = vmax.f32 %v1197_v56, 0.0  ;;  %v1162_v59 = vadd.f32 %v1161_v57, %v1143_v54 }
 0x1e1   : > { %v1182_v60 = vpop.f32.mrf.mxu1 }
 0x1e2   : > { %1239 = vst [vmem:[%s3587_s23 + $0x58] sm:$0xff] %v1215_v58  ;;  %v1220_v61 = vmax.f32 %v1162_v59, 0.0  ;;  %v1183_v62 = vadd.f32 %v1182_v60, %v3602_v47  ;;  %v1201_v63 = vpop.f32.mrf.mxu2 }
 0x1e4   : > { %1244 = vst [vmem:[%s3587_s23 + $0x80] sm:$0xff] %v1220_v61  ;;  %v1202_v0 = vadd.f32 %v1201_v63, %v1183_v62 }
 0x1e6   : > { %v1227_v1 = vmax.f32 %v1202_v0, 0.0 }
 0x1e7   : > { %v1163_v29 = vpop.f32.mrf.mxu3 }
 0x1e8   : > { %1251 = vst [vmem:[%s3587_s23 + $0xb8] sm:$0xff] %v1227_v1  ;;  %v1164_v2 = vadd.f32 %v1163_v29, %v1145_v19  ;;  %1258 = sbr.rel (!%p2789_p5) target bundleno = 647 (0x287), region = 102 }
 0x1ea   : > { %v1226_v3 = vmax.f32 %v1164_v2, 0.0 }
 0x1ec   : > { %1250 = vst [vmem:[%s3587_s23 + $0xb0] sm:$0xff] %v1226_v3 }
 0x1ed   : > { %s4025_s25 = smov (!%p1261_p1, %s1260_s25), 6 }
 0x1ee   : > { %s2057_s29 = sshll.u32 %s4025_s25, 5  ;;  %s3649_s8 = sshll.u32 %s4025_s25, 3 }
 0x1ef   : > { %p2061_p2 = scmp.eq.s32.totalorder %s2057_s29, 0 }
 0x1f0   : > { %p1271_p3 = scmp.lt.u32.totalorder (!%p2061_p2), %s3649_s8, 8 }
 0x1f1   : > { %1270 = sbr.rel (%p2061_p2) target bundleno = 647 (0x287), region = 106 }
 0x1f6   : > { %1274 = sbr.rel (%p1271_p3) target bundleno = 635 (0x27b), region = 110  ;;  %s3653_s20 = sand.u32 (!%p1271_p3), 7, %s3649_s8  }
 0x1f7   : > { %p1297_p5 = scmp.eq.s32.totalorder (!%p1271_p3), %s3653_s20, 0  ;;  %p2062_p4 = scmp.ne.s32.totalorder (!%p1271_p3), %s3653_s20, 0 }
 0x1fb   : > { %1300 = sbr.rel (%p2062_p4) target bundleno = 567 (0x237), region = 125  ;;  %s1301_s15 = sshrl.u32 (!%p2062_p4), %s3649_s8, 3 }
 0x1fc   : > { %s3660_s9 = sshrl.u32 (!%p2062_p4), %s1301_s15, 3 }
 0x1fd   : > { %p2063_p6 = scmp.le.s32.totalorder (!%p2062_p4), %s3660_s9, 0 }
 0x200   : > { %1711 = sbr.rel (%p2063_p6) target bundleno = 550 (0x226), region = 273  ;;  %s3996_s6 = smov (!%p2063_p6), %s3647_s24 }
 0x201   : > { %s3997_s10 = smov (!%p2063_p6), %s3587_s23  ;;  %s3669_s5 = smov (!%p2063_p6), 0  }
 0x202   : > { %s3671_s21 = smov (!%p2063_p6), 0  }
 0x205 LB: >> { %v1312_v47 = vld [vmem:[%s2675_s10] sm:$0xff]  ;;  %v1314_v4 = vld [vmem:[%s2675_s10 + $0x8] sm:$0xff]  ;;  %v1316_v5 = vld [vmem:[%s2675_s10 + $0x10] sm:$0xff]  ;;  %s1376_s22 = sadd.s32 1, %s2679_s5  ;;  %s1306_s21 = sadd.s32 1, %s2683_s21   ;;  %s2683_s21 = sphi %s3671_s21, %s1306_s21   ;;  %s2679_s5 = sphi %s3669_s5, %s4000_s5   ;;  %s2675_s10 = sphi %s3997_s10, %s3999_s10   ;;  %s2671_s6 = sphi %s3996_s6, %s3998_s6  }
 0x206   : >> { %1313 = vst [vmem:[%s2671_s6] sm:$0xff] %v1312_v47  ;;  %v1318_v6 = vld [vmem:[%s2675_s10 + $0x18] sm:$0xff]  ;;  %p1377_p7 = scmp.ge.s32.totalorder %s1376_s22, %s3660_s9  ;;  %v1320_v7 = vld [vmem:[%s2675_s10 + $0x20] sm:$0xff]  ;;  %v1322_v8 = vld [vmem:[%s2675_s10 + $0x28] sm:$0xff]  ;;  %p1305_p8 = scmp.ge.s32.totalorder %s1306_s21, %s3660_s9 }
 0x207   : >> { %1315 = vst [vmem:[%s2671_s6 + $0x8] sm:$0xff] %v1314_v4  ;;  %v1324_v9 = vld [vmem:[%s2675_s10 + $0x30] sm:$0xff]  ;;  %v1326_v31 = vld [vmem:[%s2675_s10 + $0x38] sm:$0xff]  ;;  %v1332_v10 = vld [vmem:[%s2675_s10 + $0x40] sm:$0xff] }
 0x208   : >> { %1317 = vst [vmem:[%s2671_s6 + $0x10] sm:$0xff] %v1316_v5  ;;  %s4027_s22 = smov (%p1377_p7, %s1376_s22), 0  ;;  %v1334_v11 = vld [vmem:[%s2675_s10 + $0x48] sm:$0xff]  ;;  %v1336_v13 = vld [vmem:[%s2675_s10 + $0x50] sm:$0xff]  ;;  %v1338_v50 = vld [vmem:[%s2675_s10 + $0x58] sm:$0xff] }
 0x209   : >> { %1319 = vst [vmem:[%s2671_s6 + $0x18] sm:$0xff] %v1318_v6  ;;  %s2064_s7 = sshll.u32 %s4027_s22, 6  ;;  %v1340_v15 = vld [vmem:[%s2675_s10 + $0x60] sm:$0xff]  ;;  %v1342_v16 = vld [vmem:[%s2675_s10 + $0x68] sm:$0xff]  ;;  %v1348_v17 = vld [vmem:[%s2675_s10 + $0x70] sm:$0xff]  ;;  %s4000_s5 = smov %s4027_s22 }
 0x20a   : >> { %1321 = vst [vmem:[%s2671_s6 + $0x20] sm:$0xff] %v1320_v7  ;;  %s3702_s11 = scalar_lea.vmem %s3587_s23, %s2064_s7 [#allocation3]   ;;  %s3705_s17 = scalar_lea.vmem %s3647_s24, %s2064_s7   ;;  %v1350_v18 = vld [vmem:[%s2675_s10 + $0x78] sm:$0xff]  ;;  %v1352_v14 = vld [vmem:[%s2675_s10 + $0x80] sm:$0xff]  ;;  %v1354_v20 = vld [vmem:[%s2675_s10 + $0x88] sm:$0xff] }
 0x20b   : >> { %1323 = vst [vmem:[%s2671_s6 + $0x28] sm:$0xff] %v1322_v8  ;;  %v1356_v21 = vld [vmem:[%s2675_s10 + $0x90] sm:$0xff]  ;;  %v1358_v22 = vld [vmem:[%s2675_s10 + $0x98] sm:$0xff]  ;;  %v1364_v23 = vld [vmem:[%s2675_s10 + $0xa0] sm:$0xff] }
 0x20c   : >> { %1325 = vst [vmem:[%s2671_s6 + $0x30] sm:$0xff] %v1324_v9  ;;  %v1366_v24 = vld [vmem:[%s2675_s10 + $0xa8] sm:$0xff]  ;;  %v1368_v25 = vld [vmem:[%s2675_s10 + $0xb0] sm:$0xff]  ;;  %v1370_v26 = vld [vmem:[%s2675_s10 + $0xb8] sm:$0xff] }
 0x20d   : >> { %1327 = vst [vmem:[%s2671_s6 + $0x38] sm:$0xff] %v1326_v31  ;;  %v1372_v27 = vld [vmem:[%s2675_s10 + $0xc0] sm:$0xff]  ;;  %v1374_v28 = vld [vmem:[%s2675_s10 + $0xc8] sm:$0xff]  ;;  %s3999_s10 = smov %s3702_s11 }
 0x20e   : >> { %1329 = vst [vmem:[%s2671_s6 + $0x58] sm:$0xff] %v1324_v9 }
 0x20f   : >> { %1331 = vst [vmem:[%s2671_s6 + $0x60] sm:$0xff] %v1326_v31 }
 0x210   : >> { %1333 = vst [vmem:[%s2671_s6 + $0x68] sm:$0xff] %v1332_v10 }
 0x211   : >> { %1335 = vst [vmem:[%s2671_s6 + $0x70] sm:$0xff] %v1334_v11 }
 0x212   : >> { %1337 = vst [vmem:[%s2671_s6 + $0x78] sm:$0xff] %v1336_v13 }
 0x213   : >> { %1339 = vst [vmem:[%s2671_s6 + $0x80] sm:$0xff] %v1338_v50 }
 0x214   : >> { %1341 = vst [vmem:[%s2671_s6 + $0x88] sm:$0xff] %v1340_v15 }
 0x215   : >> { %1343 = vst [vmem:[%s2671_s6 + $0x90] sm:$0xff] %v1342_v16 }
 0x216   : >> { %1345 = vst [vmem:[%s2671_s6 + $0xb0] sm:$0xff] %v1340_v15 }
 0x217   : >> { %1347 = vst [vmem:[%s2671_s6 + $0xb8] sm:$0xff] %v1342_v16 }
 0x218   : >> { %1349 = vst [vmem:[%s2671_s6 + $0xc0] sm:$0xff] %v1348_v17 }
 0x219   : >> { %1351 = vst [vmem:[%s2671_s6 + $0xc8] sm:$0xff] %v1350_v18 }
 0x21a   : >> { %1353 = vst [vmem:[%s2671_s6 + $0xd0] sm:$0xff] %v1352_v14 }
 0x21b   : >> { %1355 = vst [vmem:[%s2671_s6 + $0xd8] sm:$0xff] %v1354_v20 }
 0x21c   : >> { %1357 = vst [vmem:[%s2671_s6 + $0xe0] sm:$0xff] %v1356_v21 }
 0x21d   : >> { %1359 = vst [vmem:[%s2671_s6 + $0xe8] sm:$0xff] %v1358_v22 }
 0x21e   : >> { %1361 = vst [vmem:[%s2671_s6 + $0x108] sm:$0xff] %v1356_v21 }
 0x21f   : >> { %1363 = vst [vmem:[%s2671_s6 + $0x110] sm:$0xff] %v1358_v22 }
 0x220   : >> { %1365 = vst [vmem:[%s2671_s6 + $0x118] sm:$0xff] %v1364_v23 }
 0x221   : >> { %1367 = vst [vmem:[%s2671_s6 + $0x120] sm:$0xff] %v1366_v24  ;;  %1308 = sbr.rel (!%p1305_p8) target bundleno = 517 (0x205), region = 279 }
 0x222   : >> { %1369 = vst [vmem:[%s2671_s6 + $0x128] sm:$0xff] %v1368_v25 }
 0x223   : >> { %1371 = vst [vmem:[%s2671_s6 + $0x130] sm:$0xff] %v1370_v26 }
 0x224   : >> { %1373 = vst [vmem:[%s2671_s6 + $0x138] sm:$0xff] %v1372_v27 }
 0x225   : >> { %1375 = vst [vmem:[%s2671_s6 + $0x140] sm:$0xff] %v1374_v28  ;;  %s3998_s6 = smov %s3705_s17 }
 0x226 PF: > { %s3766_s28 = sand.u32 7, %s1301_s15   ;;  %s2150_s4 = sshll.u32 %s3660_s9, 6 }
 0x227   : > { %s3770_s14 = scalar_lea.vmem %s3587_s23, %s2150_s4 [#allocation3]   ;;  %s3773_s27 = scalar_lea.vmem %s3647_s24, %s2150_s4  }
 0x228   : > { %p2069_p9 = scmp.le.s32.totalorder %s3766_s28, 0 }
 0x229   : > { %s4001_s12 = smov (!%p2069_p9), %s3773_s27  ;;  %s4002_s30 = smov (!%p2069_p9), %s3770_s14 }
 0x22a   : > { %1725 = sbr.rel (%p2069_p9) target bundleno = 567 (0x237), region = 284  ;;  %s3782_s25 = smov (!%p2069_p9), 0  }
 0x22b   : > { %s2697_s26 = smov (!%p2069_p9), 0  }
 0x22f LB: >> { %v1399_v30 = vld [vmem:[%s2691_s30] sm:$0xff]  ;;  %v1401_v32 = vld [vmem:[%s2691_s30 + $0x30] sm:$0xff]  ;;  %s1407_s18 = sadd.s32 1, %s2695_s25  ;;  %s1393_s26 = sadd.s32 1, %s2699_s26   ;;  %s2699_s26 = sphi %s2697_s26, %s1393_s26   ;;  %s2695_s25 = sphi %s3782_s25, %s4003_s25   ;;  %s2691_s30 = sphi %s4002_s30, %s1412_s30   ;;  %s2687_s12 = sphi %s4001_s12, %s1413_s12  }
 0x230   : >> { %v1403_v33 = vld [vmem:[%s2691_s30 + $0x60] sm:$0xff]  ;;  %1400 = vst [vmem:[%s2687_s12] sm:$0xff] %v1399_v30  ;;  %v1405_v34 = vld [vmem:[%s2691_s30 + $0x90] sm:$0xff]  ;;  %p1408_p10 = scmp.ge.s32.totalorder %s1407_s18, %s3766_s28  ;;  %p1392_p11 = scmp.ge.s32.totalorder %s1393_s26, %s3766_s28 }
 0x231   : >> { %1402 = vst [vmem:[%s2687_s12 + $0x58] sm:$0xff] %v1401_v32 }
 0x232   : >> { %1404 = vst [vmem:[%s2687_s12 + $0xb0] sm:$0xff] %v1403_v33  ;;  %s4029_s18 = smov (%p1408_p10, %s1407_s18), 0  ;;  %1395 = sbr.rel (!%p1392_p11) target bundleno = 559 (0x22f), region = 290 }
 0x233   : >> { %1406 = vst [vmem:[%s2687_s12 + $0x108] sm:$0xff] %v1405_v34  ;;  %s2070_s29 = sshll.u32 %s4029_s18, 3  ;;  %s4003_s25 = smov %s4029_s18 }
 0x234   : >> { %s1412_s30 = scalar_lea.vmem %s3770_s14, %s2070_s29 [#allocation3]   ;;  %s1413_s12 = scalar_lea.vmem %s3773_s27, %s2070_s29  }
 0x237 PF: > { %1416 = sbr.rel (%p1297_p5) target bundleno = 635 (0x27b), region = 143  ;;  %s1418_s15 = ssub.s32 (!%p1297_p5), %s3649_s8, %s3653_s20 }
 0x238   : > { %s1422_s9 = sshrl.u32 (!%p1297_p5), %s3649_s8, 3  ;;  %s3803_s6 = scalar_lea.vmem (!%p1297_p5), %s3587_s23, %s1418_s15 [#allocation3] }
 0x239   : > { %s3806_s10 = scalar_lea.vmem (!%p1297_p5), %s3647_s24, %s1418_s15  ;;  %s3810_s5 = sshrl.u32 (!%p1297_p5), %s1422_s9, 3 }
 0x23a   : > { %p2072_p12 = scmp.le.s32.totalorder (!%p1297_p5), %s3810_s5, 0 }
 0x23c   : > { %1739 = sbr.rel (%p2072_p12) target bundleno = 610 (0x262), region = 295  ;;  %s4004_s21 = smov (!%p2072_p12), %s3647_s24 }
 0x23d   : > { %s4005_s22 = smov (!%p2072_p12), %s3587_s23  ;;  %s3819_s7 = smov (!%p2072_p12), 0  }
 0x23e   : > { %s3821_s11 = smov (!%p2072_p12), 0  }
 0x241 LB: >> { %v1433_v35 = vld [vmem:[%s2707_s22] sm:$0xff]  ;;  %v1435_v36 = vld [vmem:[%s2707_s22 + $0x8] sm:$0xff]  ;;  %v1437_v37 = vld [vmem:[%s2707_s22 + $0x10] sm:$0xff]  ;;  %s1497_s17 = sadd.s32 1, %s2711_s7  ;;  %s1427_s11 = sadd.s32 1, %s2715_s11   ;;  %s2715_s11 = sphi %s3821_s11, %s1427_s11   ;;  %s2711_s7 = sphi %s3819_s7, %s4008_s7   ;;  %s2707_s22 = sphi %s4005_s22, %s4007_s22   ;;  %s2703_s21 = sphi %s4004_s21, %s4006_s21  }
 0x242   : >> { %1434 = vst [vmem:[%s2703_s21] sm:$0xff] %v1433_v35  ;;  %v1439_v38 = vld [vmem:[%s2707_s22 + $0x18] sm:$0xff]  ;;  %p1498_p13 = scmp.ge.s32.totalorder %s1497_s17, %s3810_s5  ;;  %v1441_v39 = vld [vmem:[%s2707_s22 + $0x20] sm:$0xff]  ;;  %v1443_v40 = vld [vmem:[%s2707_s22 + $0x28] sm:$0xff]  ;;  %p1426_p0 = scmp.ge.s32.totalorder %s1427_s11, %s3810_s5 }
 0x243   : >> { %1436 = vst [vmem:[%s2703_s21 + $0x8] sm:$0xff] %v1435_v36  ;;  %v1445_v41 = vld [vmem:[%s2707_s22 + $0x30] sm:$0xff]  ;;  %v1447_v42 = vld [vmem:[%s2707_s22 + $0x38] sm:$0xff]  ;;  %v1453_v43 = vld [vmem:[%s2707_s22 + $0x40] sm:$0xff] }
 0x244   : >> { %1438 = vst [vmem:[%s2703_s21 + $0x10] sm:$0xff] %v1437_v37  ;;  %s4031_s17 = smov (%p1498_p13, %s1497_s17), 0  ;;  %v1455_v44 = vld [vmem:[%s2707_s22 + $0x48] sm:$0xff]  ;;  %v1457_v45 = vld [vmem:[%s2707_s22 + $0x50] sm:$0xff]  ;;  %v1459_v46 = vld [vmem:[%s2707_s22 + $0x58] sm:$0xff] }
 0x245   : >> { %1440 = vst [vmem:[%s2703_s21 + $0x18] sm:$0xff] %v1439_v38  ;;  %s2073_s28 = sshll.u32 %s4031_s17, 6  ;;  %v1461_v48 = vld [vmem:[%s2707_s22 + $0x60] sm:$0xff]  ;;  %v1463_v49 = vld [vmem:[%s2707_s22 + $0x68] sm:$0xff]  ;;  %v1469_v51 = vld [vmem:[%s2707_s22 + $0x70] sm:$0xff]  ;;  %s4008_s7 = smov %s4031_s17 }
 0x246   : >> { %1442 = vst [vmem:[%s2703_s21 + $0x20] sm:$0xff] %v1441_v39  ;;  %s3852_s4 = scalar_lea.vmem %s3587_s23, %s2073_s28 [#allocation3]   ;;  %s3855_s14 = scalar_lea.vmem %s3647_s24, %s2073_s28   ;;  %v1471_v52 = vld [vmem:[%s2707_s22 + $0x78] sm:$0xff]  ;;  %v1473_v53 = vld [vmem:[%s2707_s22 + $0x80] sm:$0xff]  ;;  %v1475_v12 = vld [vmem:[%s2707_s22 + $0x88] sm:$0xff] }
 0x247   : >> { %1444 = vst [vmem:[%s2703_s21 + $0x28] sm:$0xff] %v1443_v40  ;;  %v1477_v54 = vld [vmem:[%s2707_s22 + $0x90] sm:$0xff]  ;;  %v1479_v55 = vld [vmem:[%s2707_s22 + $0x98] sm:$0xff]  ;;  %v1485_v56 = vld [vmem:[%s2707_s22 + $0xa0] sm:$0xff] }
 0x248   : >> { %1446 = vst [vmem:[%s2703_s21 + $0x30] sm:$0xff] %v1445_v41  ;;  %v1487_v57 = vld [vmem:[%s2707_s22 + $0xa8] sm:$0xff]  ;;  %v1489_v58 = vld [vmem:[%s2707_s22 + $0xb0] sm:$0xff]  ;;  %v1491_v59 = vld [vmem:[%s2707_s22 + $0xb8] sm:$0xff] }
 0x249   : >> { %1448 = vst [vmem:[%s2703_s21 + $0x38] sm:$0xff] %v1447_v42  ;;  %v1493_v60 = vld [vmem:[%s2707_s22 + $0xc0] sm:$0xff]  ;;  %v1495_v61 = vld [vmem:[%s2707_s22 + $0xc8] sm:$0xff]  ;;  %s4007_s22 = smov %s3852_s4 }
 0x24a   : >> { %1450 = vst [vmem:[%s2703_s21 + $0x58] sm:$0xff] %v1445_v41 }
 0x24b   : >> { %1452 = vst [vmem:[%s2703_s21 + $0x60] sm:$0xff] %v1447_v42 }
 0x24c   : >> { %1454 = vst [vmem:[%s2703_s21 + $0x68] sm:$0xff] %v1453_v43 }
 0x24d   : >> { %1456 = vst [vmem:[%s2703_s21 + $0x70] sm:$0xff] %v1455_v44 }
 0x24e   : >> { %1458 = vst [vmem:[%s2703_s21 + $0x78] sm:$0xff] %v1457_v45 }
 0x24f   : >> { %1460 = vst [vmem:[%s2703_s21 + $0x80] sm:$0xff] %v1459_v46 }
 0x250   : >> { %1462 = vst [vmem:[%s2703_s21 + $0x88] sm:$0xff] %v1461_v48 }
 0x251   : >> { %1464 = vst [vmem:[%s2703_s21 + $0x90] sm:$0xff] %v1463_v49 }
 0x252   : >> { %1466 = vst [vmem:[%s2703_s21 + $0xb0] sm:$0xff] %v1461_v48 }
 0x253   : >> { %1468 = vst [vmem:[%s2703_s21 + $0xb8] sm:$0xff] %v1463_v49 }
 0x254   : >> { %1470 = vst [vmem:[%s2703_s21 + $0xc0] sm:$0xff] %v1469_v51 }
 0x255   : >> { %1472 = vst [vmem:[%s2703_s21 + $0xc8] sm:$0xff] %v1471_v52 }
 0x256   : >> { %1474 = vst [vmem:[%s2703_s21 + $0xd0] sm:$0xff] %v1473_v53 }
 0x257   : >> { %1476 = vst [vmem:[%s2703_s21 + $0xd8] sm:$0xff] %v1475_v12 }
 0x258   : >> { %1478 = vst [vmem:[%s2703_s21 + $0xe0] sm:$0xff] %v1477_v54 }
 0x259   : >> { %1480 = vst [vmem:[%s2703_s21 + $0xe8] sm:$0xff] %v1479_v55 }
 0x25a   : >> { %1482 = vst [vmem:[%s2703_s21 + $0x108] sm:$0xff] %v1477_v54 }
 0x25b   : >> { %1484 = vst [vmem:[%s2703_s21 + $0x110] sm:$0xff] %v1479_v55 }
 0x25c   : >> { %1486 = vst [vmem:[%s2703_s21 + $0x118] sm:$0xff] %v1485_v56 }
 0x25d   : >> { %1488 = vst [vmem:[%s2703_s21 + $0x120] sm:$0xff] %v1487_v57  ;;  %1429 = sbr.rel (!%p1426_p0) target bundleno = 577 (0x241), region = 301 }
 0x25e   : >> { %1490 = vst [vmem:[%s2703_s21 + $0x128] sm:$0xff] %v1489_v58 }
 0x25f   : >> { %1492 = vst [vmem:[%s2703_s21 + $0x130] sm:$0xff] %v1491_v59 }
 0x260   : >> { %1494 = vst [vmem:[%s2703_s21 + $0x138] sm:$0xff] %v1493_v60 }
 0x261   : >> { %1496 = vst [vmem:[%s2703_s21 + $0x140] sm:$0xff] %v1495_v61  ;;  %s4006_s21 = smov %s3855_s14 }
 0x262 PF: > { %s3916_s27 = sand.u32 7, %s1422_s9   ;;  %s2152_s12 = sshll.u32 %s3810_s5, 6 }
 0x263   : > { %s3920_s30 = scalar_lea.vmem %s3587_s23, %s2152_s12 [#allocation3]   ;;  %s3923_s25 = scalar_lea.vmem %s3647_s24, %s2152_s12  }
 0x264   : > { %p2078_p1 = scmp.le.s32.totalorder %s3916_s27, 0 }
 0x265   : > { %s4009_s26 = smov (!%p2078_p1), %s3923_s25  ;;  %s4010_s18 = smov (!%p2078_p1), %s3920_s30 }
 0x266   : > { %1753 = sbr.rel (%p2078_p1) target bundleno = 627 (0x273), region = 306  ;;  %s2725_s29 = smov (!%p2078_p1), 0  }
 0x267   : > { %s2729_s15 = smov (!%p2078_p1), 0  }
 0x26b LB: >> { %v1520_v62 = vld [vmem:[%s2723_s18] sm:$0xff]  ;;  %v1522_v63 = vld [vmem:[%s2723_s18 + $0x30] sm:$0xff]  ;;  %s1528_s9 = sadd.s32 1, %s2727_s29  ;;  %s1514_s15 = sadd.s32 1, %s2731_s15   ;;  %s2731_s15 = sphi %s2729_s15, %s1514_s15   ;;  %s2727_s29 = sphi %s2725_s29, %s2726_s29   ;;  %s2723_s18 = sphi %s4010_s18, %s1533_s18   ;;  %s2719_s26 = sphi %s4009_s26, %s1534_s26  }
 0x26c   : >> { %v1524_v0 = vld [vmem:[%s2723_s18 + $0x60] sm:$0xff]  ;;  %1521 = vst [vmem:[%s2719_s26] sm:$0xff] %v1520_v62  ;;  %v1526_v19 = vld [vmem:[%s2723_s18 + $0x90] sm:$0xff]  ;;  %p1529_p2 = scmp.ge.s32.totalorder %s1528_s9, %s3916_s27  ;;  %p1513_p3 = scmp.ge.s32.totalorder %s1514_s15, %s3916_s27 }
 0x26d   : >> { %1523 = vst [vmem:[%s2719_s26 + $0x58] sm:$0xff] %v1522_v63 }
 0x26e   : >> { %1525 = vst [vmem:[%s2719_s26 + $0xb0] sm:$0xff] %v1524_v0  ;;  %s4033_s9 = smov (%p1529_p2, %s1528_s9), 0  ;;  %1516 = sbr.rel (!%p1513_p3) target bundleno = 619 (0x26b), region = 312 }
 0x26f   : >> { %1527 = vst [vmem:[%s2719_s26 + $0x108] sm:$0xff] %v1526_v19  ;;  %s2079_s5 = sshll.u32 %s4033_s9, 3  ;;  %s2726_s29 = smov %s4033_s9  }
 0x270   : >> { %s1533_s18 = scalar_lea.vmem %s3920_s30, %s2079_s5 [#allocation3]   ;;  %s1534_s26 = scalar_lea.vmem %s3923_s25, %s2079_s5  }
 0x273 PF: > { %s2736_s21 = smov 1  }
 0x274   : > { %s1535_s22 = sshll.u32 %s2736_s21, %s3653_s20 }
 0x275   : > { %s2081_s7 = sadd.s32 4294967295, %s1535_s22 }
 0x276   : > { %v1545_v1 = vld [vmem:[%s3803_s6] sm:%s2081_s7]  ;;  %v1547_v29 = vld [vmem:[%s3803_s6 + $0x30] sm:%s2081_s7] }
 0x277   : > { %1546 = vst [vmem:[%s3806_s10] sm:%s2081_s7] %v1545_v1  ;;  %v1549_v2 = vld [vmem:[%s3803_s6 + $0x60] sm:%s2081_s7] }
 0x278   : > { %1548 = vst [vmem:[%s3806_s10 + $0x58] sm:%s2081_s7] %v1547_v29  ;;  %v1551_v3 = vld [vmem:[%s3803_s6 + $0x90] sm:%s2081_s7] }
 0x279   : > { %1550 = vst [vmem:[%s3806_s10 + $0xb0] sm:%s2081_s7] %v1549_v2 }
 0x27a   : > { %1552 = vst [vmem:[%s3806_s10 + $0x108] sm:%s2081_s7] %v1551_v3 }
 0x27b PF: > { %p2082_p5 = scmp.ge.u32.totalorder %s3649_s8, 8 }
 0x27c   : > { %s2737_s11 = smov (!%p2082_p5), 1  }
 0x27d   : > { %1277 = sbr.rel (%p2082_p5) target bundleno = 647 (0x287), region = 114  ;;  %s1278_s20 = sshll.u32 (!%p2082_p5), %s2737_s11, %s3649_s8 }
 0x27e   : > { %s2083_s17 = sadd.s32 (!%p2082_p5), 4294967295, %s1278_s20 }
 0x282   : > { %v1288_v47 = vld [vmem:[%s3587_s23] sm:%s2083_s17]  ;;  %v1290_v4 = vld [vmem:[%s3587_s23 + $0x30] sm:%s2083_s17] }
 0x283   : > { %1289 = vst [vmem:[%s3647_s24] sm:%s2083_s17] %v1288_v47  ;;  %v1292_v5 = vld [vmem:[%s3587_s23 + $0x60] sm:%s2083_s17] }
 0x284   : > { %1291 = vst [vmem:[%s3647_s24 + $0x58] sm:%s2083_s17] %v1290_v4  ;;  %v1294_v6 = vld [vmem:[%s3587_s23 + $0x90] sm:%s2083_s17] }
 0x285   : > { %1293 = vst [vmem:[%s3647_s24 + $0xb0] sm:%s2083_s17] %v1292_v5 }
 0x286   : > { %1295 = vst [vmem:[%s3647_s24 + $0x108] sm:%s2083_s17] %v1294_v6 }
 0x287 PF: > { %p10_p4 = scmp.ge.s32.totalorder %s2777_s16, 4   ;;  %s4011_s12 = smov %s2599_s13 }
 0x288   : > { %s4012_s13 = smov %s2787_s19  ;;  %s4013_s14 = smov %s2777_s16 }
 0x289   :  { %12 = sbr.rel (!%p10_p4) target bundleno = 2 (0x2), region = 323 }

// kernel: framewise_forward_pallas.8
= control target key start
LH: loop header
LB: loop body
LE: loop exit
PB: predicated region body
PF: predicated region fallthrough
CT: control target
= control target key end

     0   :  { %s1364_s12 = smov 0   ;;  %s1366_s13 = smov 0   ;;  %s1763_s0 = inlined_call_operand.vmem [shape: bf16[64,288], index: 0, kind: input, shape index: {}]   ;;  %s1764_s1 = inlined_call_operand.vmem [shape: bf16[288,480], index: 1, kind: input, shape index: {}]   ;;  %s1765_s2 = inlined_call_operand.vmem [shape: f32[64,1], index: 2, kind: input, shape index: {}]   ;;  %s1766_s3 = inlined_call_operand.vmem [shape: f32[64,480], index: 3, kind: output, shape index: {}]  }
   0x1   :  { %s1368_s14 = smov 0  }
   0x2 LB: > { %s1016_s15 = sadd.s32 4294967295, %s1341_s14   ;;  %s1381_s16 = sadd.s32 1, %s1341_s14   ;;  %s1341_s14 = sphi %s1368_s14, %s1770_s14   ;;  %s1337_s13 = sphi %s1366_s13, %s1769_s13   ;;  %s1333_s12 = sphi %s1364_s12, %s1768_s12  }
   0x3   : > { %s38_s17 = ssub.s32 %s1341_s14, %s1381_s16  ;;  %s41_s18 = sadd.s32 1, %s1337_s13 }
   0x4   : > { %p39_p0 = scmp.eq.s32.totalorder %s38_s17, 0  ;;  %p48_p1 = scmp.ne.s32.totalorder %s1337_s13, %s1333_s12 }
   0x5   : > { %p49_p2 = scmp.eq.s32.totalorder %s1341_s14, 0  ;;  %p99_p3 = scmp.eq.s32.totalorder %s1016_s15, 1 }
   0x6   : > { %s1392_s19 = scalar_select %p39_p0, %s1337_s13, %s41_s18  }
   0x7   : > { %p50_p4 = por %p49_p2, %p48_p1  ;;  %p1394_p5 = por %p99_p3, %p48_p1 }
   0x8   : > { %p1019_p6 = scmp.ge.s32.totalorder %s1341_s14, 2 }
   0xa   : > { %127 = sbr.rel (%p1019_p6) target bundleno = 55 (0x37), region = 24 }
   0xf   : > { %130 = sbr.rel (!%p50_p4) target bundleno = 55 (0x37), region = 28  ;;  %s132_s21 = sand.u32 (%p50_p4), 1, %s1337_s13  }
  0x10   : > { %s1229_s22 = sshll.u32 (%p50_p4), %s1341_s14, 3  ;;  %s1289_s23 = smul.u32 (%p50_p4), 288, %s132_s21 }
  0x11   : > { %s1404_s26 = scalar_lea.vmem (%p50_p4), %s1764_s1, %s1229_s22 }
  0x12   : > { %v236_v0 = vld [vmem:[%s1404_s26] sm:$0xff] (%p50_p4)  ;;  %v238_v1 = vld [vmem:[%s1404_s26 + $0x10] sm:$0xff] (%p50_p4)  ;;  %s1409_s27 = scalar_lea.vmem (%p50_p4), [#allocation2], %s1289_s23 }
  0x13   : > { %v240_v2 = vld [vmem:[%s1404_s26 + $0x20] sm:$0xff] (%p50_p4)  ;;  %237 = vst [vmem:[%s1409_s27] sm:$0xff] (%p50_p4), %v236_v0  ;;  %v242_v3 = vld [vmem:[%s1404_s26 + $0x30] sm:$0xff] (%p50_p4) }
  0x14   : > { %239 = vst [vmem:[%s1409_s27 + $0x8] sm:$0xff] %v238_v1  ;;  %v244_v4 = vld [vmem:[%s1404_s26 + $0x40] sm:$0xff]  ;;  %v246_v5 = vld [vmem:[%s1404_s26 + $0x50] sm:$0xff] }
  0x15   : > { %241 = vst [vmem:[%s1409_s27 + $0x10] sm:$0xff] %v240_v2  ;;  %v248_v6 = vld [vmem:[%s1404_s26 + $0x60] sm:$0xff]  ;;  %v250_v7 = vld [vmem:[%s1404_s26 + $0x70] sm:$0xff] }
  0x16   : > { %243 = vst [vmem:[%s1409_s27 + $0x18] sm:$0xff] %v242_v3  ;;  %v252_v8 = vld [vmem:[%s1404_s26 + $0x80] sm:$0xff]  ;;  %v254_v9 = vld [vmem:[%s1404_s26 + $0x90] sm:$0xff] }
  0x17   : > { %245 = vst [vmem:[%s1409_s27 + $0x20] sm:$0xff] %v244_v4  ;;  %v256_v10 = vld [vmem:[%s1404_s26 + $0xa0] sm:$0xff]  ;;  %v258_v11 = vld [vmem:[%s1404_s26 + $0xb0] sm:$0xff] }
  0x18   : > { %247 = vst [vmem:[%s1409_s27 + $0x28] sm:$0xff] %v246_v5  ;;  %v260_v12 = vld [vmem:[%s1404_s26 + $0xc0] sm:$0xff]  ;;  %v262_v13 = vld [vmem:[%s1404_s26 + $0xd0] sm:$0xff] }
  0x19   : > { %249 = vst [vmem:[%s1409_s27 + $0x30] sm:$0xff] %v248_v6  ;;  %v264_v14 = vld [vmem:[%s1404_s26 + $0xe0] sm:$0xff]  ;;  %v266_v15 = vld [vmem:[%s1404_s26 + $0xf0] sm:$0xff] }
  0x1a   : > { %251 = vst [vmem:[%s1409_s27 + $0x38] sm:$0xff] %v250_v7  ;;  %v268_v16 = vld [vmem:[%s1404_s26 + $0x100] sm:$0xff]  ;;  %v270_v17 = vld [vmem:[%s1404_s26 + $0x110] sm:$0xff] }
  0x1b   : > { %253 = vst [vmem:[%s1409_s27 + $0x40] sm:$0xff] %v252_v8  ;;  %v272_v18 = vld [vmem:[%s1404_s26 + $0x120] sm:$0xff]  ;;  %v274_v19 = vld [vmem:[%s1404_s26 + $0x130] sm:$0xff] }
  0x1c   : > { %255 = vst [vmem:[%s1409_s27 + $0x48] sm:$0xff] %v254_v9  ;;  %v276_v20 = vld [vmem:[%s1404_s26 + $0x140] sm:$0xff]  ;;  %v278_v21 = vld [vmem:[%s1404_s26 + $0x150] sm:$0xff] }
  0x1d   : > { %257 = vst [vmem:[%s1409_s27 + $0x50] sm:$0xff] %v256_v10  ;;  %v280_v22 = vld [vmem:[%s1404_s26 + $0x160] sm:$0xff]  ;;  %v282_v23 = vld [vmem:[%s1404_s26 + $0x170] sm:$0xff] }
  0x1e   : > { %259 = vst [vmem:[%s1409_s27 + $0x58] sm:$0xff] %v258_v11  ;;  %v284_v24 = vld [vmem:[%s1404_s26 + $0x180] sm:$0xff]  ;;  %v286_v25 = vld [vmem:[%s1404_s26 + $0x190] sm:$0xff] }
  0x1f   : > { %261 = vst [vmem:[%s1409_s27 + $0x60] sm:$0xff] %v260_v12  ;;  %v288_v26 = vld [vmem:[%s1404_s26 + $0x1a0] sm:$0xff]  ;;  %v290_v27 = vld [vmem:[%s1404_s26 + $0x1b0] sm:$0xff] }
  0x20   : > { %263 = vst [vmem:[%s1409_s27 + $0x68] sm:$0xff] %v262_v13  ;;  %v292_v28 = vld [vmem:[%s1404_s26 + $0x1c0] sm:$0xff]  ;;  %v294_v29 = vld [vmem:[%s1404_s26 + $0x1d0] sm:$0xff] }
  0x21   : > { %265 = vst [vmem:[%s1409_s27 + $0x70] sm:$0xff] %v264_v14  ;;  %v296_v30 = vld [vmem:[%s1404_s26 + $0x1e0] sm:$0xff]  ;;  %v298_v31 = vld [vmem:[%s1404_s26 + $0x1f0] sm:$0xff] }
  0x22   : > { %267 = vst [vmem:[%s1409_s27 + $0x78] sm:$0xff] %v266_v15  ;;  %v300_v32 = vld [vmem:[%s1404_s26 + $0x200] sm:$0xff]  ;;  %v302_v33 = vld [vmem:[%s1404_s26 + $0x210] sm:$0xff] }
  0x23   : > { %269 = vst [vmem:[%s1409_s27 + $0x80] sm:$0xff] %v268_v16  ;;  %v304_v34 = vld [vmem:[%s1404_s26 + $0x220] sm:$0xff]  ;;  %v306_v35 = vld [vmem:[%s1404_s26 + $0x230] sm:$0xff] }
  0x24   : > { %271 = vst [vmem:[%s1409_s27 + $0x88] sm:$0xff] %v270_v17 }
  0x25   : > { %273 = vst [vmem:[%s1409_s27 + $0x90] sm:$0xff] %v272_v18 }
  0x26   : > { %275 = vst [vmem:[%s1409_s27 + $0x98] sm:$0xff] %v274_v19 }
  0x27   : > { %277 = vst [vmem:[%s1409_s27 + $0xa0] sm:$0xff] %v276_v20 }
  0x28   : > { %279 = vst [vmem:[%s1409_s27 + $0xa8] sm:$0xff] %v278_v21 }
  0x29   : > { %281 = vst [vmem:[%s1409_s27 + $0xb0] sm:$0xff] %v280_v22 }
  0x2a   : > { %283 = vst [vmem:[%s1409_s27 + $0xb8] sm:$0xff] %v282_v23 }
  0x2b   : > { %285 = vst [vmem:[%s1409_s27 + $0xc0] sm:$0xff] %v284_v24 }
  0x2c   : > { %287 = vst [vmem:[%s1409_s27 + $0xc8] sm:$0xff] %v286_v25 }
  0x2d   : > { %289 = vst [vmem:[%s1409_s27 + $0xd0] sm:$0xff] %v288_v26 }
  0x2e   : > { %291 = vst [vmem:[%s1409_s27 + $0xd8] sm:$0xff] %v290_v27 }
  0x2f   : > { %293 = vst [vmem:[%s1409_s27 + $0xe0] sm:$0xff] %v292_v28 }
  0x30   : > { %295 = vst [vmem:[%s1409_s27 + $0xe8] sm:$0xff] %v294_v29 }
  0x31   : > { %297 = vst [vmem:[%s1409_s27 + $0xf0] sm:$0xff] %v296_v30 }
  0x32   : > { %299 = vst [vmem:[%s1409_s27 + $0xf8] sm:$0xff] %v298_v31 }
  0x33   : > { %301 = vst [vmem:[%s1409_s27 + $0x100] sm:$0xff] %v300_v32 }
  0x34   : > { %303 = vst [vmem:[%s1409_s27 + $0x108] sm:$0xff] %v302_v33 }
  0x35   : > { %305 = vst [vmem:[%s1409_s27 + $0x110] sm:$0xff] %v304_v34 }
  0x36   : > { %307 = vst [vmem:[%s1409_s27 + $0x118] sm:$0xff] %v306_v35 }
  0x37 PF: > { %p1022_p7 = scmp.ge.s32.totalorder %s1341_s14, 1  ;;  %p312_p8 = scmp.lt.s32.totalorder %s1341_s14, 3 }
  0x39   : > { %p313_p9 = pnand %p1022_p7, %p312_p8 }
  0x3a   : > { %s319_s28 = sand.u32 (!%p313_p9), 1, %s1333_s12  }
  0x3b   : > { %316 = sbr.rel (%p313_p9) target bundleno = 331 (0x14b), region = 66  ;;  %s1023_s18 = sshll.u32 (!%p313_p9), %s319_s28, 7 }
  0x3c   : > { %s1290_s29 = smul.u32 (!%p313_p9), 288, %s319_s28  ;;  %s1703_s21 = scalar_lea.vmem (!%p313_p9), [#allocation3], %s1023_s18 }
  0x3e   : > { %s1485_s30 = scalar_lea.vmem (!%p313_p9), [#allocation2], %s1290_s29 }
  0x40   : > { %v1130_v36 = vld [vmem:[%s1485_s30 + $0x70] sm:$0xf]  ;;  %v1257_v37 = vld [vmem:[%s1485_s30 + $0x74] sm:$0xf0]  ;;  %v1122_v41 = vld [vmem:[%s1485_s30 + $0x60] sm:$0xf] }
  0x41   : > { %v1210_v38 = vld [vmem:[%s1485_s30 + $0x110] sm:$0xf]  ;;  %v1131_v39 = vor.u32 %v1257_v37, %v1130_v36  ;;  %v1277_v40 = vld [vmem:[%s1485_s30 + $0x114] sm:$0xf0]  ;;  %v1255_v42 = vld [vmem:[%s1485_s30 + $0x64] sm:$0xf0] }
  0x42   : > { %v1211_v43 = vor.u32 %v1277_v40, %v1210_v38  ;;  %v1202_v44 = vld [vmem:[%s1485_s30 + $0x100] sm:$0xf]  ;;  %v1275_v45 = vld [vmem:[%s1485_s30 + $0x104] sm:$0xf0]  ;;  %v1058_v46 = vld [vmem:[%s1763_s0 + $0x38] sm:$0xf]  ;;  %v1123_v48 = vor.u32 %v1255_v42, %v1122_v41 }
  0x43   : > { %v1238_v47 = vld [vmem:[%s1763_s0 + $0x40] sm:$0xf0]  ;;  %697 = vmatpush.bf16.msra.mxu0 %v1131_v39  ;;  %1279 = vmatpush.bf16.msra.mxu1 %v1131_v39  ;;  %v1114_v49 = vld [vmem:[%s1485_s30 + $0x50] sm:$0xf]  ;;  %v1256_v50 = vld [vmem:[%s1485_s30 + $0x74] sm:$0xf]  ;;  %v1203_v52 = vor.u32 %v1275_v45, %v1202_v44 }
  0x44   : > { %v1132_v51 = vld [vmem:[%s1485_s30 + $0x78] sm:$0xf0]  ;;  %1287 = vmatpush.bf16.msra.mxu3 %v1211_v43  ;;  %761 = vmatpush.bf16.msra.mxu2 %v1211_v43  ;;  %v1253_v53 = vld [vmem:[%s1485_s30 + $0x54] sm:$0xf0]  ;;  %v1272_v54 = vld [vmem:[%s1485_s30 + $0xf4] sm:$0xf]  ;;  %v1517_v0 = vor.u32 %v1238_v47, %v1058_v46 }
  0x45   : > { %v1196_v55 = vld [vmem:[%s1485_s30 + $0xf8] sm:$0xf0]  ;;  %v1135_v56 = vor.u32 %v1256_v50, %v1132_v51  ;;  %v1034_v57 = vld [vmem:[%s1763_s0 + $0x8] sm:$0xf]  ;;  %v1232_v58 = vld [vmem:[%s1763_s0 + $0x10] sm:$0xf0]  ;;  %v1115_v1 = vor.u32 %v1253_v53, %v1114_v49 }
  0x46   : > { %v1199_v59 = vor.u32 %v1272_v54, %v1196_v55  ;;  %v1254_v60 = vld [vmem:[%s1485_s30 + $0x64] sm:$0xf]  ;;  %v1124_v61 = vld [vmem:[%s1485_s30 + $0x68] sm:$0xf0]  ;;  %vm684_vm0 = vcmask 261120   ;;  %v1519_v2 = vor.u32 %v1232_v58, %v1034_v57  ;;  %v1343_v43 = vmov 0  }
  0x47   : > { %v1270_v62 = vld [vmem:[%s1485_s30 + $0xe4] sm:$0xf]  ;;  %v1188_v63 = vld [vmem:[%s1485_s30 + $0xe8] sm:$0xf0]  ;;  %698 = vmatpush.bf16.msra.mxu0 %v1123_v48  ;;  %1280 = vmatpush.bf16.msra.mxu1 %v1123_v48  ;;  %v1106_v3 = vld [vmem:[%s1485_s30 + $0x40] sm:$0xf]  ;;  %v1127_v5 = vor.u32 %v1254_v60, %v1124_v61 }
  0x48   : > { %1288 = vmatpush.bf16.msra.mxu3 %v1203_v52  ;;  %762 = vmatpush.bf16.msra.mxu2 %v1203_v52  ;;  %v1251_v4 = vld [vmem:[%s1485_s30 + $0x44] sm:$0xf0]  ;;  %v1191_v6 = vor.u32 %v1270_v62, %v1188_v63  ;;  %v1252_v7 = vld [vmem:[%s1485_s30 + $0x54] sm:$0xf]  ;;  %v1116_v8 = vld [vmem:[%s1485_s30 + $0x58] sm:$0xf0] }
  0x49   : > { %v1268_v9 = vld [vmem:[%s1485_s30 + $0xd4] sm:$0xf]  ;;  %v1180_v10 = vld [vmem:[%s1485_s30 + $0xd8] sm:$0xf0]  ;;  %v1107_v11 = vor.u32 %v1251_v4, %v1106_v3  ;;  %v1098_v12 = vld [vmem:[%s1485_s30 + $0x30] sm:$0xf]  ;;  %v1119_v14 = vor.u32 %v1252_v7, %v1116_v8  ;;  %1316 = vset.pattern.permute.xlu0 %v1343_v43  ;;  %1317 = vset.pattern.permute.xlu1 %v1343_v43 }
  0x4a   : > { %v1249_v13 = vld [vmem:[%s1485_s30 + $0x34] sm:$0xf0]  ;;  %v1183_v15 = vor.u32 %v1268_v9, %v1180_v10  ;;  %v1250_v16 = vld [vmem:[%s1485_s30 + $0x44] sm:$0xf]  ;;  %v1108_v17 = vld [vmem:[%s1485_s30 + $0x48] sm:$0xf0]  ;;  %1318 = vset.pattern.permute.xlu2 %v1343_v43 }
  0x4b   : > { %1218 = vmatmul.msk.bf16.vlgmr.msra.gmra.mxu3 %vm684_vm0, %v1517_v0  ;;  %699 = vmatpush.bf16.msra.mxu0 %v1115_v1  ;;  %v1266_v18 = vld [vmem:[%s1485_s30 + $0xc4] sm:$0xf]  ;;  %v1172_v19 = vld [vmem:[%s1485_s30 + $0xc8] sm:$0xf0]  ;;  %v1099_v20 = vor.u32 %v1249_v13, %v1098_v12  ;;  %v1090_v21 = vld [vmem:[%s1485_s30 + $0x20] sm:$0xf]  ;;  %v1111_v23 = vor.u32 %v1250_v16, %v1108_v17 }
  0x4c   : > { %784 = vmatpush.bf16.msrb.mxu3 %v1135_v56  ;;  %813 = vmatpush.bf16.msrb.mxu2 %v1199_v59  ;;  %v1247_v22 = vld [vmem:[%s1485_s30 + $0x24] sm:$0xf0]  ;;  %v1175_v24 = vor.u32 %v1266_v18, %v1172_v19  ;;  %v1248_v25 = vld [vmem:[%s1485_s30 + $0x34] sm:$0xf]  ;;  %v1100_v26 = vld [vmem:[%s1485_s30 + $0x38] sm:$0xf0] }
  0x4d   : > { %1281 = vmatpush.bf16.msra.mxu1 %v1115_v1  ;;  %1216 = vmatmul.msk.bf16.vlgmr.msra.gmra.mxu2 %vm684_vm0, %v1519_v2  ;;  %v1264_v27 = vld [vmem:[%s1485_s30 + $0xb4] sm:$0xf]  ;;  %v1164_v28 = vld [vmem:[%s1485_s30 + $0xb8] sm:$0xf0]  ;;  %v1091_v29 = vor.u32 %v1247_v22, %v1090_v21  ;;  %v1070_v30 = vld [vmem:[%s1763_s0 + $0x50] sm:$0xf]  ;;  %v1103_v35 = vor.u32 %v1248_v25, %v1100_v26 }
  0x4e   : > { %v1241_v31 = vld [vmem:[%s1763_s0 + $0x58] sm:$0xf0]  ;;  %v1082_v32 = vld [vmem:[%s1485_s30 + $0x10] sm:$0xf]  ;;  %v1245_v33 = vld [vmem:[%s1485_s30 + $0x14] sm:$0xf0]  ;;  %v1167_v37 = vor.u32 %v1264_v27, %v1164_v28 }
  0x4f   : > { %700 = vmatpush.bf16.msra.mxu0 %v1107_v11  ;;  %v1046_v34 = vld [vmem:[%s1763_s0 + $0x20] sm:$0xf]  ;;  %v1235_v36 = vld [vmem:[%s1763_s0 + $0x28] sm:$0xf0]  ;;  %v1246_v38 = vld [vmem:[%s1485_s30 + $0x24] sm:$0xf]  ;;  %v1564_v44 = vor.u32 %v1241_v31, %v1070_v30  ;;  %v1083_v45 = vor.u32 %v1245_v33, %v1082_v32 }
  0x50   : > { %785 = vmatpush.bf16.msrb.mxu3 %v1127_v5  ;;  %814 = vmatpush.bf16.msrb.mxu2 %v1191_v6  ;;  %v396_v39 = vld [vmem:[%s1765_s2] sm:$0xff]  ;;  %v1092_v40 = vld [vmem:[%s1485_s30 + $0x28] sm:$0xf0]  ;;  %v1566_v46 = vor.u32 %v1235_v36, %v1046_v34  ;;  %v1243_v48 = vld [vmem:[%s1485_s30 + $0x4] sm:$0xf0]  ;;  %s1278_s12 = sshll.u32 (%p1394_p5), %s1016_s15, 4 }
  0x51   : > { %1282 = vmatpush.bf16.msra.mxu1 %v1107_v11  ;;  %v1262_v41 = vld [vmem:[%s1485_s30 + $0xa4] sm:$0xf]  ;;  %v1156_v42 = vld [vmem:[%s1485_s30 + $0xa8] sm:$0xf0]  ;;  %406 = vperm.xlu0 %1316, %v396_v39   ;;  %v1074_v47 = vld [vmem:[%s1485_s30] sm:$0xf]  ;;  %v1095_v50 = vor.u32 %v1246_v38, %v1092_v40  ;;  %s912_s20 = scalar_lea.vmem (%p1394_p5), %s1766_s3, %s1278_s12 }
  0x52   : > { %v1194_v49 = vld [vmem:[%s1485_s30 + $0xf0] sm:$0xf]  ;;  %v1159_v51 = vor.u32 %v1262_v41, %v1156_v42  ;;  %v1026_v52 = vld [vmem:[%s1763_s0] sm:$0xf]  ;;  %v1276_v53 = vld [vmem:[%s1485_s30 + $0x114] sm:$0xf]  ;;  %v1075_v59 = vor.u32 %v1243_v48, %v1074_v47 }
  0x53   : > { %701 = vmatpush.bf16.msra.mxu0 %v1099_v20  ;;  %v1212_v54 = vld [vmem:[%s1485_s30 + $0x118] sm:$0xf0]  ;;  %v398_v55 = vld [vmem:[%s1765_s2 + $0x10] sm:$0xff]  ;;  %v1273_v56 = vld [vmem:[%s1485_s30 + $0xf4] sm:$0xf0] }
  0x54   : > { %786 = vmatpush.bf16.msrb.mxu3 %v1119_v14  ;;  %815 = vmatpush.bf16.msrb.mxu2 %v1183_v15  ;;  %v1244_v57 = vld [vmem:[%s1485_s30 + $0x14] sm:$0xf]  ;;  %v1084_v58 = vld [vmem:[%s1485_s30 + $0x18] sm:$0xf0]  ;;  %v1231_v60 = vld [vmem:[%s1763_s0 + $0x8] sm:$0xf0]  ;;  %v1215_v3 = vor.u32 %v1276_v53, %v1212_v54  ;;  %v1195_v5 = vor.u32 %v1273_v56, %v1194_v49 }
  0x55   : > { %1283 = vmatpush.bf16.msra.mxu1 %v1099_v20  ;;  %416 = vperm.xlu1 %1317, %v398_v55   ;;  %v1260_v61 = vld [vmem:[%s1485_s30 + $0x94] sm:$0xf]  ;;  %v1148_v62 = vld [vmem:[%s1485_s30 + $0x98] sm:$0xf0]  ;;  %v1050_v63 = vld [vmem:[%s1763_s0 + $0x30] sm:$0xf]  ;;  %v1087_v6 = vor.u32 %v1244_v57, %v1084_v58  ;;  %v1027_v10 = vor.u32 %v1231_v60, %v1026_v52 }
  0x56   : > { %v1237_v1 = vld [vmem:[%s1763_s0 + $0x38] sm:$0xf0]  ;;  %v397_v4 = vld [vmem:[%s1765_s2 + $0x8] sm:$0xff]  ;;  %v1186_v7 = vld [vmem:[%s1485_s30 + $0xe0] sm:$0xf]  ;;  %v1151_v11 = vor.u32 %v1260_v61, %v1148_v62 }
  0x57   : > { %702 = vmatpush.bf16.msra.mxu0 %v1091_v29  ;;  %v1274_v8 = vld [vmem:[%s1485_s30 + $0x104] sm:$0xf]  ;;  %v1204_v9 = vld [vmem:[%s1485_s30 + $0x108] sm:$0xf0]  ;;  %v1271_v12 = vld [vmem:[%s1485_s30 + $0xe4] sm:$0xf0]  ;;  %v1606_v15 = vor.u32 %v1237_v1, %v1050_v63 }
  0x58   : > { %787 = vmatpush.bf16.msrb.mxu3 %v1111_v23  ;;  %816 = vmatpush.bf16.msrb.mxu2 %v1175_v24  ;;  %v1242_v13 = vld [vmem:[%s1485_s30 + $0x4] sm:$0xf]  ;;  %v1076_v14 = vld [vmem:[%s1485_s30 + $0x8] sm:$0xf0]  ;;  %v1207_v18 = vor.u32 %v1274_v8, %v1204_v9  ;;  %v399_v19 = vld [vmem:[%s1765_s2 + $0x18] sm:$0xff]  ;;  %v1187_v20 = vor.u32 %v1271_v12, %v1186_v7 }
  0x59   : > { %1284 = vmatpush.bf16.msra.mxu1 %v1091_v29  ;;  %v1258_v16 = vld [vmem:[%s1485_s30 + $0x84] sm:$0xf]  ;;  %v1140_v17 = vld [vmem:[%s1485_s30 + $0x88] sm:$0xf0]  ;;  %411 = vperm.xlu0 %1316, %v397_v4   ;;  %v1079_v21 = vor.u32 %v1242_v13, %v1076_v14  ;;  %v1178_v23 = vld [vmem:[%s1485_s30 + $0xd0] sm:$0xf] }
  0x5a   : > { %v1143_v22 = vor.u32 %v1258_v16, %v1140_v17  ;;  %v1269_v24 = vld [vmem:[%s1485_s30 + $0xd4] sm:$0xf0]  ;;  %v400_v25 = vld [vmem:[%s1765_s2 + $0x20] sm:$0xff]  ;;  %v402_v26 = vld [vmem:[%s1765_s2 + $0x30] sm:$0xff] }
  0x5b   : > { %1219 = vmatmul.msk.bf16.gmra.mxu3 %vm684_vm0, %v1564_v44  ;;  %703 = vmatpush.bf16.msra.mxu0 %v1083_v45  ;;  %v1179_v27 = vor.u32 %v1269_v24, %v1178_v23  ;;  %v1230_v28 = vld [vmem:[%s1763_s0 + $0x4] sm:$0xf]  ;;  %v1028_v29 = vld [vmem:[%s1763_s0 + $0xc] sm:$0xf0]  ;;  %v1170_v30 = vld [vmem:[%s1485_s30 + $0xc0] sm:$0xf] }
  0x5c   : > { %788 = vmatpush.bf16.msrb.mxu3 %v1103_v35  ;;  %817 = vmatpush.bf16.msrb.mxu2 %v1167_v37  ;;  %v1267_v31 = vld [vmem:[%s1485_s30 + $0xc4] sm:$0xf0]  ;;  %v1031_v32 = vor.u32 %v1230_v28, %v1028_v29  ;;  %v403_v33 = vld [vmem:[%s1765_s2 + $0x38] sm:$0xff]  ;;  %v1162_v35 = vld [vmem:[%s1485_s30 + $0xb0] sm:$0xf] }
  0x5d   : > { %1285 = vmatpush.bf16.msra.mxu1 %v1083_v45  ;;  %1217 = vmatmul.msk.bf16.gmra.mxu2 %vm684_vm0, %v1566_v46  ;;  %v1171_v34 = vor.u32 %v1267_v31, %v1170_v30  ;;  %v1265_v36 = vld [vmem:[%s1485_s30 + $0xb4] sm:$0xf0]  ;;  %v1234_v38 = vld [vmem:[%s1763_s0 + $0x20] sm:$0xf0]  ;;  %v1062_v39 = vld [vmem:[%s1763_s0 + $0x48] sm:$0xf] }
  0x5e   : > { %421 = vperm.xlu1 %1317, %v399_v19   ;;  %426 = vperm.xlu2 %1318, %v400_v25   ;;  %v1038_v37 = vld [vmem:[%s1763_s0 + $0x18] sm:$0xf]  ;;  %v1240_v40 = vld [vmem:[%s1763_s0 + $0x50] sm:$0xf0]  ;;  %v401_v41 = vld [vmem:[%s1765_s2 + $0x28] sm:$0xff]  ;;  %v1163_v42 = vor.u32 %v1265_v36, %v1162_v35 }
  0x5f   : > { %704 = vmatpush.bf16.msra.mxu0 %v1075_v59  ;;  %v1039_v43 = vor.u32 %v1234_v38, %v1038_v37  ;;  %v1154_v45 = vld [vmem:[%s1485_s30 + $0xa0] sm:$0xf]  ;;  %v1263_v47 = vld [vmem:[%s1485_s30 + $0xa4] sm:$0xf0]  ;;  %v1063_v48 = vor.u32 %v1240_v40, %v1062_v39  ;;  %v1233_v53 = vld [vmem:[%s1763_s0 + $0x1c] sm:$0xf] }
  0x60   : > { %789 = vmatpush.bf16.msrb.mxu3 %v1095_v50  ;;  %818 = vmatpush.bf16.msrb.mxu2 %v1159_v51  ;;  %v1155_v49 = vor.u32 %v1263_v47, %v1154_v45  ;;  %v1146_v50 = vld [vmem:[%s1485_s30 + $0x90] sm:$0xf]  ;;  %v1261_v51 = vld [vmem:[%s1485_s30 + $0x94] sm:$0xf0]  ;;  %v1040_v54 = vld [vmem:[%s1763_s0 + $0x24] sm:$0xf0] }
  0x61   : > { %1286 = vmatpush.bf16.msra.mxu1 %v1075_v59  ;;  %436 = vperm.xlu0 %1316, %v402_v26   ;;  %v1147_v52 = vor.u32 %v1261_v51, %v1146_v50  ;;  %v1138_v55 = vld [vmem:[%s1485_s30 + $0x80] sm:$0xf]  ;;  %v1259_v56 = vld [vmem:[%s1485_s30 + $0x84] sm:$0xf0]  ;;  %v1043_v57 = vor.u32 %v1233_v53, %v1040_v54  ;;  %v1236_v59 = vld [vmem:[%s1763_s0 + $0x34] sm:$0xf] }
  0x62   : > { %705 = vmatmul.bf16.vlgmr.msra.gmra.mxu0 %v1027_v10  ;;  %v1139_v58 = vor.u32 %v1259_v56, %v1138_v55  ;;  %v1052_v60 = vld [vmem:[%s1763_s0 + $0x3c] sm:$0xf0]  ;;  %v1064_v62 = vld [vmem:[%s1763_s0 + $0x54] sm:$0xf0] }
  0x63   : > { %848 = vmatpush.bf16.msrb.mxu0 %v1215_v3  ;;  %v1055_v61 = vor.u32 %v1236_v59, %v1052_v60 }
  0x64   : > { %790 = vmatpush.bf16.msrb.mxu3 %v1087_v6  ;;  %819 = vmatpush.bf16.msrb.mxu2 %v1151_v11 }
  0x65   : > { %726 = vmatpush.bf16.msrb.mxu1 %v1195_v5 }
  0x66   : > { %715 = vmatmul.bf16.vlgmr.msra.gmra.mxu1 %v1606_v15  ;;  %441 = vperm.xlu1 %1317, %v403_v33  }
  0x67   : > { %849 = vmatpush.bf16.msrb.mxu0 %v1207_v18  ;;  %431 = vperm.xlu2 %1318, %v401_v41  }
  0x68   : > { %791 = vmatpush.bf16.msrb.mxu3 %v1079_v21  ;;  %820 = vmatpush.bf16.msrb.mxu2 %v1143_v22 }
  0x69   : > { %727 = vmatpush.bf16.msrb.mxu1 %v1187_v20 }
  0x6b   : > { %792 = vmatmul.bf16.vlgmr.msrb.gmra.mxu3 %v1027_v10 }
  0x6d   : > { %728 = vmatpush.bf16.msrb.mxu1 %v1179_v27  ;;  %821 = vmatmul.bf16.vlgmr.msrb.gmra.mxu2 %v1031_v32 }
  0x71   : > { %729 = vmatpush.bf16.msrb.mxu1 %v1171_v34 }
  0x72   : > { %710 = vmatmul.bf16.gmra.mxu0 %v1039_v43 }
  0x75   : > { %730 = vmatpush.bf16.msrb.mxu1 %v1163_v42 }
  0x76   : > { %720 = vmatmul.bf16.gmra.mxu1 %v1063_v48 }
  0x79   : > { %731 = vmatpush.bf16.msrb.mxu1 %v1155_v49 }
  0x7b   : > { %797 = vmatmul.bf16.gmra.mxu3 %v1039_v43 }
  0x7d   : > { %732 = vmatpush.bf16.msrb.mxu1 %v1147_v52  ;;  %826 = vmatmul.bf16.gmra.mxu2 %v1043_v57 }
  0x81   : > { %733 = vmatpush.bf16.msrb.mxu1 %v1139_v58 }
  0x82   : > { %1220 = vmatmul.msk.bf16.vlgmr.msrb.gmra.mxu0 %vm684_vm0, %v1519_v2  ;;  %v1239_v2 = vld [vmem:[%s1763_s0 + $0x4c] sm:$0xf] }
  0x83   : > { %v1067_v63 = vor.u32 %v1239_v2, %v1064_v62 }
  0x86   : > { %734 = vmatmul.bf16.vlgmr.msrb.gmra.mxu1 %v1031_v32 }
  0x8b   : > { %802 = vmatmul.bf16.gmra.mxu3 %v1606_v15 }
  0x8d   : > { %831 = vmatmul.bf16.gmra.mxu2 %v1055_v61 }
  0x92   : > { %1221 = vmatmul.msk.bf16.gmra.mxu0 %vm684_vm0, %v1566_v46 }
  0x96   : > { %739 = vmatmul.bf16.gmra.mxu1 %v1043_v57 }
  0x9b   : > { %807 = vmatmul.bf16.gmra.mxu3 %v1063_v48 }
  0x9d   : > { %836 = vmatmul.bf16.gmra.mxu2 %v1067_v63 }
  0xa2   : > { %1222 = vmatmul.msk.bf16.gmra.mxu0 %vm684_vm0, %v1517_v0 }
  0xa6   : > { %744 = vmatmul.bf16.gmra.mxu1 %v1055_v61 }
  0xb2   : > { %1223 = vmatmul.msk.bf16.gmra.mxu0 %vm684_vm0, %v1564_v44 }
  0xb6   : > { %749 = vmatmul.bf16.gmra.mxu1 %v1067_v63 }
  0xb8   : > { %v427_v62 = vpop.permute.xlu2 %426 }
  0xc3   : > { %v407_v15 = vpop.permute.xlu0 %406 }
  0xc7   : > { %v417_v34 = vpop.permute.xlu1 %416 }
  0xcb   : > { %v412_v27 = vpop.permute.xlu0 %411 }
  0xce   : > { %v1683_v46 = vpop.f32.mrf.mxu3 }
  0xd0   : > { %v764_v1 = vpop.f32.mrf.mxu2  ;;  %v422_v54 = vpop.permute.xlu1 %421 }
  0xd6   : > { %v1685_v3 = vpop.f32.mrf.mxu3 }
  0xd8   : > { %v766_v4 = vpop.f32.mrf.mxu2 }
  0xde   : > { %v1687_v5 = vpop.f32.mrf.mxu3 }
  0xdf   : > { %v706_v6 = vpop.f32.mrf.mxu0 }
  0xe0   : > { %v769_v7 = vpop.f32.mrf.mxu2  ;;  %v707_v23 = vadd.f32 %v706_v6, %v407_v15 }
  0xe3   : > { %v1689_v8 = vpop.f32.mrf.mxu1 }
  0xe6   : > { %v1691_v9 = vpop.f32.mrf.mxu3 }
  0xe7   : > { %v708_v0 = vpop.f32.mrf.mxu0 }
  0xe8   : > { %v1693_v10 = vpop.f32.mrf.mxu2  ;;  %v709_v36 = vadd.f32 %v708_v0, %v412_v27 }
  0xeb   : > { %v1695_v44 = vpop.f32.mrf.mxu1 }
  0xee   : > { %v793_v11 = vpop.f32.mrf.mxu3 }
  0xef   : > { %v711_v12 = vpop.f32.mrf.mxu0  ;;  %v794_v19 = vadd.f32 %v793_v11, %v407_v15 }
  0xf0   : > { %v822_v13 = vpop.f32.mrf.mxu2  ;;  %v712_v50 = vadd.f32 %v711_v12, %v417_v34 }
  0xf1   : > { %v823_v21 = vadd.f32 %v822_v13, %v794_v19 }
  0xf3   : > { %v1697_v14 = vpop.f32.mrf.mxu1 }
  0xf6   : > { %v795_v16 = vpop.f32.mrf.mxu3 }
  0xf7   : > { %v713_v17 = vpop.f32.mrf.mxu0  ;;  %v796_v30 = vadd.f32 %v795_v16, %v412_v27 }
  0xf8   : > { %v824_v18 = vpop.f32.mrf.mxu2  ;;  %v714_v63 = vadd.f32 %v713_v17, %v422_v54 }
  0xf9   : > { %v825_v35 = vadd.f32 %v824_v18, %v796_v30  ;;  %v717_v18 = vadd.f32 %v1689_v8, %v427_v62 }
  0xfb   : > { %v1699_v20 = vpop.f32.mrf.mxu1 }
  0xfe   : > { %v798_v22 = vpop.f32.mrf.mxu3 }
  0xff   : > { %v851_v24 = vpop.f32.mrf.mxu0  ;;  %v799_v39 = vadd.f32 %v798_v22, %v417_v34 }
 0x100   : > { %v852_v26 = vadd.f32 %v851_v24, %v823_v21  ;;  %v827_v29 = vpop.f32.mrf.mxu2 }
 0x101   : > { %v828_v48 = vadd.f32 %v827_v29, %v799_v39 }
 0x102   : > { %v872_v31 = vmax.f32 %v852_v26, 0.0 }
 0x103   : > { %v735_v25 = vpop.f32.mrf.mxu1 }
 0x104   : > { %v736_v28 = vadd.f32 %v735_v25, %v707_v23  ;;  %888 = vst [vmem:[%s1703_s21 + $0x8] sm:$0xff] %v872_v31  ;;  %v432_v23 = vpop.permute.xlu2 %431 }
 0x105   : > { %v719_v30 = vadd.f32 %v1695_v44, %v432_v23 }
 0x106   : > { %v765_v32 = vadd.f32 %v764_v1, %v736_v28  ;;  %v800_v37 = vpop.f32.mrf.mxu3 }
 0x107   : > { %v853_v38 = vpop.f32.mrf.mxu0  ;;  %v801_v57 = vadd.f32 %v800_v37, %v422_v54 }
 0x108   : > { %v871_v33 = vmax.f32 %v765_v32, 0.0  ;;  %v854_v41 = vadd.f32 %v853_v38, %v825_v35  ;;  %v829_v47 = vpop.f32.mrf.mxu2 }
 0x109   : > { %v830_v2 = vadd.f32 %v829_v47, %v801_v57 }
 0x10a   : > { %887 = vst [vmem:[%s1703_s21] sm:$0xff] %v871_v33  ;;  %v874_v43 = vmax.f32 %v854_v41, 0.0  ;;  %v437_v33 = vpop.permute.xlu0 %436 }
 0x10b   : > { %v737_v40 = vpop.f32.mrf.mxu1 }
 0x10c   : > { %v738_v42 = vadd.f32 %v737_v40, %v709_v36  ;;  %890 = vst [vmem:[%s1703_s21 + $0x18] sm:$0xff] %v874_v43  ;;  %v722_v40 = vadd.f32 %v1697_v14, %v437_v33 }
 0x10e   : > { %v767_v45 = vadd.f32 %v766_v4, %v738_v42  ;;  %v803_v55 = vpop.f32.mrf.mxu3 }
 0x10f   : > { %v856_v51 = vpop.f32.mrf.mxu0  ;;  %v804_v4 = vadd.f32 %v803_v55, %v427_v62 }
 0x110   : > { %v873_v49 = vmax.f32 %v767_v45, 0.0  ;;  %v857_v53 = vadd.f32 %v856_v51, %v828_v48  ;;  %v832_v61 = vpop.f32.mrf.mxu2  ;;  %v442_v45 = vpop.permute.xlu1 %441 }
 0x111   : > { %v724_v14 = vadd.f32 %v1699_v20, %v442_v45 }
 0x112   : > { %889 = vst [vmem:[%s1703_s21 + $0x10] sm:$0xff] %v873_v49  ;;  %v876_v58 = vmax.f32 %v857_v53, 0.0 }
 0x113   : > { %v740_v52 = vpop.f32.mrf.mxu1 }
 0x114   : > { %v741_v56 = vadd.f32 %v740_v52, %v712_v50  ;;  %892 = vst [vmem:[%s1703_s21 + $0x28] sm:$0xff] %v876_v58 }
 0x116   : > { %v770_v59 = vadd.f32 %v769_v7, %v741_v56  ;;  %v805_v13 = vpop.f32.mrf.mxu3  ;;  %v833_v7 = vadd.f32 %v832_v61, %v804_v4 }
 0x117   : > { %v858_v1 = vpop.f32.mrf.mxu0  ;;  %v806_v25 = vadd.f32 %v805_v13, %v432_v23 }
 0x118   : > { %v875_v60 = vmax.f32 %v770_v59, 0.0  ;;  %v859_v0 = vadd.f32 %v858_v1, %v830_v2  ;;  %v834_v19 = vpop.f32.mrf.mxu2 }
 0x119   : > { %v835_v29 = vadd.f32 %v834_v19, %v806_v25  ;;  %v929_v20 = vld [vmem:[%s1703_s21 + $0x10] sm:$0xff] (%p1394_p5) }
 0x11a   : > { %891 = vst [vmem:[%s1703_s21 + $0x20] sm:$0xff] %v875_v60  ;;  %v878_v12 = vmax.f32 %v859_v0, 0.0  ;;  %v931_v60 = vld [vmem:[%s1703_s21 + $0x18] sm:$0xff] (%p1394_p5) }
 0x11b   : > { %v742_v6 = vpop.f32.mrf.mxu1  ;;  %930 = vst [vmem:[%s912_s20 + $0x20] sm:$0xff] (%p1394_p5), %v929_v20  ;;  %v935_v2 = vld [vmem:[%s1703_s21 + $0x28] sm:$0xff] (%p1394_p5) }
 0x11c   : > { %v743_v11 = vadd.f32 %v742_v6, %v714_v63  ;;  %894 = vst [vmem:[%s1703_s21 + $0x38] sm:$0xff] %v878_v12 }
 0x11d   : > { %932 = vst [vmem:[%s912_s20 + $0x28] sm:$0xff] (%p1394_p5), %v931_v60 }
 0x11e   : > { %v772_v15 = vadd.f32 %v1693_v10, %v743_v11  ;;  %v808_v10 = vpop.f32.mrf.mxu3  ;;  %936 = vst [vmem:[%s912_s20 + $0x48] sm:$0xff] (%p1394_p5), %v935_v2 }
 0x11f   : > { %v861_v17 = vpop.f32.mrf.mxu0  ;;  %v809_v36 = vadd.f32 %v808_v10, %v437_v33 }
 0x120   : > { %v877_v16 = vmax.f32 %v772_v15, 0.0  ;;  %v862_v22 = vadd.f32 %v861_v17, %v833_v7  ;;  %v837_v34 = vpop.f32.mrf.mxu2 }
 0x121   : > { %v838_v39 = vadd.f32 %v837_v34, %v809_v36  ;;  %v933_v61 = vld [vmem:[%s1703_s21 + $0x20] sm:$0xff] (%p1394_p5) }
 0x122   : > { %893 = vst [vmem:[%s1703_s21 + $0x30] sm:$0xff] %v877_v16  ;;  %v880_v26 = vmax.f32 %v862_v22, 0.0 }
 0x123   : > { %v745_v21 = vpop.f32.mrf.mxu1  ;;  %934 = vst [vmem:[%s912_s20 + $0x40] sm:$0xff] (%p1394_p5), %v933_v61  ;;  %v939_v63 = vld [vmem:[%s1703_s21 + $0x38] sm:$0xff] (%p1394_p5) }
 0x124   : > { %v746_v24 = vadd.f32 %v745_v21, %v717_v18  ;;  %896 = vst [vmem:[%s1703_s21 + $0x48] sm:$0xff] %v880_v26 }
 0x125   : > { %940 = vst [vmem:[%s912_s20 + $0x68] sm:$0xff] (%p1394_p5), %v939_v63 }
 0x126   : > { %v775_v27 = vadd.f32 %v1683_v46, %v746_v24  ;;  %v810_v44 = vpop.f32.mrf.mxu3 }
 0x127   : > { %v863_v8 = vpop.f32.mrf.mxu0  ;;  %v811_v48 = vadd.f32 %v810_v44, %v442_v45 }
 0x128   : > { %v879_v28 = vmax.f32 %v775_v27, 0.0  ;;  %v864_v32 = vadd.f32 %v863_v8, %v835_v29  ;;  %v839_v50 = vpop.f32.mrf.mxu2 }
 0x129   : > { %v840_v52 = vadd.f32 %v839_v50, %v811_v48  ;;  %v937_v62 = vld [vmem:[%s1703_s21 + $0x30] sm:$0xff] (%p1394_p5) }
 0x12a   : > { %895 = vst [vmem:[%s1703_s21 + $0x40] sm:$0xff] %v879_v28  ;;  %v882_v37 = vmax.f32 %v864_v32, 0.0 }
 0x12b   : > { %v747_v31 = vpop.f32.mrf.mxu1  ;;  %938 = vst [vmem:[%s912_s20 + $0x60] sm:$0xff] (%p1394_p5), %v937_v62  ;;  %v943_v4 = vld [vmem:[%s1703_s21 + $0x48] sm:$0xff] (%p1394_p5) }
 0x12c   : > { %v748_v35 = vadd.f32 %v747_v31, %v719_v30  ;;  %898 = vst [vmem:[%s1703_s21 + $0x58] sm:$0xff] %v882_v37 }
 0x12d   : > { %944 = vst [vmem:[%s912_s20 + $0x88] sm:$0xff] (%p1394_p5), %v943_v4 }
 0x12e   : > { %v777_v38 = vadd.f32 %v1685_v3, %v748_v35 }
 0x12f   : > { %v866_v41 = vpop.f32.mrf.mxu0 }
 0x130   : > { %v881_v46 = vmax.f32 %v777_v38, 0.0  ;;  %v867_v43 = vadd.f32 %v866_v41, %v838_v39 }
 0x131   : > { %v941_v1 = vld [vmem:[%s1703_s21 + $0x40] sm:$0xff] (%p1394_p5) }
 0x132   : > { %897 = vst [vmem:[%s1703_s21 + $0x50] sm:$0xff] %v881_v46  ;;  %v884_v49 = vmax.f32 %v867_v43, 0.0 }
 0x133   : > { %v750_v42 = vpop.f32.mrf.mxu1  ;;  %942 = vst [vmem:[%s912_s20 + $0x80] sm:$0xff] (%p1394_p5), %v941_v1  ;;  %v947_v0 = vld [vmem:[%s1703_s21 + $0x58] sm:$0xff] (%p1394_p5) }
 0x134   : > { %v751_v47 = vadd.f32 %v750_v42, %v722_v40  ;;  %900 = vst [vmem:[%s1703_s21 + $0x68] sm:$0xff] %v884_v49 }
 0x135   : > { %948 = vst [vmem:[%s912_s20 + $0xa8] sm:$0xff] (%p1394_p5), %v947_v0 }
 0x136   : > { %v780_v3 = vadd.f32 %v1687_v5, %v751_v47  ;;  %v925_v5 = vld [vmem:[%s1703_s21] sm:$0xff] (%p1394_p5) }
 0x137   : > { %v868_v53 = vpop.f32.mrf.mxu0  ;;  %926 = vst [vmem:[%s912_s20] sm:$0xff] (%p1394_p5), %v925_v5 }
 0x138   : > { %v883_v51 = vmax.f32 %v780_v3, 0.0  ;;  %v869_v55 = vadd.f32 %v868_v53, %v840_v52 }
 0x139   : > { %v945_v6 = vld [vmem:[%s1703_s21 + $0x50] sm:$0xff] (%p1394_p5) }
 0x13a   : > { %899 = vst [vmem:[%s1703_s21 + $0x60] sm:$0xff] %v883_v51  ;;  %v886_v57 = vmax.f32 %v869_v55, 0.0 }
 0x13b   : > { %v752_v54 = vpop.f32.mrf.mxu1  ;;  %946 = vst [vmem:[%s912_s20 + $0xa0] sm:$0xff] (%p1394_p5), %v945_v6  ;;  %v951_v12 = vld [vmem:[%s1703_s21 + $0x68] sm:$0xff] (%p1394_p5) }
 0x13c   : > { %v753_v56 = vadd.f32 %v752_v54, %v724_v14  ;;  %902 = vst [vmem:[%s1703_s21 + $0x78] sm:$0xff] %v886_v57 }
 0x13d   : > { %952 = vst [vmem:[%s912_s20 + $0xc8] sm:$0xff] (%p1394_p5), %v951_v12 }
 0x13e   : > { %v782_v58 = vadd.f32 %v1691_v9, %v753_v56  ;;  %909 = sbr.rel (!%p1394_p5) target bundleno = 331 (0x14b), region = 74  ;;  %v927_v9 = vld [vmem:[%s1703_s21 + $0x8] sm:$0xff] (%p1394_p5) }
 0x13f   : > { %928 = vst [vmem:[%s912_s20 + $0x8] sm:$0xff] (%p1394_p5), %v927_v9 }
 0x140   : > { %v885_v59 = vmax.f32 %v782_v58, 0.0 }
 0x141   : > { %v949_v11 = vld [vmem:[%s1703_s21 + $0x60] sm:$0xff] (%p1394_p5) }
 0x142   : > { %901 = vst [vmem:[%s1703_s21 + $0x70] sm:$0xff] %v885_v59 }
 0x143   : > { %950 = vst [vmem:[%s912_s20 + $0xc0] sm:$0xff] %v949_v11  ;;  %v955_v15 = vld [vmem:[%s1703_s21 + $0x78] sm:$0xff] }
 0x144   : > { %956 = vst [vmem:[%s912_s20 + $0xe8] sm:$0xff] %v955_v15 }
 0x149   : > { %v953_v13 = vld [vmem:[%s1703_s21 + $0x70] sm:$0xff] }
 0x14a   : > { %954 = vst [vmem:[%s912_s20 + $0xe0] sm:$0xff] %v953_v13 }
 0x14b PF: > { %p10_p10 = scmp.ge.s32.totalorder %s1381_s16, 4   ;;  %s1768_s12 = smov %s1337_s13 }
 0x14c   : > { %s1769_s13 = smov %s1392_s19  ;;  %s1770_s14 = smov %s1381_s16 }
 0x14d   :  { %12 = sbr.rel (!%p10_p10) target bundleno = 2 (0x2), region = 128 }

// kernel: framewise_forward_pallas.9
= control target key start
LH: loop header
LB: loop body
LE: loop exit
PB: predicated region body
PF: predicated region fallthrough
CT: control target
= control target key end

     0   :  { %s2114_s12 = smov 0   ;;  %s2116_s13 = smov 0   ;;  %s2794_s0 = inlined_call_operand.vmem [shape: bf16[64,576], index: 0, kind: input, shape index: {}]   ;;  %s2795_s1 = inlined_call_operand.vmem [shape: bf16[576,480], index: 1, kind: input, shape index: {}]   ;;  %s2796_s2 = inlined_call_operand.vmem [shape: f32[64,1], index: 2, kind: input, shape index: {}]   ;;  %s2797_s3 = inlined_call_operand.vmem [shape: f32[64,480], index: 3, kind: output, shape index: {}]  }
   0x1   :  { %s2118_s14 = smov 0  }
   0x2 LB: > { %s1540_s15 = sadd.s32 4294967295, %s2091_s14   ;;  %s2131_s16 = sadd.s32 1, %s2091_s14   ;;  %s2091_s14 = sphi %s2118_s14, %s2801_s14   ;;  %s2087_s13 = sphi %s2116_s13, %s2800_s13   ;;  %s2083_s12 = sphi %s2114_s12, %s2799_s12  }
   0x3   : > { %s38_s17 = ssub.s32 %s2091_s14, %s2131_s16  ;;  %s41_s18 = sadd.s32 1, %s2087_s13 }
   0x4   : > { %p39_p0 = scmp.eq.s32.totalorder %s38_s17, 0  ;;  %p48_p1 = scmp.ne.s32.totalorder %s2087_s13, %s2083_s12 }
   0x5   : > { %p49_p2 = scmp.eq.s32.totalorder %s2091_s14, 0  ;;  %p99_p3 = scmp.eq.s32.totalorder %s1540_s15, 1 }
   0x6   : > { %s2142_s19 = scalar_select %p39_p0, %s2087_s13, %s41_s18  }
   0x7   : > { %p50_p4 = por %p49_p2, %p48_p1  ;;  %p2144_p5 = por %p99_p3, %p48_p1 }
   0x8   : > { %p1543_p6 = scmp.ge.s32.totalorder %s2091_s14, 2 }
   0xa   : > { %127 = sbr.rel (%p1543_p6) target bundleno = 91 (0x5b), region = 24 }
   0xf   : > { %130 = sbr.rel (!%p50_p4) target bundleno = 91 (0x5b), region = 28  ;;  %s132_s21 = sand.u32 (%p50_p4), 1, %s2087_s13  }
  0x10   : > { %s1929_s22 = sshll.u32 (%p50_p4), %s2091_s14, 3  ;;  %s2039_s23 = smul.u32 (%p50_p4), 576, %s132_s21 }
  0x11   : > { %s2154_s26 = scalar_lea.vmem (%p50_p4), %s2795_s1, %s1929_s22 }
  0x12   : > { %v308_v0 = vld [vmem:[%s2154_s26] sm:$0xff] (%p50_p4)  ;;  %v310_v1 = vld [vmem:[%s2154_s26 + $0x10] sm:$0xff] (%p50_p4)  ;;  %s2159_s27 = scalar_lea.vmem (%p50_p4), [#allocation2], %s2039_s23 }
  0x13   : > { %v312_v2 = vld [vmem:[%s2154_s26 + $0x20] sm:$0xff] (%p50_p4)  ;;  %309 = vst [vmem:[%s2159_s27] sm:$0xff] (%p50_p4), %v308_v0  ;;  %v314_v3 = vld [vmem:[%s2154_s26 + $0x30] sm:$0xff] (%p50_p4) }
  0x14   : > { %311 = vst [vmem:[%s2159_s27 + $0x8] sm:$0xff] %v310_v1  ;;  %v316_v4 = vld [vmem:[%s2154_s26 + $0x40] sm:$0xff]  ;;  %v318_v5 = vld [vmem:[%s2154_s26 + $0x50] sm:$0xff] }
  0x15   : > { %313 = vst [vmem:[%s2159_s27 + $0x10] sm:$0xff] %v312_v2  ;;  %v320_v6 = vld [vmem:[%s2154_s26 + $0x60] sm:$0xff]  ;;  %v322_v7 = vld [vmem:[%s2154_s26 + $0x70] sm:$0xff] }
  0x16   : > { %315 = vst [vmem:[%s2159_s27 + $0x18] sm:$0xff] %v314_v3  ;;  %v324_v8 = vld [vmem:[%s2154_s26 + $0x80] sm:$0xff]  ;;  %v326_v9 = vld [vmem:[%s2154_s26 + $0x90] sm:$0xff] }
  0x17   : > { %317 = vst [vmem:[%s2159_s27 + $0x20] sm:$0xff] %v316_v4  ;;  %v328_v10 = vld [vmem:[%s2154_s26 + $0xa0] sm:$0xff]  ;;  %v330_v11 = vld [vmem:[%s2154_s26 + $0xb0] sm:$0xff] }
  0x18   : > { %319 = vst [vmem:[%s2159_s27 + $0x28] sm:$0xff] %v318_v5  ;;  %v332_v12 = vld [vmem:[%s2154_s26 + $0xc0] sm:$0xff]  ;;  %v334_v13 = vld [vmem:[%s2154_s26 + $0xd0] sm:$0xff] }
  0x19   : > { %321 = vst [vmem:[%s2159_s27 + $0x30] sm:$0xff] %v320_v6  ;;  %v336_v14 = vld [vmem:[%s2154_s26 + $0xe0] sm:$0xff]  ;;  %v338_v15 = vld [vmem:[%s2154_s26 + $0xf0] sm:$0xff] }
  0x1a   : > { %323 = vst [vmem:[%s2159_s27 + $0x38] sm:$0xff] %v322_v7  ;;  %v340_v16 = vld [vmem:[%s2154_s26 + $0x100] sm:$0xff]  ;;  %v342_v17 = vld [vmem:[%s2154_s26 + $0x110] sm:$0xff] }
  0x1b   : > { %325 = vst [vmem:[%s2159_s27 + $0x40] sm:$0xff] %v324_v8  ;;  %v344_v18 = vld [vmem:[%s2154_s26 + $0x120] sm:$0xff]  ;;  %v346_v19 = vld [vmem:[%s2154_s26 + $0x130] sm:$0xff] }
  0x1c   : > { %327 = vst [vmem:[%s2159_s27 + $0x48] sm:$0xff] %v326_v9  ;;  %v348_v20 = vld [vmem:[%s2154_s26 + $0x140] sm:$0xff]  ;;  %v350_v21 = vld [vmem:[%s2154_s26 + $0x150] sm:$0xff] }
  0x1d   : > { %329 = vst [vmem:[%s2159_s27 + $0x50] sm:$0xff] %v328_v10  ;;  %v352_v22 = vld [vmem:[%s2154_s26 + $0x160] sm:$0xff]  ;;  %v354_v23 = vld [vmem:[%s2154_s26 + $0x170] sm:$0xff] }
  0x1e   : > { %331 = vst [vmem:[%s2159_s27 + $0x58] sm:$0xff] %v330_v11  ;;  %v356_v24 = vld [vmem:[%s2154_s26 + $0x180] sm:$0xff]  ;;  %v358_v25 = vld [vmem:[%s2154_s26 + $0x190] sm:$0xff] }
  0x1f   : > { %333 = vst [vmem:[%s2159_s27 + $0x60] sm:$0xff] %v332_v12  ;;  %v360_v26 = vld [vmem:[%s2154_s26 + $0x1a0] sm:$0xff]  ;;  %v362_v27 = vld [vmem:[%s2154_s26 + $0x1b0] sm:$0xff] }
  0x20   : > { %335 = vst [vmem:[%s2159_s27 + $0x68] sm:$0xff] %v334_v13  ;;  %v364_v28 = vld [vmem:[%s2154_s26 + $0x1c0] sm:$0xff]  ;;  %v366_v29 = vld [vmem:[%s2154_s26 + $0x1d0] sm:$0xff] }
  0x21   : > { %337 = vst [vmem:[%s2159_s27 + $0x70] sm:$0xff] %v336_v14  ;;  %v368_v30 = vld [vmem:[%s2154_s26 + $0x1e0] sm:$0xff]  ;;  %v370_v31 = vld [vmem:[%s2154_s26 + $0x1f0] sm:$0xff] }
  0x22   : > { %339 = vst [vmem:[%s2159_s27 + $0x78] sm:$0xff] %v338_v15  ;;  %v372_v32 = vld [vmem:[%s2154_s26 + $0x200] sm:$0xff]  ;;  %v374_v33 = vld [vmem:[%s2154_s26 + $0x210] sm:$0xff] }
  0x23   : > { %341 = vst [vmem:[%s2159_s27 + $0x80] sm:$0xff] %v340_v16  ;;  %v376_v34 = vld [vmem:[%s2154_s26 + $0x220] sm:$0xff]  ;;  %v378_v35 = vld [vmem:[%s2154_s26 + $0x230] sm:$0xff] }
  0x24   : > { %343 = vst [vmem:[%s2159_s27 + $0x88] sm:$0xff] %v342_v17  ;;  %v380_v36 = vld [vmem:[%s2154_s26 + $0x240] sm:$0xff]  ;;  %v382_v37 = vld [vmem:[%s2154_s26 + $0x250] sm:$0xff] }
  0x25   : > { %345 = vst [vmem:[%s2159_s27 + $0x90] sm:$0xff] %v344_v18  ;;  %v384_v38 = vld [vmem:[%s2154_s26 + $0x260] sm:$0xff]  ;;  %v386_v39 = vld [vmem:[%s2154_s26 + $0x270] sm:$0xff] }
  0x26   : > { %347 = vst [vmem:[%s2159_s27 + $0x98] sm:$0xff] %v346_v19  ;;  %v388_v40 = vld [vmem:[%s2154_s26 + $0x280] sm:$0xff]  ;;  %v390_v41 = vld [vmem:[%s2154_s26 + $0x290] sm:$0xff] }
  0x27   : > { %349 = vst [vmem:[%s2159_s27 + $0xa0] sm:$0xff] %v348_v20  ;;  %v392_v42 = vld [vmem:[%s2154_s26 + $0x2a0] sm:$0xff]  ;;  %v394_v43 = vld [vmem:[%s2154_s26 + $0x2b0] sm:$0xff] }
  0x28   : > { %351 = vst [vmem:[%s2159_s27 + $0xa8] sm:$0xff] %v350_v21  ;;  %v396_v44 = vld [vmem:[%s2154_s26 + $0x2c0] sm:$0xff]  ;;  %v398_v45 = vld [vmem:[%s2154_s26 + $0x2d0] sm:$0xff] }
  0x29   : > { %353 = vst [vmem:[%s2159_s27 + $0xb0] sm:$0xff] %v352_v22  ;;  %v400_v46 = vld [vmem:[%s2154_s26 + $0x2e0] sm:$0xff]  ;;  %v402_v47 = vld [vmem:[%s2154_s26 + $0x2f0] sm:$0xff] }
  0x2a   : > { %355 = vst [vmem:[%s2159_s27 + $0xb8] sm:$0xff] %v354_v23  ;;  %v404_v48 = vld [vmem:[%s2154_s26 + $0x300] sm:$0xff]  ;;  %v406_v49 = vld [vmem:[%s2154_s26 + $0x310] sm:$0xff] }
  0x2b   : > { %357 = vst [vmem:[%s2159_s27 + $0xc0] sm:$0xff] %v356_v24  ;;  %v408_v50 = vld [vmem:[%s2154_s26 + $0x320] sm:$0xff]  ;;  %v410_v51 = vld [vmem:[%s2154_s26 + $0x330] sm:$0xff] }
  0x2c   : > { %359 = vst [vmem:[%s2159_s27 + $0xc8] sm:$0xff] %v358_v25  ;;  %v412_v52 = vld [vmem:[%s2154_s26 + $0x340] sm:$0xff]  ;;  %v414_v53 = vld [vmem:[%s2154_s26 + $0x350] sm:$0xff] }
  0x2d   : > { %361 = vst [vmem:[%s2159_s27 + $0xd0] sm:$0xff] %v360_v26  ;;  %v416_v54 = vld [vmem:[%s2154_s26 + $0x360] sm:$0xff]  ;;  %v418_v55 = vld [vmem:[%s2154_s26 + $0x370] sm:$0xff] }
  0x2e   : > { %363 = vst [vmem:[%s2159_s27 + $0xd8] sm:$0xff] %v362_v27  ;;  %v420_v56 = vld [vmem:[%s2154_s26 + $0x380] sm:$0xff]  ;;  %v422_v57 = vld [vmem:[%s2154_s26 + $0x390] sm:$0xff] }
  0x2f   : > { %365 = vst [vmem:[%s2159_s27 + $0xe0] sm:$0xff] %v364_v28  ;;  %v424_v58 = vld [vmem:[%s2154_s26 + $0x3a0] sm:$0xff]  ;;  %v426_v59 = vld [vmem:[%s2154_s26 + $0x3b0] sm:$0xff] }
  0x30   : > { %367 = vst [vmem:[%s2159_s27 + $0xe8] sm:$0xff] %v366_v29  ;;  %v428_v60 = vld [vmem:[%s2154_s26 + $0x3c0] sm:$0xff]  ;;  %v430_v61 = vld [vmem:[%s2154_s26 + $0x3d0] sm:$0xff] }
  0x31   : > { %369 = vst [vmem:[%s2159_s27 + $0xf0] sm:$0xff] %v368_v30  ;;  %v432_v62 = vld [vmem:[%s2154_s26 + $0x3e0] sm:$0xff]  ;;  %v434_v63 = vld [vmem:[%s2154_s26 + $0x3f0] sm:$0xff] }
  0x32   : > { %371 = vst [vmem:[%s2159_s27 + $0xf8] sm:$0xff] %v370_v31  ;;  %v436_v0 = vld [vmem:[%s2154_s26 + $0x400] sm:$0xff]  ;;  %v438_v1 = vld [vmem:[%s2154_s26 + $0x410] sm:$0xff] }
  0x33   : > { %373 = vst [vmem:[%s2159_s27 + $0x100] sm:$0xff] %v372_v32  ;;  %v440_v2 = vld [vmem:[%s2154_s26 + $0x420] sm:$0xff]  ;;  %v442_v3 = vld [vmem:[%s2154_s26 + $0x430] sm:$0xff] }
  0x34   : > { %375 = vst [vmem:[%s2159_s27 + $0x108] sm:$0xff] %v374_v33  ;;  %v444_v4 = vld [vmem:[%s2154_s26 + $0x440] sm:$0xff]  ;;  %v446_v5 = vld [vmem:[%s2154_s26 + $0x450] sm:$0xff] }
  0x35   : > { %377 = vst [vmem:[%s2159_s27 + $0x110] sm:$0xff] %v376_v34  ;;  %v448_v6 = vld [vmem:[%s2154_s26 + $0x460] sm:$0xff]  ;;  %v450_v7 = vld [vmem:[%s2154_s26 + $0x470] sm:$0xff] }
  0x36   : > { %379 = vst [vmem:[%s2159_s27 + $0x118] sm:$0xff] %v378_v35 }
  0x37   : > { %381 = vst [vmem:[%s2159_s27 + $0x120] sm:$0xff] %v380_v36 }
  0x38   : > { %383 = vst [vmem:[%s2159_s27 + $0x128] sm:$0xff] %v382_v37 }
  0x39   : > { %385 = vst [vmem:[%s2159_s27 + $0x130] sm:$0xff] %v384_v38 }
  0x3a   : > { %387 = vst [vmem:[%s2159_s27 + $0x138] sm:$0xff] %v386_v39 }
  0x3b   : > { %389 = vst [vmem:[%s2159_s27 + $0x140] sm:$0xff] %v388_v40 }
  0x3c   : > { %391 = vst [vmem:[%s2159_s27 + $0x148] sm:$0xff] %v390_v41 }
  0x3d   : > { %393 = vst [vmem:[%s2159_s27 + $0x150] sm:$0xff] %v392_v42 }
  0x3e   : > { %395 = vst [vmem:[%s2159_s27 + $0x158] sm:$0xff] %v394_v43 }
  0x3f   : > { %397 = vst [vmem:[%s2159_s27 + $0x160] sm:$0xff] %v396_v44 }
  0x40   : > { %399 = vst [vmem:[%s2159_s27 + $0x168] sm:$0xff] %v398_v45 }
  0x41   : > { %401 = vst [vmem:[%s2159_s27 + $0x170] sm:$0xff] %v400_v46 }
  0x42   : > { %403 = vst [vmem:[%s2159_s27 + $0x178] sm:$0xff] %v402_v47 }
  0x43   : > { %405 = vst [vmem:[%s2159_s27 + $0x180] sm:$0xff] %v404_v48 }
  0x44   : > { %407 = vst [vmem:[%s2159_s27 + $0x188] sm:$0xff] %v406_v49 }
  0x45   : > { %409 = vst [vmem:[%s2159_s27 + $0x190] sm:$0xff] %v408_v50 }
  0x46   : > { %411 = vst [vmem:[%s2159_s27 + $0x198] sm:$0xff] %v410_v51 }
  0x47   : > { %413 = vst [vmem:[%s2159_s27 + $0x1a0] sm:$0xff] %v412_v52 }
  0x48   : > { %415 = vst [vmem:[%s2159_s27 + $0x1a8] sm:$0xff] %v414_v53 }
  0x49   : > { %417 = vst [vmem:[%s2159_s27 + $0x1b0] sm:$0xff] %v416_v54 }
  0x4a   : > { %419 = vst [vmem:[%s2159_s27 + $0x1b8] sm:$0xff] %v418_v55 }
  0x4b   : > { %421 = vst [vmem:[%s2159_s27 + $0x1c0] sm:$0xff] %v420_v56 }
  0x4c   : > { %423 = vst [vmem:[%s2159_s27 + $0x1c8] sm:$0xff] %v422_v57 }
  0x4d   : > { %425 = vst [vmem:[%s2159_s27 + $0x1d0] sm:$0xff] %v424_v58 }
  0x4e   : > { %427 = vst [vmem:[%s2159_s27 + $0x1d8] sm:$0xff] %v426_v59 }
  0x4f   : > { %429 = vst [vmem:[%s2159_s27 + $0x1e0] sm:$0xff] %v428_v60 }
  0x50   : > { %431 = vst [vmem:[%s2159_s27 + $0x1e8] sm:$0xff] %v430_v61 }
  0x51   : > { %433 = vst [vmem:[%s2159_s27 + $0x1f0] sm:$0xff] %v432_v62 }
  0x52   : > { %435 = vst [vmem:[%s2159_s27 + $0x1f8] sm:$0xff] %v434_v63 }
  0x53   : > { %437 = vst [vmem:[%s2159_s27 + $0x200] sm:$0xff] %v436_v0 }
  0x54   : > { %439 = vst [vmem:[%s2159_s27 + $0x208] sm:$0xff] %v438_v1 }
  0x55   : > { %441 = vst [vmem:[%s2159_s27 + $0x210] sm:$0xff] %v440_v2 }
  0x56   : > { %443 = vst [vmem:[%s2159_s27 + $0x218] sm:$0xff] %v442_v3 }
  0x57   : > { %445 = vst [vmem:[%s2159_s27 + $0x220] sm:$0xff] %v444_v4 }
  0x58   : > { %447 = vst [vmem:[%s2159_s27 + $0x228] sm:$0xff] %v446_v5 }
  0x59   : > { %449 = vst [vmem:[%s2159_s27 + $0x230] sm:$0xff] %v448_v6 }
  0x5a   : > { %451 = vst [vmem:[%s2159_s27 + $0x238] sm:$0xff] %v450_v7 }
  0x5b PF: > { %p1546_p7 = scmp.ge.s32.totalorder %s2091_s14, 1  ;;  %p456_p8 = scmp.lt.s32.totalorder %s2091_s14, 3 }
  0x5d   : > { %p457_p9 = pnand %p1546_p7, %p456_p8 }
  0x5e   : > { %s463_s28 = sand.u32 (!%p457_p9), 1, %s2083_s12  }
  0x5f   : > { %460 = sbr.rel (%p457_p9) target bundleno = 437 (0x1b5), region = 66  ;;  %s1547_s9 = sshll.u32 (!%p457_p9), %s463_s28, 7 }
  0x60   : > { %s2040_s29 = smul.u32 (!%p457_p9), 576, %s463_s28  ;;  %s2691_s10 = scalar_lea.vmem (!%p457_p9), [#allocation3], %s1547_s9 }
  0x62   : > { %s2307_s30 = scalar_lea.vmem (!%p457_p9), [#allocation2], %s2040_s29 }
  0x64   : > { %v1686_v8 = vld [vmem:[%s2307_s30 + $0x70] sm:$0xf]  ;;  %v1965_v9 = vld [vmem:[%s2307_s30 + $0x74] sm:$0xf0]  ;;  %v1678_v13 = vld [vmem:[%s2307_s30 + $0x60] sm:$0xf] }
  0x65   : > { %v1750_v10 = vld [vmem:[%s2307_s30 + $0xf0] sm:$0xf]  ;;  %v1687_v11 = vor.u32 %v1965_v9, %v1686_v8  ;;  %v1981_v12 = vld [vmem:[%s2307_s30 + $0xf4] sm:$0xf0]  ;;  %v1963_v14 = vld [vmem:[%s2307_s30 + $0x64] sm:$0xf0] }
  0x66   : > { %v1751_v15 = vor.u32 %v1981_v12, %v1750_v10  ;;  %v1742_v16 = vld [vmem:[%s2307_s30 + $0xe0] sm:$0xf]  ;;  %v1979_v17 = vld [vmem:[%s2307_s30 + $0xe4] sm:$0xf0]  ;;  %v1679_v18 = vor.u32 %v1963_v14, %v1678_v13  ;;  %v1670_v20 = vld [vmem:[%s2307_s30 + $0x50] sm:$0xf] }
  0x67   : > { %2023 = vmatpush.bf16.msra.mxu2 %v1687_v11  ;;  %1105 = vmatpush.bf16.msra.mxu0 %v1687_v11  ;;  %v1743_v19 = vor.u32 %v1979_v17, %v1742_v16  ;;  %v1961_v21 = vld [vmem:[%s2307_s30 + $0x54] sm:$0xf0]  ;;  %v1734_v22 = vld [vmem:[%s2307_s30 + $0xd0] sm:$0xf]  ;;  %v1662_v26 = vld [vmem:[%s2307_s30 + $0x40] sm:$0xf] }
  0x68   : > { %2031 = vmatpush.bf16.msra.mxu3 %v1751_v15  ;;  %1134 = vmatpush.bf16.msra.mxu1 %v1751_v15  ;;  %v1977_v23 = vld [vmem:[%s2307_s30 + $0xd4] sm:$0xf0]  ;;  %v1671_v24 = vor.u32 %v1961_v21, %v1670_v20  ;;  %v1959_v27 = vld [vmem:[%s2307_s30 + $0x44] sm:$0xf0]  ;;  %v1726_v28 = vld [vmem:[%s2307_s30 + $0xc0] sm:$0xf] }
  0x69   : > { %v1735_v25 = vor.u32 %v1977_v23, %v1734_v22  ;;  %v1975_v29 = vld [vmem:[%s2307_s30 + $0xc4] sm:$0xf0]  ;;  %v1663_v30 = vor.u32 %v1959_v27, %v1662_v26  ;;  %v1654_v32 = vld [vmem:[%s2307_s30 + $0x30] sm:$0xf]  ;;  %v1957_v33 = vld [vmem:[%s2307_s30 + $0x34] sm:$0xf0] }
  0x6a   : > { %v1727_v31 = vor.u32 %v1975_v29, %v1726_v28  ;;  %v1718_v34 = vld [vmem:[%s2307_s30 + $0xb0] sm:$0xf]  ;;  %v1973_v35 = vld [vmem:[%s2307_s30 + $0xb4] sm:$0xf0]  ;;  %v1655_v36 = vor.u32 %v1957_v33, %v1654_v32  ;;  %v1646_v38 = vld [vmem:[%s2307_s30 + $0x20] sm:$0xf] }
  0x6b   : > { %2024 = vmatpush.bf16.msra.mxu2 %v1679_v18  ;;  %1106 = vmatpush.bf16.msra.mxu0 %v1679_v18  ;;  %v1719_v37 = vor.u32 %v1973_v35, %v1718_v34  ;;  %v1955_v39 = vld [vmem:[%s2307_s30 + $0x24] sm:$0xf0]  ;;  %v1710_v40 = vld [vmem:[%s2307_s30 + $0xa0] sm:$0xf]  ;;  %v1638_v45 = vld [vmem:[%s2307_s30 + $0x10] sm:$0xf] }
  0x6c   : > { %2032 = vmatpush.bf16.msra.mxu3 %v1743_v19  ;;  %1135 = vmatpush.bf16.msra.mxu1 %v1743_v19  ;;  %v1971_v41 = vld [vmem:[%s2307_s30 + $0xa4] sm:$0xf0]  ;;  %v1647_v42 = vor.u32 %v1955_v39, %v1646_v38  ;;  %v584_v43 = vld [vmem:[%s2796_s2] sm:$0xff]  ;;  %v1953_v46 = vld [vmem:[%s2307_s30 + $0x14] sm:$0xf0]  ;;  %v2093_v49 = vmov 0  }
  0x6d   : > { %v1711_v44 = vor.u32 %v1971_v41, %v1710_v40  ;;  %v1702_v47 = vld [vmem:[%s2307_s30 + $0x90] sm:$0xf]  ;;  %v1969_v48 = vld [vmem:[%s2307_s30 + $0x94] sm:$0xf0]  ;;  %2066 = vset.pattern.permute.xlu0 %v2093_v49  ;;  %2067 = vset.pattern.permute.xlu1 %v2093_v49  ;;  %v1639_v50 = vor.u32 %v1953_v46, %v1638_v45  ;;  %v1630_v51 = vld [vmem:[%s2307_s30] sm:$0xf] }
  0x6e   : > { %594 = vperm.xlu0 %2066, %v584_v43   ;;  %2068 = vset.pattern.permute.xlu2 %v2093_v49  ;;  %v1703_v52 = vor.u32 %v1969_v48, %v1702_v47  ;;  %v1951_v53 = vld [vmem:[%s2307_s30 + $0x4] sm:$0xf0]  ;;  %v1694_v54 = vld [vmem:[%s2307_s30 + $0x80] sm:$0xf]  ;;  %v1590_v56 = vld [vmem:[%s2794_s0 + $0x50] sm:$0xf] }
  0x6f   : > { %2025 = vmatpush.bf16.msra.mxu2 %v1671_v24  ;;  %1107 = vmatpush.bf16.msra.mxu0 %v1671_v24  ;;  %v1967_v55 = vld [vmem:[%s2307_s30 + $0x84] sm:$0xf0]  ;;  %v1942_v57 = vld [vmem:[%s2794_s0 + $0x60] sm:$0xf0]  ;;  %v1814_v58 = vld [vmem:[%s2307_s30 + $0x170] sm:$0xf]  ;;  %v1631_v1 = vor.u32 %v1951_v53, %v1630_v51 }
  0x70   : > { %2033 = vmatpush.bf16.msra.mxu3 %v1735_v25  ;;  %1136 = vmatpush.bf16.msra.mxu1 %v1735_v25  ;;  %v1997_v59 = vld [vmem:[%s2307_s30 + $0x174] sm:$0xf0]  ;;  %v1940_v60 = vld [vmem:[%s2794_s0 + $0x54] sm:$0xf]  ;;  %v1592_v61 = vld [vmem:[%s2794_s0 + $0x64] sm:$0xf0]  ;;  %v1695_v5 = vor.u32 %v1967_v55, %v1694_v54  ;;  %v2380_v14 = vor.u32 %v1942_v57, %v1590_v56 }
  0x71   : > { %v1878_v62 = vld [vmem:[%s2307_s30 + $0x1f0] sm:$0xf]  ;;  %v2013_v63 = vld [vmem:[%s2307_s30 + $0x1f4] sm:$0xf0]  ;;  %v1550_v0 = vld [vmem:[%s2794_s0] sm:$0xf]  ;;  %v1815_v6 = vor.u32 %v1997_v59, %v1814_v58  ;;  %v2387_v19 = vor.u32 %v1940_v60, %v1592_v61 }
  0x72   : > { %v1932_v2 = vld [vmem:[%s2794_s0 + $0x10] sm:$0xf0]  ;;  %v1930_v3 = vld [vmem:[%s2794_s0 + $0x4] sm:$0xf]  ;;  %v585_v4 = vld [vmem:[%s2796_s2 + $0x8] sm:$0xff]  ;;  %v1879_v10 = vor.u32 %v2013_v63, %v1878_v62  ;;  %vm1092_vm0 = vcmask 523264  }
  0x73   : > { %2026 = vmatpush.bf16.msra.mxu2 %v1663_v30  ;;  %1108 = vmatpush.bf16.msra.mxu0 %v1663_v30  ;;  %v1552_v7 = vld [vmem:[%s2794_s0 + $0x14] sm:$0xf0]  ;;  %v1964_v8 = vld [vmem:[%s2307_s30 + $0x74] sm:$0xf]  ;;  %v1688_v9 = vld [vmem:[%s2307_s30 + $0x78] sm:$0xf0]  ;;  %v2382_v15 = vor.u32 %v1932_v2, %v1550_v0 }
  0x74   : > { %2034 = vmatpush.bf16.msra.mxu3 %v1727_v31  ;;  %1137 = vmatpush.bf16.msra.mxu1 %v1727_v31  ;;  %v1806_v11 = vld [vmem:[%s2307_s30 + $0x160] sm:$0xf]  ;;  %v1995_v12 = vld [vmem:[%s2307_s30 + $0x164] sm:$0xf0]  ;;  %v1910_v17 = vld [vmem:[%s2307_s30 + $0x230] sm:$0xf]  ;;  %v1691_v20 = vor.u32 %v1964_v8, %v1688_v9  ;;  %v2389_v21 = vor.u32 %v1930_v3, %v1552_v7 }
  0x75   : > { %v1870_v13 = vld [vmem:[%s2307_s30 + $0x1e0] sm:$0xf]  ;;  %v2011_v16 = vld [vmem:[%s2307_s30 + $0x1e4] sm:$0xf0]  ;;  %v2021_v18 = vld [vmem:[%s2307_s30 + $0x234] sm:$0xf0]  ;;  %v1807_v22 = vor.u32 %v1995_v12, %v1806_v11 }
  0x76   : > { %599 = vperm.xlu0 %2066, %v585_v4   ;;  %v1962_v23 = vld [vmem:[%s2307_s30 + $0x64] sm:$0xf]  ;;  %v1680_v24 = vld [vmem:[%s2307_s30 + $0x68] sm:$0xf0]  ;;  %v1871_v25 = vor.u32 %v2011_v16, %v1870_v13  ;;  %v1798_v26 = vld [vmem:[%s2307_s30 + $0x150] sm:$0xf]  ;;  %v1911_v29 = vor.u32 %v2021_v18, %v1910_v17 }
  0x77   : > { %2027 = vmatpush.bf16.msra.mxu2 %v1655_v36  ;;  %1109 = vmatpush.bf16.msra.mxu0 %v1655_v36  ;;  %v1993_v27 = vld [vmem:[%s2307_s30 + $0x154] sm:$0xf0]  ;;  %v1862_v28 = vld [vmem:[%s2307_s30 + $0x1d0] sm:$0xf]  ;;  %v1902_v31 = vld [vmem:[%s2307_s30 + $0x220] sm:$0xf]  ;;  %v1683_v33 = vor.u32 %v1962_v23, %v1680_v24 }
  0x78   : > { %2035 = vmatpush.bf16.msra.mxu3 %v1719_v37  ;;  %1138 = vmatpush.bf16.msra.mxu1 %v1719_v37  ;;  %v2009_v30 = vld [vmem:[%s2307_s30 + $0x1d4] sm:$0xf0]  ;;  %v2019_v32 = vld [vmem:[%s2307_s30 + $0x224] sm:$0xf0]  ;;  %v586_v34 = vld [vmem:[%s2796_s2 + $0x10] sm:$0xff]  ;;  %v1799_v35 = vor.u32 %v1993_v27, %v1798_v26  ;;  %s2022_s12 = sshll.u32 (%p2144_p5), %s1540_s15, 4 }
  0x79   : > { %v1790_v36 = vld [vmem:[%s2307_s30 + $0x140] sm:$0xf]  ;;  %v1960_v37 = vld [vmem:[%s2307_s30 + $0x54] sm:$0xf]  ;;  %v1672_v38 = vld [vmem:[%s2307_s30 + $0x58] sm:$0xf0]  ;;  %v1863_v39 = vor.u32 %v2009_v30, %v1862_v28  ;;  %604 = vperm.xlu1 %2067, %v586_v34   ;;  %s1436_s20 = scalar_lea.vmem (%p2144_p5), %s2797_s3, %s2022_s12 }
  0x7a   : > { %v1991_v40 = vld [vmem:[%s2307_s30 + $0x144] sm:$0xf0]  ;;  %v1854_v41 = vld [vmem:[%s2307_s30 + $0x1c0] sm:$0xf]  ;;  %v590_v43 = vld [vmem:[%s2796_s2 + $0x30] sm:$0xff]  ;;  %v1675_v47 = vor.u32 %v1960_v37, %v1672_v38 }
  0x7b   : > { %2028 = vmatpush.bf16.msra.mxu2 %v1647_v42  ;;  %1110 = vmatpush.bf16.msra.mxu0 %v1647_v42  ;;  %v1903_v42 = vor.u32 %v2019_v32, %v1902_v31  ;;  %v1894_v45 = vld [vmem:[%s2307_s30 + $0x210] sm:$0xf]  ;;  %v2017_v46 = vld [vmem:[%s2307_s30 + $0x214] sm:$0xf0]  ;;  %v1791_v49 = vor.u32 %v1991_v40, %v1790_v36  ;;  %v1664_v51 = vld [vmem:[%s2307_s30 + $0x48] sm:$0xf0] }
  0x7c   : > { %2036 = vmatpush.bf16.msra.mxu3 %v1711_v44  ;;  %1139 = vmatpush.bf16.msra.mxu1 %v1711_v44  ;;  %v2007_v44 = vld [vmem:[%s2307_s30 + $0x1c4] sm:$0xf0]  ;;  %v1782_v48 = vld [vmem:[%s2307_s30 + $0x130] sm:$0xf]  ;;  %v1610_v54 = vld [vmem:[%s2794_s0 + $0x78] sm:$0xf]  ;;  %v1895_v59 = vor.u32 %v2017_v46, %v1894_v45 }
  0x7d   : > { %v1855_v53 = vor.u32 %v2007_v44, %v1854_v41  ;;  %v1947_v55 = vld [vmem:[%s2794_s0 + $0x88] sm:$0xf0]  ;;  %v1989_v56 = vld [vmem:[%s2307_s30 + $0x134] sm:$0xf0]  ;;  %v1846_v57 = vld [vmem:[%s2307_s30 + $0x1b0] sm:$0xf] }
  0x7e   : > { %624 = vperm.xlu0 %2066, %v590_v43   ;;  %v2005_v58 = vld [vmem:[%s2307_s30 + $0x1b4] sm:$0xf0]  ;;  %v1945_v60 = vld [vmem:[%s2794_s0 + $0x7c] sm:$0xf]  ;;  %v1612_v61 = vld [vmem:[%s2794_s0 + $0x8c] sm:$0xf0]  ;;  %v2460_v16 = vor.u32 %v1947_v55, %v1610_v54 }
  0x7f   : > { %2029 = vmatpush.bf16.msra.mxu2 %v1639_v50  ;;  %1111 = vmatpush.bf16.msra.mxu0 %v1639_v50  ;;  %v1958_v50 = vld [vmem:[%s2307_s30 + $0x44] sm:$0xf]  ;;  %v1570_v62 = vld [vmem:[%s2794_s0 + $0x28] sm:$0xf]  ;;  %v1886_v63 = vld [vmem:[%s2307_s30 + $0x200] sm:$0xf]  ;;  %v1847_v9 = vor.u32 %v2005_v58, %v1846_v57  ;;  %v2467_v23 = vor.u32 %v1945_v60, %v1612_v61 }
  0x80   : > { %2037 = vmatpush.bf16.msra.mxu3 %v1703_v52  ;;  %1140 = vmatpush.bf16.msra.mxu1 %v1703_v52  ;;  %v588_v52 = vld [vmem:[%s2796_s2 + $0x20] sm:$0xff]  ;;  %v2015_v0 = vld [vmem:[%s2307_s30 + $0x204] sm:$0xf0]  ;;  %v1937_v2 = vld [vmem:[%s2794_s0 + $0x38] sm:$0xf0] }
  0x81   : > { %614 = vperm.xlu2 %2068, %v588_v52   ;;  %v1935_v3 = vld [vmem:[%s2794_s0 + $0x2c] sm:$0xf]  ;;  %v587_v4 = vld [vmem:[%s2796_s2 + $0x18] sm:$0xff]  ;;  %v1956_v7 = vld [vmem:[%s2307_s30 + $0x34] sm:$0xf]  ;;  %v1887_v13 = vor.u32 %v2015_v0, %v1886_v63  ;;  %v2462_v17 = vor.u32 %v1937_v2, %v1570_v62 }
  0x82   : > { %v1656_v8 = vld [vmem:[%s2307_s30 + $0x38] sm:$0xf0]  ;;  %v1987_v11 = vld [vmem:[%s2307_s30 + $0x124] sm:$0xf0]  ;;  %v1838_v12 = vld [vmem:[%s2307_s30 + $0x1a0] sm:$0xf]  ;;  %609 = vperm.xlu1 %2067, %v587_v4  }
  0x83   : > { %2030 = vmatpush.bf16.msra.mxu2 %v1631_v1  ;;  %1112 = vmatpush.bf16.msra.mxu0 %v1631_v1  ;;  %v1667_v1 = vor.u32 %v1958_v50, %v1664_v51  ;;  %v2003_v18 = vld [vmem:[%s2307_s30 + $0x1a4] sm:$0xf0]  ;;  %v1659_v24 = vor.u32 %v1956_v7, %v1656_v8  ;;  %v1954_v27 = vld [vmem:[%s2307_s30 + $0x24] sm:$0xf]  ;;  %v1648_v28 = vld [vmem:[%s2307_s30 + $0x28] sm:$0xf0] }
  0x84   : > { %2038 = vmatpush.bf16.msra.mxu3 %v1695_v5  ;;  %1141 = vmatpush.bf16.msra.mxu1 %v1695_v5  ;;  %v1783_v5 = vor.u32 %v1989_v56, %v1782_v48  ;;  %v1766_v30 = vld [vmem:[%s2307_s30 + $0x110] sm:$0xf]  ;;  %v1985_v31 = vld [vmem:[%s2307_s30 + $0x114] sm:$0xf0]  ;;  %v1758_v36 = vld [vmem:[%s2307_s30 + $0x100] sm:$0xf] }
  0x85   : > { %v2001_v34 = vld [vmem:[%s2307_s30 + $0x194] sm:$0xf0]  ;;  %v1983_v37 = vld [vmem:[%s2307_s30 + $0x104] sm:$0xf0]  ;;  %v1767_v40 = vor.u32 %v1985_v31, %v1766_v30  ;;  %v1952_v41 = vld [vmem:[%s2307_s30 + $0x14] sm:$0xf] }
  0x86   : > { %1123 = vmatmul.bf16.vlgmr.msra.gmra.mxu2 %v2380_v14  ;;  %1113 = vmatmul.bf16.vlgmr.msra.gmra.mxu0 %v2382_v15  ;;  %v591_v38 = vld [vmem:[%s2796_s2 + $0x38] sm:$0xff]  ;;  %v2010_v43 = vld [vmem:[%s2307_s30 + $0x1e4] sm:$0xf]  ;;  %v1822_v45 = vld [vmem:[%s2307_s30 + $0x180] sm:$0xf]  ;;  %v1759_v56 = vor.u32 %v1983_v37, %v1758_v36 }
  0x87   : > { %1163 = vmatpush.bf16.msrb.mxu2 %v1815_v6  ;;  %1152 = vmatmul.bf16.vlgmr.msra.gmra.mxu3 %v2387_v19  ;;  %v1572_v6 = vld [vmem:[%s2794_s0 + $0x3c] sm:$0xf0]  ;;  %v1999_v46 = vld [vmem:[%s2307_s30 + $0x184] sm:$0xf0]  ;;  %v1980_v48 = vld [vmem:[%s2307_s30 + $0xf4] sm:$0xf] }
  0x88   : > { %1192 = vmatpush.bf16.msrb.mxu3 %v1879_v10  ;;  %1250 = vmatpush.bf16.msrb.mxu1 %v1691_v20  ;;  %v1774_v10 = vld [vmem:[%s2307_s30 + $0x120] sm:$0xf]  ;;  %v2012_v20 = vld [vmem:[%s2307_s30 + $0x1f4] sm:$0xf]  ;;  %v1864_v55 = vld [vmem:[%s2307_s30 + $0x1d8] sm:$0xf0] }
  0x89   : > { %1142 = vmatmul.bf16.vlgmr.msra.gmra.mxu1 %v2389_v21  ;;  %1225 = vmatpush.bf16.msrb.mxu0 %v1911_v29  ;;  %v1775_v26 = vor.u32 %v1987_v11, %v1774_v10  ;;  %v1839_v29 = vor.u32 %v2003_v18, %v1838_v12  ;;  %v1996_v50 = vld [vmem:[%s2307_s30 + $0x174] sm:$0xf]  ;;  %v1950_v57 = vld [vmem:[%s2307_s30 + $0x4] sm:$0xf]  ;;  %v1632_v58 = vld [vmem:[%s2307_s30 + $0x8] sm:$0xf0] }
  0x8a   : > { %629 = vperm.xlu1 %2067, %v591_v38   ;;  %v2008_v54 = vld [vmem:[%s2307_s30 + $0x1d4] sm:$0xf]  ;;  %v1912_v62 = vld [vmem:[%s2307_s30 + $0x238] sm:$0xf0]  ;;  %v1558_v63 = vld [vmem:[%s2794_s0 + $0x8] sm:$0xf] }
  0x8b   : > { %1164 = vmatpush.bf16.msrb.mxu2 %v1807_v22  ;;  %v1880_v22 = vld [vmem:[%s2307_s30 + $0x1f8] sm:$0xf0]  ;;  %v2020_v61 = vld [vmem:[%s2307_s30 + $0x234] sm:$0xf]  ;;  %v1744_v2 = vld [vmem:[%s2307_s30 + $0xe8] sm:$0xf0] }
  0x8c   : > { %1193 = vmatpush.bf16.msrb.mxu3 %v1871_v25  ;;  %1251 = vmatpush.bf16.msrb.mxu1 %v1683_v33  ;;  %v2469_v25 = vor.u32 %v1935_v3, %v1572_v6  ;;  %v1883_v32 = vor.u32 %v2012_v20, %v1880_v22  ;;  %v1830_v33 = vld [vmem:[%s2307_s30 + $0x190] sm:$0xf]  ;;  %v1867_v3 = vor.u32 %v2008_v54, %v1864_v55  ;;  %v1933_v4 = vld [vmem:[%s2794_s0 + $0x18] sm:$0xf0]  ;;  %v1934_v7 = vld [vmem:[%s2794_s0 + $0x20] sm:$0xf0] }
  0x8d   : > { %1226 = vmatpush.bf16.msrb.mxu0 %v1903_v42  ;;  %v1640_v42 = vld [vmem:[%s2307_s30 + $0x18] sm:$0xf0]  ;;  %v1831_v44 = vor.u32 %v2001_v34, %v1830_v33  ;;  %v1566_v6 = vld [vmem:[%s2794_s0 + $0x10] sm:$0xf]  ;;  %v1931_v8 = vld [vmem:[%s2794_s0 + $0xc] sm:$0xf]  ;;  %v1915_v10 = vor.u32 %v2020_v61, %v1912_v62  ;;  %v2528_v20 = vor.u32 %v1933_v4, %v1558_v63 }
  0x8e   : > { %v1643_v52 = vor.u32 %v1952_v41, %v1640_v42  ;;  %v1994_v12 = vld [vmem:[%s2307_s30 + $0x164] sm:$0xf]  ;;  %v1976_v18 = vld [vmem:[%s2307_s30 + $0xd4] sm:$0xf]  ;;  %v2530_v22 = vor.u32 %v1934_v7, %v1566_v6  ;;  %v1856_v38 = vld [vmem:[%s2307_s30 + $0x1c8] sm:$0xf0] }
  0x8f   : > { %1165 = vmatpush.bf16.msrb.mxu2 %v1799_v35  ;;  %v1651_v35 = vor.u32 %v1954_v27, %v1648_v28  ;;  %v1904_v27 = vld [vmem:[%s2307_s30 + $0x228] sm:$0xf0]  ;;  %v1992_v31 = vld [vmem:[%s2307_s30 + $0x154] sm:$0xf]  ;;  %v1974_v34 = vld [vmem:[%s2307_s30 + $0xc4] sm:$0xf] }
  0x90   : > { %1194 = vmatpush.bf16.msrb.mxu3 %v1863_v39  ;;  %1252 = vmatpush.bf16.msrb.mxu1 %v1675_v47  ;;  %v589_v39 = vld [vmem:[%s2796_s2 + $0x28] sm:$0xff]  ;;  %v2006_v37 = vld [vmem:[%s2307_s30 + $0x1c4] sm:$0xf]  ;;  %v1972_v42 = vld [vmem:[%s2307_s30 + $0xb4] sm:$0xf] }
  0x91   : > { %1227 = vmatpush.bf16.msrb.mxu0 %v1895_v59  ;;  %v1872_v47 = vld [vmem:[%s2307_s30 + $0x1e8] sm:$0xf0]  ;;  %619 = vperm.xlu2 %2068, %v589_v39   ;;  %v1823_v59 = vor.u32 %v1999_v46, %v1822_v45  ;;  %v2004_v45 = vld [vmem:[%s2307_s30 + $0x1b4] sm:$0xf]  ;;  %v1578_v54 = vld [vmem:[%s2794_s0 + $0x30] sm:$0xf] }
  0x92   : > { %v1875_v51 = vor.u32 %v2010_v43, %v1872_v47  ;;  %v1792_v41 = vld [vmem:[%s2307_s30 + $0x148] sm:$0xf0]  ;;  %v1859_v43 = vor.u32 %v2006_v37, %v1856_v38  ;;  %v2016_v47 = vld [vmem:[%s2307_s30 + $0x214] sm:$0xf]  ;;  %v1970_v55 = vld [vmem:[%s2307_s30 + $0xa4] sm:$0xf] }
  0x93   : > { %1166 = vmatpush.bf16.msrb.mxu2 %v1791_v49  ;;  %v1752_v49 = vld [vmem:[%s2307_s30 + $0xf8] sm:$0xf0]  ;;  %v1580_v61 = vld [vmem:[%s2794_s0 + $0x44] sm:$0xf0]  ;;  %v1968_v6 = vld [vmem:[%s2307_s30 + $0x94] sm:$0xf] }
  0x94   : > { %1195 = vmatpush.bf16.msrb.mxu3 %v1855_v53  ;;  %1253 = vmatpush.bf16.msrb.mxu1 %v1667_v1  ;;  %v1816_v53 = vld [vmem:[%s2307_s30 + $0x178] sm:$0xf0]  ;;  %v1755_v60 = vor.u32 %v1980_v48, %v1752_v49  ;;  %v1978_v1 = vld [vmem:[%s2307_s30 + $0xe4] sm:$0xf]  ;;  %v1824_v38 = vld [vmem:[%s2307_s30 + $0x188] sm:$0xf0] }
  0x95   : > { %1228 = vmatpush.bf16.msrb.mxu0 %v1887_v13  ;;  %v1819_v0 = vor.u32 %v1996_v50, %v1816_v53  ;;  %v1747_v11 = vor.u32 %v1978_v1, %v1744_v2  ;;  %v1808_v13 = vld [vmem:[%s2307_s30 + $0x168] sm:$0xf0]  ;;  %v1896_v48 = vld [vmem:[%s2307_s30 + $0x218] sm:$0xf0]  ;;  %v1998_v37 = vld [vmem:[%s2307_s30 + $0x184] sm:$0xf] }
  0x96   : > { %1128 = vmatmul.bf16.gmra.mxu2 %v2460_v16  ;;  %1118 = vmatmul.bf16.gmra.mxu0 %v2462_v17  ;;  %v1899_v50 = vor.u32 %v2016_v47, %v1896_v48  ;;  %v1784_v53 = vld [vmem:[%s2307_s30 + $0x138] sm:$0xf0]  ;;  %v1776_v1 = vld [vmem:[%s2307_s30 + $0x128] sm:$0xf0]  ;;  %v1618_v48 = vld [vmem:[%s2794_s0 + $0x80] sm:$0xf] }
  0x97   : > { %1167 = vmatpush.bf16.msrb.mxu2 %v1783_v5  ;;  %1157 = vmatmul.bf16.gmra.mxu3 %v2467_v23  ;;  %v1635_v5 = vor.u32 %v1950_v57, %v1632_v58  ;;  %v1938_v57 = vld [vmem:[%s2794_s0 + $0x40] sm:$0xf0]  ;;  %v1586_v58 = vld [vmem:[%s2794_s0 + $0x38] sm:$0xf]  ;;  %v1704_v7 = vld [vmem:[%s2307_s30 + $0x98] sm:$0xf0] }
  0x98   : > { %1196 = vmatpush.bf16.msrb.mxu3 %v1847_v9  ;;  %1254 = vmatpush.bf16.msrb.mxu1 %v1659_v24  ;;  %v1560_v9 = vld [vmem:[%s2794_s0 + $0x1c] sm:$0xf0]  ;;  %v1736_v24 = vld [vmem:[%s2307_s30 + $0xd8] sm:$0xf0]  ;;  %v2580_v2 = vor.u32 %v1938_v57, %v1578_v54 }
  0x99   : > { %1147 = vmatmul.bf16.gmra.mxu1 %v2469_v25  ;;  %1337 = vmatpush.bf16.msra.mxu0 %v1883_v32  ;;  %v2535_v28 = vor.u32 %v1931_v8, %v1560_v9  ;;  %v1739_v30 = vor.u32 %v1976_v18, %v1736_v24  ;;  %v1800_v32 = vld [vmem:[%s2307_s30 + $0x158] sm:$0xf0]  ;;  %v1984_v8 = vld [vmem:[%s2307_s30 + $0x114] sm:$0xf]  ;;  %v1707_v9 = vor.u32 %v1968_v6, %v1704_v7  ;;  %v1966_v24 = vld [vmem:[%s2307_s30 + $0x84] sm:$0xf] }
  0x9a   : > { %v1803_v36 = vor.u32 %v1992_v31, %v1800_v32  ;;  %v2000_v31 = vld [vmem:[%s2307_s30 + $0x194] sm:$0xf]  ;;  %v1832_v32 = vld [vmem:[%s2307_s30 + $0x198] sm:$0xf0] }
  0x9b   : > { %1168 = vmatpush.bf16.msrb.mxu2 %v1775_v26  ;;  %v2018_v26 = vld [vmem:[%s2307_s30 + $0x224] sm:$0xf] }
  0x9c   : > { %1197 = vmatpush.bf16.msrb.mxu3 %v1839_v29  ;;  %1255 = vmatpush.bf16.msrb.mxu1 %v1651_v35  ;;  %v1811_v29 = vor.u32 %v1994_v12, %v1808_v13  ;;  %v1907_v33 = vor.u32 %v2018_v26, %v1904_v27  ;;  %v1728_v35 = vld [vmem:[%s2307_s30 + $0xc8] sm:$0xf0]  ;;  %v1982_v27 = vld [vmem:[%s2307_s30 + $0x104] sm:$0xf] }
  0x9d   : > { %1338 = vmatpush.bf16.msra.mxu0 %v1875_v51  ;;  %v1731_v39 = vor.u32 %v1974_v34, %v1728_v35  ;;  %v1840_v12 = vld [vmem:[%s2307_s30 + $0x1a8] sm:$0xf0] }
  0x9e   : > { %v1696_v26 = vld [vmem:[%s2307_s30 + $0x88] sm:$0xf0] }
  0x9f   : > { %1169 = vmatpush.bf16.msrb.mxu2 %v1767_v40  ;;  %v1990_v40 = vld [vmem:[%s2307_s30 + $0x144] sm:$0xf]  ;;  %v1888_v34 = vld [vmem:[%s2307_s30 + $0x208] sm:$0xf0] }
  0xa0   : > { %1198 = vmatpush.bf16.msrb.mxu3 %v1831_v44  ;;  %1256 = vmatpush.bf16.msrb.mxu1 %v1643_v52  ;;  %v1720_v44 = vld [vmem:[%s2307_s30 + $0xb8] sm:$0xf0]  ;;  %v1795_v49 = vor.u32 %v1990_v40, %v1792_v41  ;;  %v1988_v52 = vld [vmem:[%s2307_s30 + $0x134] sm:$0xf]  ;;  %v1943_v40 = vld [vmem:[%s2794_s0 + $0x68] sm:$0xf0] }
  0xa1   : > { %1339 = vmatpush.bf16.msra.mxu0 %v1867_v3  ;;  %v1723_v51 = vor.u32 %v1972_v42, %v1720_v44  ;;  %v1787_v62 = vor.u32 %v1988_v52, %v1784_v53  ;;  %v1606_v41 = vld [vmem:[%s2794_s0 + $0x60] sm:$0xf]  ;;  %v1944_v42 = vld [vmem:[%s2794_s0 + $0x70] sm:$0xf0]  ;;  %v1941_v44 = vld [vmem:[%s2794_s0 + $0x5c] sm:$0xf] }
  0xa2   : > { %v1620_v52 = vld [vmem:[%s2794_s0 + $0x94] sm:$0xf0] }
  0xa3   : > { %1170 = vmatpush.bf16.msrb.mxu2 %v1759_v56  ;;  %v1712_v56 = vld [vmem:[%s2307_s30 + $0xa8] sm:$0xf0] }
  0xa4   : > { %1199 = vmatpush.bf16.msrb.mxu3 %v1823_v59  ;;  %1257 = vmatpush.bf16.msrb.mxu1 %v1635_v5  ;;  %v1939_v59 = vld [vmem:[%s2794_s0 + $0x48] sm:$0xf0]  ;;  %v1715_v63 = vor.u32 %v1970_v55, %v1712_v56 }
  0xa5   : > { %1340 = vmatpush.bf16.msra.mxu0 %v1859_v43  ;;  %v2582_v3 = vor.u32 %v1939_v59, %v1586_v58  ;;  %v1827_v43 = vor.u32 %v1998_v37, %v1824_v38 }
  0xa6   : > { %1171 = vmatmul.bf16.vlgmr.msrb.gmra.mxu2 %v2528_v20  ;;  %1916 = vmatmul.msk.bf16.vlgmr.msrb.gmra.mxu0 %vm1092_vm0, %v2530_v22 }
  0xa7   : > { %1279 = vmatpush.bf16.msra.mxu2 %v1755_v60  ;;  %1200 = vmatmul.bf16.vlgmr.msrb.gmra.mxu3 %v2535_v28  ;;  %v1936_v60 = vld [vmem:[%s2794_s0 + $0x34] sm:$0xf] }
  0xa8   : > { %1308 = vmatpush.bf16.msra.mxu3 %v1819_v0  ;;  %1370 = vmatpush.bf16.msra.mxu1 %v1915_v10  ;;  %v1986_v0 = vld [vmem:[%s2307_s30 + $0x124] sm:$0xf]  ;;  %v2584_v4 = vor.u32 %v1936_v60, %v1580_v61  ;;  %v1768_v10 = vld [vmem:[%s2307_s30 + $0x118] sm:$0xf0] }
  0xa9   : > { %1258 = vmatmul.bf16.vlgmr.msrb.gmra.mxu1 %v2382_v15  ;;  %v1848_v15 = vld [vmem:[%s2307_s30 + $0x1b8] sm:$0xf0]  ;;  %v1779_v5 = vor.u32 %v1986_v0, %v1776_v1  ;;  %v1771_v13 = vor.u32 %v1984_v8, %v1768_v10 }
  0xaa   : > { %v1851_v46 = vor.u32 %v2004_v45, %v1848_v15  ;;  %v1600_v45 = vld [vmem:[%s2794_s0 + $0x6c] sm:$0xf0] }
  0xab   : > { %1280 = vmatpush.bf16.msra.mxu2 %v1747_v11  ;;  %v2002_v11 = vld [vmem:[%s2307_s30 + $0x1a4] sm:$0xf]  ;;  %v1603_v47 = vor.u32 %v1941_v44, %v1600_v45 }
  0xac   : > { %1309 = vmatpush.bf16.msra.mxu3 %v1811_v29  ;;  %1371 = vmatpush.bf16.msra.mxu1 %v1907_v33  ;;  %v1843_v18 = vor.u32 %v2002_v11, %v1840_v12  ;;  %v1699_v29 = vor.u32 %v1966_v24, %v1696_v26  ;;  %v2014_v33 = vld [vmem:[%s2307_s30 + $0x204] sm:$0xf] }
  0xad   : > { %1341 = vmatpush.bf16.msra.mxu0 %v1851_v46  ;;  %v1607_v46 = vor.u32 %v1944_v42, %v1606_v41 }
  0xaf   : > { %1281 = vmatpush.bf16.msra.mxu2 %v1739_v30  ;;  %v1760_v30 = vld [vmem:[%s2307_s30 + $0x108] sm:$0xf0] }
  0xb0   : > { %1310 = vmatpush.bf16.msra.mxu3 %v1803_v36  ;;  %1372 = vmatpush.bf16.msra.mxu1 %v1899_v50  ;;  %v1763_v35 = vor.u32 %v1982_v27, %v1760_v30  ;;  %v1891_v36 = vor.u32 %v2014_v33, %v1888_v34  ;;  %v1626_v50 = vld [vmem:[%s2794_s0 + $0x88] sm:$0xf] }
  0xb1   : > { %1342 = vmatpush.bf16.msra.mxu0 %v1843_v18 }
  0xb3   : > { %1282 = vmatpush.bf16.msra.mxu2 %v1731_v39  ;;  %v1598_v39 = vld [vmem:[%s2794_s0 + $0x58] sm:$0xf] }
  0xb4   : > { %1311 = vmatpush.bf16.msra.mxu3 %v1795_v49  ;;  %1373 = vmatpush.bf16.msra.mxu1 %v1891_v36  ;;  %v1599_v15 = vor.u32 %v1943_v40, %v1598_v39  ;;  %v1948_v49 = vld [vmem:[%s2794_s0 + $0x90] sm:$0xf0] }
  0xb5   : > { %v1619_v53 = vor.u32 %v1948_v49, %v1618_v48 }
  0xb6   : > { %1176 = vmatmul.bf16.gmra.mxu2 %v2580_v2  ;;  %1917 = vmatmul.msk.bf16.gmra.mxu0 %vm1092_vm0, %v2582_v3 }
  0xb7   : > { %1283 = vmatpush.bf16.msra.mxu2 %v1723_v51  ;;  %1205 = vmatmul.bf16.gmra.mxu3 %v2584_v4  ;;  %v1949_v51 = vld [vmem:[%s2794_s0 + $0x98] sm:$0xf0] }
  0xb8   : > { %1312 = vmatpush.bf16.msra.mxu3 %v1787_v62  ;;  %v1627_v54 = vor.u32 %v1949_v51, %v1626_v50 }
  0xb9   : > { %1263 = vmatmul.bf16.gmra.mxu1 %v2462_v17  ;;  %v1835_v17 = vor.u32 %v2000_v31, %v1832_v32 }
  0xbb   : > { %1284 = vmatpush.bf16.msra.mxu2 %v1715_v63  ;;  %1343 = vmatpush.bf16.msra.mxu0 %v1835_v17 }
  0xbc   : > { %1313 = vmatpush.bf16.msra.mxu3 %v1779_v5 }
  0xbf   : > { %1285 = vmatpush.bf16.msra.mxu2 %v1707_v9  ;;  %1344 = vmatpush.bf16.msra.mxu0 %v1827_v43 }
  0xc0   : > { %1314 = vmatpush.bf16.msra.mxu3 %v1771_v13 }
  0xc3   : > { %1286 = vmatpush.bf16.msra.mxu2 %v1699_v29 }
  0xc4   : > { %1315 = vmatpush.bf16.msra.mxu3 %v1763_v35 }
  0xc6   : > { %1181 = vmatmul.bf16.gmra.mxu2 %v1599_v15  ;;  %1918 = vmatmul.msk.bf16.gmra.mxu0 %vm1092_vm0, %v1607_v46 }
  0xc7   : > { %1210 = vmatmul.bf16.gmra.mxu3 %v1603_v47 }
  0xc9   : > { %1268 = vmatmul.bf16.gmra.mxu1 %v2380_v14  ;;  %v1946_v14 = vld [vmem:[%s2794_s0 + $0x84] sm:$0xf] }
  0xca   : > { %v1623_v55 = vor.u32 %v1946_v14, %v1620_v52 }
  0xd6   : > { %1186 = vmatmul.bf16.gmra.mxu2 %v1619_v53  ;;  %1919 = vmatmul.msk.bf16.gmra.mxu0 %vm1092_vm0, %v1627_v54 }
  0xd7   : > { %1215 = vmatmul.bf16.gmra.mxu3 %v1623_v55 }
  0xd9   : > { %1273 = vmatmul.bf16.gmra.mxu1 %v2460_v16 }
  0xe0   : > { %v2673_v63 = vpop.permute.xlu0 %594 }
  0xe6   : > { %1287 = vmatmul.bf16.vlgmr.msra.gmra.mxu2 %v2389_v21  ;;  %1345 = vmatmul.bf16.vlgmr.msra.gmra.mxu0 %v2535_v28 }
  0xe7   : > { %1316 = vmatmul.bf16.vlgmr.msra.gmra.mxu3 %v2528_v20 }
  0xe8   : > { %v2682_v5 = vpop.permute.xlu0 %599 }
  0xe9   : > { %1920 = vmatmul.msk.bf16.vlgmr.msra.gmra.mxu1 %vm1092_vm0, %v2530_v22 }
  0xeb   : > { %v2689_v26 = vpop.permute.xlu1 %604 }
  0xf4   : > { %v2698_v40 = vpop.permute.xlu1 %609 }
  0xf6   : > { %1292 = vmatmul.bf16.gmra.mxu2 %v2469_v25  ;;  %1350 = vmatmul.bf16.gmra.mxu0 %v2584_v4 }
  0xf7   : > { %1321 = vmatmul.bf16.gmra.mxu3 %v2580_v2 }
  0xf9   : > { %1921 = vmatmul.msk.bf16.gmra.mxu1 %vm1092_vm0, %v2582_v3 }
 0x103   : > { %v1114_v56 = vpop.f32.mrf.mxu0 }
 0x106   : > { %v1143_v16 = vpop.f32.mrf.mxu1  ;;  %1297 = vmatmul.bf16.gmra.mxu2 %v2387_v19  ;;  %1355 = vmatmul.bf16.gmra.mxu0 %v1603_v47 }
 0x107   : > { %1326 = vmatmul.bf16.gmra.mxu3 %v1599_v15  ;;  %v2703_v15 = vpop.permute.xlu2 %614 }
 0x109   : > { %1922 = vmatmul.msk.bf16.gmra.mxu1 %vm1092_vm0, %v1607_v46  ;;  %v2659_v21 = vpop.f32.mrf.mxu2 }
 0x10a   : > { %v2661_v20 = vpop.f32.mrf.mxu3  ;;  %v1125_v14 = vadd.f32 %v2659_v21, %v2703_v15 }
 0x10b   : > { %v1116_v25 = vpop.f32.mrf.mxu0 }
 0x10c   : > { %v1117_v10 = vadd.f32 %v1116_v25, %v2682_v5 }
 0x10e   : > { %v1145_v22 = vpop.f32.mrf.mxu1 }
 0x10f   : > { %v1146_v18 = vadd.f32 %v1145_v22, %v1117_v10 }
 0x111   : > { %v2663_v28 = vpop.f32.mrf.mxu2 }
 0x112   : > { %v2665_v57 = vpop.f32.mrf.mxu3 }
 0x113   : > { %v1119_v58 = vpop.f32.mrf.mxu0 }
 0x114   : > { %v1120_v32 = vadd.f32 %v1119_v58, %v2689_v26 }
 0x116   : > { %v1148_v59 = vpop.f32.mrf.mxu1  ;;  %1302 = vmatmul.bf16.gmra.mxu2 %v2467_v23  ;;  %1360 = vmatmul.bf16.gmra.mxu0 %v1623_v55  ;;  %v1115_v23 = vadd.f32 %v1114_v56, %v2673_v63  ;;  %v1154_v55 = vadd.f32 %v2661_v20, %v1125_v14 }
 0x117   : > { %1331 = vmatmul.bf16.gmra.mxu3 %v1619_v53  ;;  %v1149_v35 = vadd.f32 %v1148_v59, %v1120_v32 }
 0x118   : > { %v1144_v4 = vadd.f32 %v1143_v16, %v1115_v23  ;;  %v2711_v16 = vpop.permute.xlu2 %619 }
 0x119   : > { %1923 = vmatmul.msk.bf16.gmra.mxu1 %vm1092_vm0, %v1627_v54  ;;  %v2669_v19 = vpop.f32.mrf.mxu2 }
 0x11a   : > { %v2671_v60 = vpop.f32.mrf.mxu3 }
 0x11b   : > { %v1121_v61 = vpop.f32.mrf.mxu0 }
 0x11c   : > { %v1122_v42 = vadd.f32 %v1121_v61, %v2698_v40  ;;  %v1127_v61 = vadd.f32 %v2663_v28, %v2711_v16 }
 0x11e   : > { %v1150_v62 = vpop.f32.mrf.mxu1  ;;  %v1156_v23 = vadd.f32 %v2665_v57, %v1127_v61 }
 0x11f   : > { %v1151_v46 = vadd.f32 %v1150_v62, %v1122_v42 }
 0x121   : > { %v2675_v0 = vpop.f32.mrf.mxu2 }
 0x122   : > { %v2677_v1 = vpop.f32.mrf.mxu3 }
 0x123   : > { %v1230_v2 = vpop.f32.mrf.mxu0 }
 0x126   : > { %v2680_v3 = vpop.f32.mrf.mxu1 }
 0x129   : > { %v1172_v6 = vpop.f32.mrf.mxu2 }
 0x12a   : > { %v1173_v7 = vadd.f32 %v1172_v6, %v1144_v4  ;;  %v1201_v8 = vpop.f32.mrf.mxu3  ;;  %v2719_v4 = vpop.permute.xlu0 %624 }
 0x12b   : > { %v1232_v9 = vpop.f32.mrf.mxu0  ;;  %v1130_v10 = vadd.f32 %v2669_v19, %v2719_v4 }
 0x12c   : > { %v1202_v11 = vadd.f32 %v1201_v8, %v1173_v7 }
 0x12e   : > { %v2687_v12 = vpop.f32.mrf.mxu1  ;;  %v1231_v13 = vadd.f32 %v1230_v2, %v1202_v11 }
 0x12f   : > { %v1262_v14 = vadd.f32 %v2687_v12, %v2682_v5 }
 0x130   : > { %v1395_v24 = vmax.f32 %v1231_v13, 0.0 }
 0x131   : > { %v1174_v27 = vpop.f32.mrf.mxu2 }
 0x132   : > { %1411 = vst [vmem:[%s2691_s10] sm:$0xff] %v1395_v24  ;;  %v1175_v29 = vadd.f32 %v1174_v27, %v1146_v18  ;;  %v1203_v30 = vpop.f32.mrf.mxu3  ;;  %v1159_v18 = vadd.f32 %v2671_v60, %v1130_v10  ;;  %v2727_v24 = vpop.permute.xlu1 %629 }
 0x133   : > { %v1235_v31 = vpop.f32.mrf.mxu0  ;;  %v1132_v32 = vadd.f32 %v2675_v0, %v2727_v24 }
 0x134   : > { %v1204_v17 = vadd.f32 %v1203_v30, %v1175_v29 }
 0x136   : > { %v2695_v33 = vpop.f32.mrf.mxu1  ;;  %v1233_v34 = vadd.f32 %v1232_v9, %v1204_v17 }
 0x138   : > { %v1397_v36 = vmax.f32 %v1233_v34, 0.0 }
 0x139   : > { %v1177_v37 = vpop.f32.mrf.mxu2 }
 0x13a   : > { %1413 = vst [vmem:[%s2691_s10 + $0x10] sm:$0xff] %v1397_v36  ;;  %v1178_v38 = vadd.f32 %v1177_v37, %v1149_v35  ;;  %v1206_v39 = vpop.f32.mrf.mxu3  ;;  %v1161_v35 = vadd.f32 %v2677_v1, %v1132_v32 }
 0x13b   : > { %v1237_v41 = vpop.f32.mrf.mxu0 }
 0x13c   : > { %v1207_v43 = vadd.f32 %v1206_v39, %v1178_v38 }
 0x13e   : > { %v2701_v44 = vpop.f32.mrf.mxu1  ;;  %v1236_v45 = vadd.f32 %v1235_v31, %v1207_v43 }
 0x140   : > { %v1399_v47 = vmax.f32 %v1236_v45, 0.0  ;;  %v1260_v45 = vadd.f32 %v2680_v3, %v2673_v63 }
 0x141   : > { %v1179_v48 = vpop.f32.mrf.mxu2 }
 0x142   : > { %1415 = vst [vmem:[%s2691_s10 + $0x20] sm:$0xff] %v1399_v47  ;;  %v1180_v49 = vadd.f32 %v1179_v48, %v1151_v46  ;;  %v1208_v50 = vpop.f32.mrf.mxu3 }
 0x143   : > { %v1240_v51 = vpop.f32.mrf.mxu0 }
 0x144   : > { %v1209_v52 = vadd.f32 %v1208_v50, %v1180_v49 }
 0x146   : > { %v2708_v53 = vpop.f32.mrf.mxu1  ;;  %v1238_v54 = vadd.f32 %v1237_v41, %v1209_v52 }
 0x148   : > { %v1401_v56 = vmax.f32 %v1238_v54, 0.0 }
 0x149   : > { %v1182_v25 = vpop.f32.mrf.mxu2 }
 0x14a   : > { %1417 = vst [vmem:[%s2691_s10 + $0x30] sm:$0xff] %v1401_v56  ;;  %v1183_v22 = vadd.f32 %v1182_v25, %v1154_v55  ;;  %v1211_v58 = vpop.f32.mrf.mxu3 }
 0x14b   : > { %v1242_v59 = vpop.f32.mrf.mxu0 }
 0x14c   : > { %v1212_v62 = vadd.f32 %v1211_v58, %v1183_v22 }
 0x14e   : > { %v2716_v21 = vpop.f32.mrf.mxu1  ;;  %v1241_v2 = vadd.f32 %v1240_v51, %v1212_v62 }
 0x150   : > { %v1403_v20 = vmax.f32 %v1241_v2, 0.0 }
 0x151   : > { %v1184_v6 = vpop.f32.mrf.mxu2 }
 0x152   : > { %1419 = vst [vmem:[%s2691_s10 + $0x40] sm:$0xff] %v1403_v20  ;;  %v1185_v7 = vadd.f32 %v1184_v6, %v1156_v23  ;;  %v1213_v8 = vpop.f32.mrf.mxu3 }
 0x153   : > { %v1245_v9 = vpop.f32.mrf.mxu0 }
 0x154   : > { %v1214_v11 = vadd.f32 %v1213_v8, %v1185_v7  ;;  %v1267_v8 = vadd.f32 %v2701_v44, %v2698_v40 }
 0x156   : > { %v2724_v28 = vpop.f32.mrf.mxu1  ;;  %v1243_v13 = vadd.f32 %v1242_v59, %v1214_v11  ;;  %v1265_v59 = vadd.f32 %v2695_v33, %v2689_v26 }
 0x158   : > { %v1405_v57 = vmax.f32 %v1243_v13, 0.0 }
 0x159   : > { %v1187_v27 = vpop.f32.mrf.mxu2 }
 0x15a   : > { %1421 = vst [vmem:[%s2691_s10 + $0x50] sm:$0xff] %v1405_v57  ;;  %v1188_v29 = vadd.f32 %v1187_v27, %v1159_v18  ;;  %v1216_v30 = vpop.f32.mrf.mxu3  ;;  %v1270_v27 = vadd.f32 %v2708_v53, %v2703_v15 }
 0x15b   : > { %v1247_v31 = vpop.f32.mrf.mxu0 }
 0x15c   : > { %v1217_v17 = vadd.f32 %v1216_v30, %v1188_v29 }
 0x15e   : > { %v2732_v19 = vpop.f32.mrf.mxu1  ;;  %v1246_v34 = vadd.f32 %v1245_v9, %v1217_v17 }
 0x160   : > { %v1407_v36 = vmax.f32 %v1246_v34, 0.0 }
 0x161   : > { %v1189_v60 = vpop.f32.mrf.mxu2 }
 0x162   : > { %1423 = vst [vmem:[%s2691_s10 + $0x60] sm:$0xff] %v1407_v36  ;;  %v1190_v37 = vadd.f32 %v1189_v60, %v1161_v35  ;;  %v1218_v38 = vpop.f32.mrf.mxu3  ;;  %v1272_v35 = vadd.f32 %v2716_v21, %v2711_v16 }
 0x163   : > { %v1346_v39 = vpop.f32.mrf.mxu0 }
 0x164   : > { %v1219_v41 = vadd.f32 %v1218_v38, %v1190_v37 }
 0x166   : > { %v1375_v42 = vpop.f32.mrf.mxu1  ;;  %v1248_v43 = vadd.f32 %v1247_v31, %v1219_v41 }
 0x168   : > { %v1409_v0 = vmax.f32 %v1248_v43, 0.0  ;;  %v1275_v43 = vadd.f32 %v2724_v28, %v2719_v4 }
 0x169   : > { %v1288_v46 = vpop.f32.mrf.mxu2 }
 0x16a   : > { %1425 = vst [vmem:[%s2691_s10 + $0x70] sm:$0xff] %v1409_v0  ;;  %v1289_v47 = vadd.f32 %v1288_v46, %v1260_v45  ;;  %v1317_v48 = vpop.f32.mrf.mxu3 }
 0x16b   : > { %v1348_v49 = vpop.f32.mrf.mxu0 }
 0x16c   : > { %v1318_v1 = vadd.f32 %v1317_v48, %v1289_v47 }
 0x16e   : > { %v1377_v50 = vpop.f32.mrf.mxu1  ;;  %v1347_v51 = vadd.f32 %v1346_v39, %v1318_v1 }
 0x170   : > { %v1376_v52 = vadd.f32 %v1375_v42, %v1347_v51 }
 0x171   : > { %v1290_v54 = vpop.f32.mrf.mxu2 }
 0x172   : > { %v1396_v55 = vmax.f32 %v1376_v52, 0.0  ;;  %v1291_v56 = vadd.f32 %v1290_v54, %v1262_v14  ;;  %v1319_v25 = vpop.f32.mrf.mxu3 }
 0x173   : > { %v1351_v63 = vpop.f32.mrf.mxu0 }
 0x174   : > { %1412 = vst [vmem:[%s2691_s10 + $0x8] sm:$0xff] %v1396_v55  ;;  %v1320_v3 = vadd.f32 %v1319_v25, %v1291_v56 }
 0x176   : > { %v1380_v22 = vpop.f32.mrf.mxu1  ;;  %v1349_v58 = vadd.f32 %v1348_v49, %v1320_v3 }
 0x178   : > { %v1378_v61 = vadd.f32 %v1377_v50, %v1349_v58  ;;  %v1277_v50 = vadd.f32 %v2732_v19, %v2727_v24  ;;  %v1449_v24 = vld [vmem:[%s2691_s10] sm:$0xff] (%p2144_p5) }
 0x179   : > { %v1293_v62 = vpop.f32.mrf.mxu2  ;;  %1450 = vst [vmem:[%s1436_s20] sm:$0xff] (%p2144_p5), %v1449_v24 }
 0x17a   : > { %v1398_v2 = vmax.f32 %v1378_v61, 0.0  ;;  %v1294_v23 = vadd.f32 %v1293_v62, %v1265_v59  ;;  %v1322_v5 = vpop.f32.mrf.mxu3  ;;  %v1457_v59 = vld [vmem:[%s2691_s10 + $0x20] sm:$0xff] (%p2144_p5)  ;;  %v1461_v62 = vld [vmem:[%s2691_s10 + $0x30] sm:$0xff] (%p2144_p5) }
 0x17b   : > { %v1353_v20 = vpop.f32.mrf.mxu0  ;;  %v1451_v19 = vld [vmem:[%s2691_s10 + $0x8] sm:$0xff] (%p2144_p5)  ;;  %1458 = vst [vmem:[%s1436_s20 + $0x40] sm:$0xff] (%p2144_p5), %v1457_v59 }
 0x17c   : > { %1414 = vst [vmem:[%s2691_s10 + $0x18] sm:$0xff] %v1398_v2  ;;  %v1323_v12 = vadd.f32 %v1322_v5, %v1294_v23  ;;  %v1465_v23 = vld [vmem:[%s2691_s10 + $0x40] sm:$0xff] (%p2144_p5) }
 0x17d   : > { %1452 = vst [vmem:[%s1436_s20 + $0x8] sm:$0xff] (%p2144_p5), %v1451_v19 }
 0x17e   : > { %v1352_v6 = vadd.f32 %v1351_v63, %v1323_v12  ;;  %v1382_v7 = vpop.f32.mrf.mxu1  ;;  %1462 = vst [vmem:[%s1436_s20 + $0x60] sm:$0xff] (%p2144_p5), %v1461_v62  ;;  %v1469_v12 = vld [vmem:[%s2691_s10 + $0x50] sm:$0xff] (%p2144_p5) }
 0x17f   : > { %1466 = vst [vmem:[%s1436_s20 + $0x80] sm:$0xff] (%p2144_p5), %v1465_v23 }
 0x180   : > { %v1381_v9 = vadd.f32 %v1380_v22, %v1352_v6  ;;  %v1453_v22 = vld [vmem:[%s2691_s10 + $0x10] sm:$0xff] (%p2144_p5)  ;;  %v1473_v6 = vld [vmem:[%s2691_s10 + $0x60] sm:$0xff] (%p2144_p5)  ;;  %1470 = vst [vmem:[%s1436_s20 + $0xa0] sm:$0xff] (%p2144_p5), %v1469_v12 }
 0x181   : > { %v1295_v10 = vpop.f32.mrf.mxu2  ;;  %1454 = vst [vmem:[%s1436_s20 + $0x20] sm:$0xff] (%p2144_p5), %v1453_v22 }
 0x182   : > { %v1400_v11 = vmax.f32 %v1381_v9, 0.0  ;;  %v1296_v13 = vadd.f32 %v1295_v10, %v1267_v8  ;;  %v1324_v26 = vpop.f32.mrf.mxu3  ;;  %v1477_v8 = vld [vmem:[%s2691_s10 + $0x70] sm:$0xff] (%p2144_p5)  ;;  %1474 = vst [vmem:[%s1436_s20 + $0xc0] sm:$0xff] (%p2144_p5), %v1473_v6 }
 0x183   : > { %v1356_v57 = vpop.f32.mrf.mxu0  ;;  %v1455_v58 = vld [vmem:[%s2691_s10 + $0x18] sm:$0xff] (%p2144_p5)  ;;  %1478 = vst [vmem:[%s1436_s20 + $0xe0] sm:$0xff] (%p2144_p5), %v1477_v8 }
 0x184   : > { %1416 = vst [vmem:[%s2691_s10 + $0x28] sm:$0xff] %v1400_v11  ;;  %v1325_v33 = vadd.f32 %v1324_v26, %v1296_v13 }
 0x185   : > { %1456 = vst [vmem:[%s1436_s20 + $0x28] sm:$0xff] (%p2144_p5), %v1455_v58 }
 0x186   : > { %v1354_v18 = vadd.f32 %v1353_v20, %v1325_v33  ;;  %v1385_v30 = vpop.f32.mrf.mxu1 }
 0x188   : > { %v1383_v29 = vadd.f32 %v1382_v7, %v1354_v18 }
 0x189   : > { %v1298_v31 = vpop.f32.mrf.mxu2 }
 0x18a   : > { %v1402_v32 = vmax.f32 %v1383_v29, 0.0  ;;  %v1299_v17 = vadd.f32 %v1298_v31, %v1270_v27  ;;  %v1327_v40 = vpop.f32.mrf.mxu3 }
 0x18b   : > { %v1358_v60 = vpop.f32.mrf.mxu0  ;;  %v1459_v61 = vld [vmem:[%s2691_s10 + $0x28] sm:$0xff] (%p2144_p5) }
 0x18c   : > { %1418 = vst [vmem:[%s2691_s10 + $0x38] sm:$0xff] %v1402_v32  ;;  %v1328_v44 = vadd.f32 %v1327_v40, %v1299_v17 }
 0x18d   : > { %1460 = vst [vmem:[%s1436_s20 + $0x48] sm:$0xff] (%p2144_p5), %v1459_v61 }
 0x18e   : > { %v1357_v34 = vadd.f32 %v1356_v57, %v1328_v44  ;;  %v1387_v53 = vpop.f32.mrf.mxu1 }
 0x190   : > { %v1386_v36 = vadd.f32 %v1385_v30, %v1357_v34 }
 0x191   : > { %v1300_v37 = vpop.f32.mrf.mxu2 }
 0x192   : > { %v1404_v38 = vmax.f32 %v1386_v36, 0.0  ;;  %v1301_v39 = vadd.f32 %v1300_v37, %v1272_v35  ;;  %v1329_v15 = vpop.f32.mrf.mxu3 }
 0x193   : > { %v1361_v21 = vpop.f32.mrf.mxu0  ;;  %v1463_v2 = vld [vmem:[%s2691_s10 + $0x38] sm:$0xff] (%p2144_p5) }
 0x194   : > { %1420 = vst [vmem:[%s2691_s10 + $0x48] sm:$0xff] %v1404_v38  ;;  %v1330_v41 = vadd.f32 %v1329_v15, %v1301_v39 }
 0x195   : > { %1464 = vst [vmem:[%s1436_s20 + $0x68] sm:$0xff] (%p2144_p5), %v1463_v2 }
 0x196   : > { %v1359_v42 = vadd.f32 %v1358_v60, %v1330_v41  ;;  %v1390_v49 = vpop.f32.mrf.mxu1 }
 0x198   : > { %v1388_v45 = vadd.f32 %v1387_v53, %v1359_v42 }
 0x199   : > { %v1303_v0 = vpop.f32.mrf.mxu2 }
 0x19a   : > { %v1406_v46 = vmax.f32 %v1388_v45, 0.0  ;;  %v1304_v47 = vadd.f32 %v1303_v0, %v1275_v43  ;;  %v1332_v16 = vpop.f32.mrf.mxu3 }
 0x19b   : > { %v1363_v55 = vpop.f32.mrf.mxu0  ;;  %v1467_v5 = vld [vmem:[%s2691_s10 + $0x48] sm:$0xff] (%p2144_p5) }
 0x19c   : > { %1422 = vst [vmem:[%s2691_s10 + $0x58] sm:$0xff] %v1406_v46  ;;  %v1333_v48 = vadd.f32 %v1332_v16, %v1304_v47 }
 0x19d   : > { %1468 = vst [vmem:[%s1436_s20 + $0x88] sm:$0xff] (%p2144_p5), %v1467_v5 }
 0x19e   : > { %v1362_v1 = vadd.f32 %v1361_v21, %v1333_v48  ;;  %v1392_v25 = vpop.f32.mrf.mxu1 }
 0x1a0   : > { %v1391_v51 = vadd.f32 %v1390_v49, %v1362_v1 }
 0x1a1   : > { %v1305_v14 = vpop.f32.mrf.mxu2 }
 0x1a2   : > { %v1408_v52 = vmax.f32 %v1391_v51, 0.0  ;;  %v1306_v54 = vadd.f32 %v1305_v14, %v1277_v50  ;;  %v1334_v4 = vpop.f32.mrf.mxu3 }
 0x1a3   : > { %v1471_v20 = vld [vmem:[%s2691_s10 + $0x58] sm:$0xff] (%p2144_p5) }
 0x1a4   : > { %1424 = vst [vmem:[%s2691_s10 + $0x68] sm:$0xff] %v1408_v52  ;;  %v1335_v28 = vadd.f32 %v1334_v4, %v1306_v54 }
 0x1a5   : > { %1472 = vst [vmem:[%s1436_s20 + $0xa8] sm:$0xff] (%p2144_p5), %v1471_v20 }
 0x1a6   : > { %v1364_v56 = vadd.f32 %v1363_v55, %v1335_v28 }
 0x1a8   : > { %v1393_v63 = vadd.f32 %v1392_v25, %v1364_v56  ;;  %1433 = sbr.rel (!%p2144_p5) target bundleno = 437 (0x1b5), region = 74 }
 0x1aa   : > { %v1410_v3 = vmax.f32 %v1393_v63, 0.0 }
 0x1ab   : > { %v1475_v7 = vld [vmem:[%s2691_s10 + $0x68] sm:$0xff] (%p2144_p5) }
 0x1ac   : > { %1426 = vst [vmem:[%s2691_s10 + $0x78] sm:$0xff] %v1410_v3 }
 0x1ad   : > { %1476 = vst [vmem:[%s1436_s20 + $0xc8] sm:$0xff] %v1475_v7 }
 0x1b3   : > { %v1479_v9 = vld [vmem:[%s2691_s10 + $0x78] sm:$0xff] }
 0x1b4   : > { %1480 = vst [vmem:[%s1436_s20 + $0xe8] sm:$0xff] %v1479_v9 }
 0x1b5 PF: > { %p10_p10 = scmp.ge.s32.totalorder %s2131_s16, 4   ;;  %s2799_s12 = smov %s2087_s13 }
 0x1b6   : > { %s2800_s13 = smov %s2142_s19  ;;  %s2801_s14 = smov %s2131_s16 }
 0x1b7   :  { %12 = sbr.rel (!%p10_p10) target bundleno = 2 (0x2), region = 128 }

// kernel: framewise_forward_pallas.10
= control target key start
LH: loop header
LB: loop body
LE: loop exit
PB: predicated region body
PF: predicated region fallthrough
CT: control target
= control target key end

     0   :  { %s1639_s12 = smov 0   ;;  %s1641_s13 = smov 0   ;;  %s2061_s0 = inlined_call_operand.vmem [shape: bf16[64,576], index: 0, kind: input, shape index: {}]   ;;  %s2062_s1 = inlined_call_operand.vmem [shape: bf16[576,144], index: 1, kind: input, shape index: {}]   ;;  %s2063_s2 = inlined_call_operand.vmem [shape: f32[64,1], index: 2, kind: input, shape index: {}]   ;;  %s2064_s3 = inlined_call_operand.vmem [shape: f32[64,144], index: 3, kind: output, shape index: {}]  }
   0x1   :  { %s1643_s14 = smov 0  }
   0x2 LB: > { %s1253_s15 = sadd.s32 4294967295, %s1616_s14   ;;  %s1656_s16 = sadd.s32 1, %s1616_s14   ;;  %s1616_s14 = sphi %s1643_s14, %s2068_s14   ;;  %s1612_s13 = sphi %s1641_s13, %s2067_s13   ;;  %s1608_s12 = sphi %s1639_s12, %s2066_s12  }
   0x3   : > { %s38_s17 = ssub.s32 %s1616_s14, %s1656_s16  ;;  %s41_s18 = sadd.s32 1, %s1612_s13 }
   0x4   : > { %p39_p0 = scmp.eq.s32.totalorder %s38_s17, 0  ;;  %p48_p1 = scmp.ne.s32.totalorder %s1612_s13, %s1608_s12 }
   0x5   : > { %p49_p2 = scmp.eq.s32.totalorder %s1616_s14, 0  ;;  %p99_p3 = scmp.eq.s32.totalorder %s1253_s15, 1 }
   0x6   : > { %s1667_s19 = scalar_select %p39_p0, %s1612_s13, %s41_s18  }
   0x7   : > { %p50_p4 = por %p49_p2, %p48_p1  ;;  %p1669_p5 = por %p99_p3, %p48_p1 }
   0x8   : > { %p1256_p6 = scmp.ge.s32.totalorder %s1616_s14, 2 }
   0xa   : > { %127 = sbr.rel (%p1256_p6) target bundleno = 92 (0x5c), region = 24 }
   0xf   : > { %130 = sbr.rel (!%p50_p4) target bundleno = 92 (0x5c), region = 28  ;;  %s132_s21 = sand.u32 (%p50_p4), 1, %s1612_s13  }
  0x10   : > { %s1257_s22 = sshll.u32 (%p50_p4), %s1616_s14, 2  ;;  %s1564_s23 = smul.u32 (%p50_p4), 288, %s132_s21 }
  0x11   : > { %s1679_s26 = scalar_lea.vmem (%p50_p4), %s2062_s1, %s1257_s22 }
  0x12   : > { %v153_v0 = vld [vmem:[%s1679_s26] sm:$0xf] (%p50_p4)  ;;  %v155_v1 = vld [vmem:[%s1679_s26 + $0x8] sm:$0xf] (%p50_p4)  ;;  %v157_v2 = vld [vmem:[%s1679_s26 + $0x10] sm:$0xf] (%p50_p4) }
  0x13   : > { %s1684_s27 = scalar_lea.vmem (%p50_p4), [#allocation2], %s1564_s23  ;;  %v159_v3 = vld [vmem:[%s1679_s26 + $0x18] sm:$0xf] (%p50_p4)  ;;  %v161_v4 = vld [vmem:[%s1679_s26 + $0x20] sm:$0xf] (%p50_p4) }
  0x14   : > { %154 = vst [vmem:[%s1684_s27] sm:$0xf] %v153_v0  ;;  %v163_v5 = vld [vmem:[%s1679_s26 + $0x28] sm:$0xf]  ;;  %v165_v6 = vld [vmem:[%s1679_s26 + $0x30] sm:$0xf] }
  0x15   : > { %156 = vst [vmem:[%s1684_s27 + $0x4] sm:$0xf] %v155_v1  ;;  %v167_v7 = vld [vmem:[%s1679_s26 + $0x38] sm:$0xf]  ;;  %v169_v8 = vld [vmem:[%s1679_s26 + $0x40] sm:$0xf] }
  0x16   : > { %158 = vst [vmem:[%s1684_s27 + $0x8] sm:$0xf] %v157_v2  ;;  %v171_v9 = vld [vmem:[%s1679_s26 + $0x48] sm:$0xf]  ;;  %v173_v10 = vld [vmem:[%s1679_s26 + $0x50] sm:$0xf] }
  0x17   : > { %160 = vst [vmem:[%s1684_s27 + $0xc] sm:$0xf] %v159_v3  ;;  %v175_v11 = vld [vmem:[%s1679_s26 + $0x58] sm:$0xf]  ;;  %v177_v12 = vld [vmem:[%s1679_s26 + $0x60] sm:$0xf] }
  0x18   : > { %162 = vst [vmem:[%s1684_s27 + $0x10] sm:$0xf] %v161_v4  ;;  %v179_v13 = vld [vmem:[%s1679_s26 + $0x68] sm:$0xf]  ;;  %v181_v14 = vld [vmem:[%s1679_s26 + $0x70] sm:$0xf] }
  0x19   : > { %164 = vst [vmem:[%s1684_s27 + $0x14] sm:$0xf] %v163_v5  ;;  %v183_v15 = vld [vmem:[%s1679_s26 + $0x78] sm:$0xf]  ;;  %v185_v16 = vld [vmem:[%s1679_s26 + $0x80] sm:$0xf] }
  0x1a   : > { %166 = vst [vmem:[%s1684_s27 + $0x18] sm:$0xf] %v165_v6  ;;  %v187_v17 = vld [vmem:[%s1679_s26 + $0x88] sm:$0xf]  ;;  %v189_v18 = vld [vmem:[%s1679_s26 + $0x90] sm:$0xf] }
  0x1b   : > { %168 = vst [vmem:[%s1684_s27 + $0x1c] sm:$0xf] %v167_v7  ;;  %v191_v19 = vld [vmem:[%s1679_s26 + $0x98] sm:$0xf]  ;;  %v193_v20 = vld [vmem:[%s1679_s26 + $0xa0] sm:$0xf] }
  0x1c   : > { %170 = vst [vmem:[%s1684_s27 + $0x20] sm:$0xf] %v169_v8  ;;  %v195_v21 = vld [vmem:[%s1679_s26 + $0xa8] sm:$0xf]  ;;  %v197_v22 = vld [vmem:[%s1679_s26 + $0xb0] sm:$0xf] }
  0x1d   : > { %172 = vst [vmem:[%s1684_s27 + $0x24] sm:$0xf] %v171_v9  ;;  %v199_v23 = vld [vmem:[%s1679_s26 + $0xb8] sm:$0xf]  ;;  %v201_v24 = vld [vmem:[%s1679_s26 + $0xc0] sm:$0xf] }
  0x1e   : > { %174 = vst [vmem:[%s1684_s27 + $0x28] sm:$0xf] %v173_v10  ;;  %v203_v25 = vld [vmem:[%s1679_s26 + $0xc8] sm:$0xf]  ;;  %v205_v26 = vld [vmem:[%s1679_s26 + $0xd0] sm:$0xf] }
  0x1f   : > { %176 = vst [vmem:[%s1684_s27 + $0x2c] sm:$0xf] %v175_v11  ;;  %v207_v27 = vld [vmem:[%s1679_s26 + $0xd8] sm:$0xf]  ;;  %v209_v28 = vld [vmem:[%s1679_s26 + $0xe0] sm:$0xf] }
  0x20   : > { %178 = vst [vmem:[%s1684_s27 + $0x30] sm:$0xf] %v177_v12  ;;  %v211_v29 = vld [vmem:[%s1679_s26 + $0xe8] sm:$0xf]  ;;  %v213_v30 = vld [vmem:[%s1679_s26 + $0xf0] sm:$0xf] }
  0x21   : > { %180 = vst [vmem:[%s1684_s27 + $0x34] sm:$0xf] %v179_v13  ;;  %v215_v31 = vld [vmem:[%s1679_s26 + $0xf8] sm:$0xf]  ;;  %v217_v32 = vld [vmem:[%s1679_s26 + $0x100] sm:$0xf] }
  0x22   : > { %182 = vst [vmem:[%s1684_s27 + $0x38] sm:$0xf] %v181_v14  ;;  %v219_v33 = vld [vmem:[%s1679_s26 + $0x108] sm:$0xf]  ;;  %v221_v34 = vld [vmem:[%s1679_s26 + $0x110] sm:$0xf] }
  0x23   : > { %184 = vst [vmem:[%s1684_s27 + $0x3c] sm:$0xf] %v183_v15  ;;  %v223_v35 = vld [vmem:[%s1679_s26 + $0x118] sm:$0xf]  ;;  %v225_v36 = vld [vmem:[%s1679_s26 + $0x120] sm:$0xf] }
  0x24   : > { %186 = vst [vmem:[%s1684_s27 + $0x40] sm:$0xf] %v185_v16  ;;  %v227_v37 = vld [vmem:[%s1679_s26 + $0x128] sm:$0xf]  ;;  %v229_v38 = vld [vmem:[%s1679_s26 + $0x130] sm:$0xf] }
  0x25   : > { %188 = vst [vmem:[%s1684_s27 + $0x44] sm:$0xf] %v187_v17  ;;  %v231_v39 = vld [vmem:[%s1679_s26 + $0x138] sm:$0xf]  ;;  %v233_v40 = vld [vmem:[%s1679_s26 + $0x140] sm:$0xf] }
  0x26   : > { %190 = vst [vmem:[%s1684_s27 + $0x48] sm:$0xf] %v189_v18  ;;  %v235_v41 = vld [vmem:[%s1679_s26 + $0x148] sm:$0xf]  ;;  %v237_v42 = vld [vmem:[%s1679_s26 + $0x150] sm:$0xf] }
  0x27   : > { %192 = vst [vmem:[%s1684_s27 + $0x4c] sm:$0xf] %v191_v19  ;;  %v239_v43 = vld [vmem:[%s1679_s26 + $0x158] sm:$0xf]  ;;  %v241_v44 = vld [vmem:[%s1679_s26 + $0x160] sm:$0xf] }
  0x28   : > { %194 = vst [vmem:[%s1684_s27 + $0x50] sm:$0xf] %v193_v20  ;;  %v243_v45 = vld [vmem:[%s1679_s26 + $0x168] sm:$0xf]  ;;  %v245_v46 = vld [vmem:[%s1679_s26 + $0x170] sm:$0xf] }
  0x29   : > { %196 = vst [vmem:[%s1684_s27 + $0x54] sm:$0xf] %v195_v21  ;;  %v247_v47 = vld [vmem:[%s1679_s26 + $0x178] sm:$0xf]  ;;  %v249_v48 = vld [vmem:[%s1679_s26 + $0x180] sm:$0xf] }
  0x2a   : > { %198 = vst [vmem:[%s1684_s27 + $0x58] sm:$0xf] %v197_v22  ;;  %v251_v49 = vld [vmem:[%s1679_s26 + $0x188] sm:$0xf]  ;;  %v253_v50 = vld [vmem:[%s1679_s26 + $0x190] sm:$0xf] }
  0x2b   : > { %200 = vst [vmem:[%s1684_s27 + $0x5c] sm:$0xf] %v199_v23  ;;  %v255_v51 = vld [vmem:[%s1679_s26 + $0x198] sm:$0xf]  ;;  %v257_v52 = vld [vmem:[%s1679_s26 + $0x1a0] sm:$0xf] }
  0x2c   : > { %202 = vst [vmem:[%s1684_s27 + $0x60] sm:$0xf] %v201_v24  ;;  %v259_v53 = vld [vmem:[%s1679_s26 + $0x1a8] sm:$0xf]  ;;  %v261_v54 = vld [vmem:[%s1679_s26 + $0x1b0] sm:$0xf] }
  0x2d   : > { %204 = vst [vmem:[%s1684_s27 + $0x64] sm:$0xf] %v203_v25  ;;  %v263_v55 = vld [vmem:[%s1679_s26 + $0x1b8] sm:$0xf]  ;;  %v265_v56 = vld [vmem:[%s1679_s26 + $0x1c0] sm:$0xf] }
  0x2e   : > { %206 = vst [vmem:[%s1684_s27 + $0x68] sm:$0xf] %v205_v26  ;;  %v267_v57 = vld [vmem:[%s1679_s26 + $0x1c8] sm:$0xf]  ;;  %v269_v58 = vld [vmem:[%s1679_s26 + $0x1d0] sm:$0xf] }
  0x2f   : > { %208 = vst [vmem:[%s1684_s27 + $0x6c] sm:$0xf] %v207_v27  ;;  %v271_v59 = vld [vmem:[%s1679_s26 + $0x1d8] sm:$0xf]  ;;  %v273_v60 = vld [vmem:[%s1679_s26 + $0x1e0] sm:$0xf] }
  0x30   : > { %210 = vst [vmem:[%s1684_s27 + $0x70] sm:$0xf] %v209_v28  ;;  %v275_v61 = vld [vmem:[%s1679_s26 + $0x1e8] sm:$0xf]  ;;  %v277_v62 = vld [vmem:[%s1679_s26 + $0x1f0] sm:$0xf] }
  0x31   : > { %212 = vst [vmem:[%s1684_s27 + $0x74] sm:$0xf] %v211_v29  ;;  %v279_v63 = vld [vmem:[%s1679_s26 + $0x1f8] sm:$0xf]  ;;  %v281_v0 = vld [vmem:[%s1679_s26 + $0x200] sm:$0xf] }
  0x32   : > { %214 = vst [vmem:[%s1684_s27 + $0x78] sm:$0xf] %v213_v30  ;;  %v283_v1 = vld [vmem:[%s1679_s26 + $0x208] sm:$0xf]  ;;  %v285_v2 = vld [vmem:[%s1679_s26 + $0x210] sm:$0xf] }
  0x33   : > { %216 = vst [vmem:[%s1684_s27 + $0x7c] sm:$0xf] %v215_v31  ;;  %v287_v3 = vld [vmem:[%s1679_s26 + $0x218] sm:$0xf]  ;;  %v289_v4 = vld [vmem:[%s1679_s26 + $0x220] sm:$0xf] }
  0x34   : > { %218 = vst [vmem:[%s1684_s27 + $0x80] sm:$0xf] %v217_v32  ;;  %v291_v5 = vld [vmem:[%s1679_s26 + $0x228] sm:$0xf]  ;;  %v293_v6 = vld [vmem:[%s1679_s26 + $0x230] sm:$0xf] }
  0x35   : > { %220 = vst [vmem:[%s1684_s27 + $0x84] sm:$0xf] %v219_v33  ;;  %v295_v7 = vld [vmem:[%s1679_s26 + $0x238] sm:$0xf] }
  0x36   : > { %222 = vst [vmem:[%s1684_s27 + $0x88] sm:$0xf] %v221_v34 }
  0x37   : > { %224 = vst [vmem:[%s1684_s27 + $0x8c] sm:$0xf] %v223_v35 }
  0x38   : > { %226 = vst [vmem:[%s1684_s27 + $0x90] sm:$0xf] %v225_v36 }
  0x39   : > { %228 = vst [vmem:[%s1684_s27 + $0x94] sm:$0xf] %v227_v37 }
  0x3a   : > { %230 = vst [vmem:[%s1684_s27 + $0x98] sm:$0xf] %v229_v38 }
  0x3b   : > { %232 = vst [vmem:[%s1684_s27 + $0x9c] sm:$0xf] %v231_v39 }
  0x3c   : > { %234 = vst [vmem:[%s1684_s27 + $0xa0] sm:$0xf] %v233_v40 }
  0x3d   : > { %236 = vst [vmem:[%s1684_s27 + $0xa4] sm:$0xf] %v235_v41 }
  0x3e   : > { %238 = vst [vmem:[%s1684_s27 + $0xa8] sm:$0xf] %v237_v42 }
  0x3f   : > { %240 = vst [vmem:[%s1684_s27 + $0xac] sm:$0xf] %v239_v43 }
  0x40   : > { %242 = vst [vmem:[%s1684_s27 + $0xb0] sm:$0xf] %v241_v44 }
  0x41   : > { %244 = vst [vmem:[%s1684_s27 + $0xb4] sm:$0xf] %v243_v45 }
  0x42   : > { %246 = vst [vmem:[%s1684_s27 + $0xb8] sm:$0xf] %v245_v46 }
  0x43   : > { %248 = vst [vmem:[%s1684_s27 + $0xbc] sm:$0xf] %v247_v47 }
  0x44   : > { %250 = vst [vmem:[%s1684_s27 + $0xc0] sm:$0xf] %v249_v48 }
  0x45   : > { %252 = vst [vmem:[%s1684_s27 + $0xc4] sm:$0xf] %v251_v49 }
  0x46   : > { %254 = vst [vmem:[%s1684_s27 + $0xc8] sm:$0xf] %v253_v50 }
  0x47   : > { %256 = vst [vmem:[%s1684_s27 + $0xcc] sm:$0xf] %v255_v51 }
  0x48   : > { %258 = vst [vmem:[%s1684_s27 + $0xd0] sm:$0xf] %v257_v52 }
  0x49   : > { %260 = vst [vmem:[%s1684_s27 + $0xd4] sm:$0xf] %v259_v53 }
  0x4a   : > { %262 = vst [vmem:[%s1684_s27 + $0xd8] sm:$0xf] %v261_v54 }
  0x4b   : > { %264 = vst [vmem:[%s1684_s27 + $0xdc] sm:$0xf] %v263_v55 }
  0x4c   : > { %266 = vst [vmem:[%s1684_s27 + $0xe0] sm:$0xf] %v265_v56 }
  0x4d   : > { %268 = vst [vmem:[%s1684_s27 + $0xe4] sm:$0xf] %v267_v57 }
  0x4e   : > { %270 = vst [vmem:[%s1684_s27 + $0xe8] sm:$0xf] %v269_v58 }
  0x4f   : > { %272 = vst [vmem:[%s1684_s27 + $0xec] sm:$0xf] %v271_v59 }
  0x50   : > { %274 = vst [vmem:[%s1684_s27 + $0xf0] sm:$0xf] %v273_v60 }
  0x51   : > { %276 = vst [vmem:[%s1684_s27 + $0xf4] sm:$0xf] %v275_v61 }
  0x52   : > { %278 = vst [vmem:[%s1684_s27 + $0xf8] sm:$0xf] %v277_v62 }
  0x53   : > { %280 = vst [vmem:[%s1684_s27 + $0xfc] sm:$0xf] %v279_v63 }
  0x54   : > { %282 = vst [vmem:[%s1684_s27 + $0x100] sm:$0xf] %v281_v0 }
  0x55   : > { %284 = vst [vmem:[%s1684_s27 + $0x104] sm:$0xf] %v283_v1 }
  0x56   : > { %286 = vst [vmem:[%s1684_s27 + $0x108] sm:$0xf] %v285_v2 }
  0x57   : > { %288 = vst [vmem:[%s1684_s27 + $0x10c] sm:$0xf] %v287_v3 }
  0x58   : > { %290 = vst [vmem:[%s1684_s27 + $0x110] sm:$0xf] %v289_v4 }
  0x59   : > { %292 = vst [vmem:[%s1684_s27 + $0x114] sm:$0xf] %v291_v5 }
  0x5a   : > { %294 = vst [vmem:[%s1684_s27 + $0x118] sm:$0xf] %v293_v6 }
  0x5b   : > { %296 = vst [vmem:[%s1684_s27 + $0x11c] sm:$0xf] %v295_v7 }
  0x5c PF: > { %p1258_p7 = scmp.ge.s32.totalorder %s1616_s14, 1  ;;  %p463_p8 = scmp.lt.s32.totalorder %s1616_s14, 3 }
  0x5e   : > { %p464_p9 = pnand %p1258_p7, %p463_p8 }
  0x5f   : > { %s470_s28 = sand.u32 (!%p464_p9), 1, %s1608_s12  }
  0x60   : > { %467 = sbr.rel (%p464_p9) target bundleno = 370 (0x172), region = 69  ;;  %s1259_s7 = sshll.u32 (!%p464_p9), %s470_s28, 6 }
  0x61   : > { %s1565_s29 = smul.u32 (!%p464_p9), 288, %s470_s28  ;;  %s2024_s8 = scalar_lea.vmem (!%p464_p9), [#allocation3], %s1259_s7 }
  0x63   : > { %s1832_s30 = scalar_lea.vmem (!%p464_p9), [#allocation2], %s1565_s29 }
  0x65   : > { %v1519_v8 = vld [vmem:[%s1832_s30 + $0x38] sm:$0xff]  ;;  %v1518_v9 = vld [vmem:[%s1832_s30 + $0x30] sm:$0xff]  ;;  %v1517_v12 = vld [vmem:[%s1832_s30 + $0x28] sm:$0xff]  ;;  %v1618_v14 = vmov 0   ;;  %vm953_vm0 = vcmask 523264   ;;  %s1489_s12 = sshll.u32 (%p1669_p5), %s1253_s15, 3 }
  0x66   : > { %1548 = vmatpush.bf16.msra.mxu1 %v1519_v8  ;;  %1549 = vmatpush.bf16.msra.mxu2 %v1519_v8  ;;  %v1543_v10 = vld [vmem:[%s1832_s30 + $0xf8] sm:$0xff]  ;;  %v1542_v11 = vld [vmem:[%s1832_s30 + $0xf0] sm:$0xff]  ;;  %v1541_v13 = vld [vmem:[%s1832_s30 + $0xe8] sm:$0xff]  ;;  %s1135_s10 = scalar_lea.vmem (%p1669_p5), %s2064_s3, %s1489_s12 }
  0x67   : > { %966 = vmatpush.bf16.msra.mxu0 %v1519_v8  ;;  %1053 = vmatpush.bf16.msra.mxu3 %v1543_v10  ;;  %v1516_v15 = vld [vmem:[%s1832_s30 + $0x20] sm:$0xff]  ;;  %v591_v16 = vld [vmem:[%s2063_s2 + $0x10] sm:$0xff]  ;;  %v1515_v19 = vld [vmem:[%s1832_s30 + $0x18] sm:$0xff] }
  0x68   : > { %1592 = vset.pattern.permute.xlu1 %v1618_v14  ;;  %1591 = vset.pattern.permute.xlu0 %v1618_v14  ;;  %v1540_v17 = vld [vmem:[%s1832_s30 + $0xe0] sm:$0xff]  ;;  %v1539_v20 = vld [vmem:[%s1832_s30 + $0xd8] sm:$0xff]  ;;  %v1514_v21 = vld [vmem:[%s1832_s30 + $0x10] sm:$0xff] }
  0x69   : > { %1593 = vset.pattern.permute.xlu2 %v1618_v14  ;;  %609 = vperm.xlu1 %1592, %v591_v16   ;;  %v589_v18 = vld [vmem:[%s2063_s2] sm:$0xff]  ;;  %v592_v22 = vld [vmem:[%s2063_s2 + $0x18] sm:$0xff]  ;;  %v1538_v23 = vld [vmem:[%s1832_s30 + $0xd0] sm:$0xff] }
  0x6a   : > { %1550 = vmatpush.bf16.msra.mxu1 %v1518_v9  ;;  %1551 = vmatpush.bf16.msra.mxu2 %v1518_v9  ;;  %v590_v24 = vld [vmem:[%s2063_s2 + $0x8] sm:$0xff]  ;;  %v1499_v28 = vld [vmem:[%s2061_s0 + $0x38] sm:$0xf0]  ;;  %v1512_v29 = vld [vmem:[%s1832_s30] sm:$0xff] }
  0x6b   : > { %967 = vmatpush.bf16.msra.mxu0 %v1518_v9  ;;  %1054 = vmatpush.bf16.msra.mxu3 %v1542_v11  ;;  %v1513_v25 = vld [vmem:[%s1832_s30 + $0x8] sm:$0xff]  ;;  %v1322_v30 = vld [vmem:[%s2061_s0 + $0x78] sm:$0xf]  ;;  %v1262_v34 = vld [vmem:[%s2061_s0] sm:$0xf] }
  0x6c   : > { %599 = vperm.xlu0 %1591, %v589_v18   ;;  %v1537_v26 = vld [vmem:[%s1832_s30 + $0xc8] sm:$0xff]  ;;  %v1535_v32 = vld [vmem:[%s1832_s30 + $0xb8] sm:$0xff]  ;;  %v1536_v35 = vld [vmem:[%s1832_s30 + $0xc0] sm:$0xff] }
  0x6d   : > { %v1282_v27 = vld [vmem:[%s2061_s0 + $0x28] sm:$0xf]  ;;  %v1509_v31 = vld [vmem:[%s2061_s0 + $0x88] sm:$0xf0]  ;;  %v1527_v33 = vld [vmem:[%s1832_s30 + $0x78] sm:$0xff] }
  0x6e   : > { %1552 = vmatpush.bf16.msra.mxu1 %v1517_v12  ;;  %1553 = vmatpush.bf16.msra.mxu2 %v1517_v12  ;;  %v1283_v36 = vor.u32 %v1499_v28, %v1282_v27  ;;  %v1323_v37 = vor.u32 %v1509_v31, %v1322_v30  ;;  %v1494_v38 = vld [vmem:[%s2061_s0 + $0x10] sm:$0xf0]  ;;  %v1493_v39 = vld [vmem:[%s2061_s0 + $0xc] sm:$0xf]  ;;  %v1272_v40 = vld [vmem:[%s2061_s0 + $0x1c] sm:$0xf0] }
  0x6f   : > { %968 = vmatpush.bf16.msra.mxu0 %v1517_v12  ;;  %1055 = vmatpush.bf16.msra.mxu3 %v1541_v13  ;;  %v1547_v41 = vld [vmem:[%s1832_s30 + $0x118] sm:$0xff]  ;;  %v1534_v42 = vld [vmem:[%s1832_s30 + $0xb0] sm:$0xff]  ;;  %v1263_v45 = vor.u32 %v1494_v38, %v1262_v34  ;;  %v1275_v46 = vor.u32 %v1493_v39, %v1272_v40  ;;  %v1533_v49 = vld [vmem:[%s1832_s30 + $0xa8] sm:$0xff] }
  0x70   : > { %v1526_v43 = vld [vmem:[%s1832_s30 + $0x70] sm:$0xff]  ;;  %v596_v44 = vld [vmem:[%s2063_s2 + $0x38] sm:$0xff]  ;;  %v1525_v50 = vld [vmem:[%s1832_s30 + $0x68] sm:$0xff] }
  0x71   : > { %614 = vperm.xlu1 %1592, %v592_v22   ;;  %v1546_v47 = vld [vmem:[%s1832_s30 + $0x110] sm:$0xff]  ;;  %v1545_v51 = vld [vmem:[%s1832_s30 + $0x108] sm:$0xff]  ;;  %v1532_v52 = vld [vmem:[%s1832_s30 + $0xa0] sm:$0xff] }
  0x72   : > { %1554 = vmatpush.bf16.msra.mxu1 %v1516_v15  ;;  %1555 = vmatpush.bf16.msra.mxu2 %v1516_v15  ;;  %v595_v48 = vld [vmem:[%s2063_s2 + $0x30] sm:$0xff]  ;;  %v1524_v53 = vld [vmem:[%s1832_s30 + $0x60] sm:$0xff]  ;;  %v1531_v57 = vld [vmem:[%s1832_s30 + $0x98] sm:$0xff] }
  0x73   : > { %969 = vmatpush.bf16.msra.mxu0 %v1516_v15  ;;  %1056 = vmatpush.bf16.msra.mxu3 %v1540_v17  ;;  %v1302_v54 = vld [vmem:[%s2061_s0 + $0x50] sm:$0xf]  ;;  %v1504_v55 = vld [vmem:[%s2061_s0 + $0x60] sm:$0xf0]  ;;  %v1523_v58 = vld [vmem:[%s1832_s30 + $0x58] sm:$0xff] }
  0x74   : > { %604 = vperm.xlu0 %1591, %v590_v24   ;;  %v1544_v56 = vld [vmem:[%s1832_s30 + $0x100] sm:$0xff]  ;;  %v1278_v59 = vld [vmem:[%s2061_s0 + $0x10] sm:$0xf]  ;;  %v1303_v60 = vor.u32 %v1504_v55, %v1302_v54  ;;  %v1498_v62 = vld [vmem:[%s2061_s0 + $0x34] sm:$0xf] }
  0x75   : > { %v1496_v61 = vld [vmem:[%s2061_s0 + $0x20] sm:$0xf0]  ;;  %v1292_v63 = vld [vmem:[%s2061_s0 + $0x44] sm:$0xf0]  ;;  %v1530_v0 = vld [vmem:[%s1832_s30 + $0x90] sm:$0xff] }
  0x76   : > { %1556 = vmatpush.bf16.msra.mxu1 %v1515_v19  ;;  %1557 = vmatpush.bf16.msra.mxu2 %v1515_v19  ;;  %v1522_v1 = vld [vmem:[%s1832_s30 + $0x50] sm:$0xff]  ;;  %v1279_v2 = vor.u32 %v1496_v61, %v1278_v59  ;;  %v1295_v3 = vor.u32 %v1498_v62, %v1292_v63  ;;  %v593_v4 = vld [vmem:[%s2063_s2 + $0x20] sm:$0xff]  ;;  %v1529_v5 = vld [vmem:[%s1832_s30 + $0x88] sm:$0xff] }
  0x77   : > { %970 = vmatpush.bf16.msra.mxu0 %v1515_v19  ;;  %1057 = vmatpush.bf16.msra.mxu3 %v1539_v20  ;;  %v1521_v6 = vld [vmem:[%s1832_s30 + $0x48] sm:$0xff]  ;;  %v1528_v7 = vld [vmem:[%s1832_s30 + $0x80] sm:$0xff]  ;;  %v1495_v10 = vld [vmem:[%s2061_s0 + $0x18] sm:$0xf0] }
  0x78   : > { %619 = vperm.xlu2 %1593, %v593_v4   ;;  %v1520_v8 = vld [vmem:[%s1832_s30 + $0x40] sm:$0xff]  ;;  %v1270_v9 = vld [vmem:[%s2061_s0 + $0x8] sm:$0xf]  ;;  %v1264_v14 = vld [vmem:[%s2061_s0 + $0x14] sm:$0xf0] }
  0x79   : > { %634 = vperm.xlu1 %1592, %v596_v44   ;;  %v594_v11 = vld [vmem:[%s2063_s2 + $0x28] sm:$0xff]  ;;  %v1271_v12 = vor.u32 %v1495_v10, %v1270_v9  ;;  %v1492_v13 = vld [vmem:[%s2061_s0 + $0x4] sm:$0xf]  ;;  %v1298_v15 = vld [vmem:[%s2061_s0 + $0x38] sm:$0xf] }
  0x7a   : > { %1558 = vmatpush.bf16.msra.mxu1 %v1514_v21  ;;  %1559 = vmatpush.bf16.msra.mxu2 %v1514_v21  ;;  %v1267_v16 = vor.u32 %v1492_v13, %v1264_v14  ;;  %v1501_v17 = vld [vmem:[%s2061_s0 + $0x48] sm:$0xf0]  ;;  %v1503_v18 = vld [vmem:[%s2061_s0 + $0x5c] sm:$0xf]  ;;  %v1312_v19 = vld [vmem:[%s2061_s0 + $0x6c] sm:$0xf0] }
  0x7b   : > { %971 = vmatpush.bf16.msra.mxu0 %v1514_v21  ;;  %1058 = vmatpush.bf16.msra.mxu3 %v1538_v23  ;;  %v1299_v20 = vor.u32 %v1501_v17, %v1298_v15  ;;  %v1315_v21 = vor.u32 %v1503_v18, %v1312_v19  ;;  %v1290_v22 = vld [vmem:[%s2061_s0 + $0x30] sm:$0xf]  ;;  %v1500_v23 = vld [vmem:[%s2061_s0 + $0x40] sm:$0xf0]  ;;  %v1318_v27 = vld [vmem:[%s2061_s0 + $0x60] sm:$0xf] }
  0x7c   : > { %629 = vperm.xlu0 %1591, %v595_v48   ;;  %v1291_v24 = vor.u32 %v1500_v23, %v1290_v22  ;;  %v1508_v30 = vld [vmem:[%s2061_s0 + $0x84] sm:$0xf]  ;;  %v1332_v31 = vld [vmem:[%s2061_s0 + $0x94] sm:$0xf0]  ;;  %v1304_v38 = vld [vmem:[%s2061_s0 + $0x64] sm:$0xf0] }
  0x7d   : > { %v1310_v34 = vld [vmem:[%s2061_s0 + $0x58] sm:$0xf]  ;;  %v1338_v40 = vld [vmem:[%s2061_s0 + $0x88] sm:$0xf]  ;;  %v1510_v44 = vld [vmem:[%s2061_s0 + $0x90] sm:$0xf0] }
  0x7e   : > { %1560 = vmatpush.bf16.msra.mxu1 %v1513_v25  ;;  %1561 = vmatpush.bf16.msra.mxu2 %v1513_v25 }
  0x7f   : > { %972 = vmatpush.bf16.msra.mxu0 %v1513_v25  ;;  %1059 = vmatpush.bf16.msra.mxu3 %v1537_v26  ;;  %v1497_v25 = vld [vmem:[%s2061_s0 + $0x2c] sm:$0xf]  ;;  %v1284_v26 = vld [vmem:[%s2061_s0 + $0x3c] sm:$0xf0] }
  0x80   : > { %624 = vperm.xlu2 %1593, %v594_v11   ;;  %v1287_v28 = vor.u32 %v1497_v25, %v1284_v26 }
  0x82   : > { %1562 = vmatpush.bf16.msra.mxu1 %v1512_v29  ;;  %1563 = vmatpush.bf16.msra.mxu2 %v1512_v29 }
  0x83   : > { %973 = vmatpush.bf16.msra.mxu0 %v1512_v29  ;;  %1060 = vmatpush.bf16.msra.mxu3 %v1536_v35  ;;  %v1506_v29 = vld [vmem:[%s2061_s0 + $0x70] sm:$0xf0]  ;;  %v1505_v35 = vld [vmem:[%s2061_s0 + $0x68] sm:$0xf0] }
  0x85   : > { %979 = vmatmul.bf16.vlgmr.msra.gmra.mxu1 %v1283_v36  ;;  %989 = vmatmul.bf16.vlgmr.msra.gmra.mxu2 %v1323_v37  ;;  %v1311_v36 = vor.u32 %v1505_v35, %v1310_v34  ;;  %v1502_v37 = vld [vmem:[%s2061_s0 + $0x54] sm:$0xf] }
  0x86   : > { %1024 = vmatpush.bf16.msrb.mxu2 %v1535_v32  ;;  %995 = vmatpush.bf16.msrb.mxu1 %v1527_v33  ;;  %v1319_v32 = vor.u32 %v1506_v29, %v1318_v27  ;;  %v1335_v33 = vor.u32 %v1508_v30, %v1332_v31  ;;  %v1307_v39 = vor.u32 %v1502_v37, %v1304_v38 }
  0x87   : > { %1086 = vmatpush.bf16.msrb.mxu0 %v1547_v41  ;;  %1061 = vmatmul.bf16.vlgmr.msra.gmra.mxu3 %v1275_v46  ;;  %v1511_v41 = vld [vmem:[%s2061_s0 + $0x98] sm:$0xf0] }
  0x88   : > { %974 = vmatmul.bf16.vlgmr.msra.gmra.mxu0 %v1263_v45  ;;  %v1507_v46 = vld [vmem:[%s2061_s0 + $0x7c] sm:$0xf] }
  0x8a   : > { %1025 = vmatpush.bf16.msrb.mxu2 %v1534_v42  ;;  %996 = vmatpush.bf16.msrb.mxu1 %v1526_v43  ;;  %v1339_v42 = vor.u32 %v1511_v41, %v1338_v40  ;;  %v1330_v43 = vld [vmem:[%s2061_s0 + $0x80] sm:$0xf] }
  0x8b   : > { %1087 = vmatpush.bf16.msrb.mxu0 %v1546_v47  ;;  %v1331_v45 = vor.u32 %v1510_v44, %v1330_v43  ;;  %v1324_v47 = vld [vmem:[%s2061_s0 + $0x8c] sm:$0xf0] }
  0x8c   : > { %v1327_v48 = vor.u32 %v1507_v46, %v1324_v47 }
  0x8e   : > { %1026 = vmatpush.bf16.msrb.mxu2 %v1533_v49  ;;  %997 = vmatpush.bf16.msrb.mxu1 %v1525_v50 }
  0x8f   : > { %1088 = vmatpush.bf16.msrb.mxu0 %v1545_v51 }
  0x92   : > { %1027 = vmatpush.bf16.msrb.mxu2 %v1532_v52  ;;  %998 = vmatpush.bf16.msrb.mxu1 %v1524_v53 }
  0x93   : > { %1089 = vmatpush.bf16.msrb.mxu0 %v1544_v56 }
  0x95   : > { %984 = vmatmul.bf16.gmra.mxu1 %v1303_v60 }
  0x96   : > { %1028 = vmatpush.bf16.msrb.mxu2 %v1531_v57  ;;  %999 = vmatpush.bf16.msrb.mxu1 %v1523_v58 }
  0x97   : > { %1066 = vmatmul.bf16.gmra.mxu3 %v1295_v3 }
  0x98   : > { %1484 = vmatmul.msk.bf16.vlgmr.msrb.gmra.mxu0 %vm953_vm0, %v1279_v2 }
  0x9a   : > { %1029 = vmatpush.bf16.msrb.mxu2 %v1530_v0  ;;  %1000 = vmatpush.bf16.msrb.mxu1 %v1522_v1 }
  0x9e   : > { %1030 = vmatpush.bf16.msrb.mxu2 %v1529_v5  ;;  %1001 = vmatpush.bf16.msrb.mxu1 %v1521_v6 }
  0xa2   : > { %1031 = vmatpush.bf16.msrb.mxu2 %v1528_v7  ;;  %1002 = vmatpush.bf16.msrb.mxu1 %v1520_v8 }
  0xa5   : > { %1032 = vmatmul.bf16.vlgmr.msrb.gmra.mxu2 %v1271_v12  ;;  %1003 = vmatmul.bf16.vlgmr.msrb.gmra.mxu1 %v1267_v16 }
  0xa7   : > { %1071 = vmatmul.bf16.gmra.mxu3 %v1315_v21 }
  0xa8   : > { %1485 = vmatmul.msk.bf16.gmra.mxu0 %vm953_vm0, %v1299_v20 }
  0xb5   : > { %1037 = vmatmul.bf16.gmra.mxu2 %v1291_v24  ;;  %1008 = vmatmul.bf16.gmra.mxu1 %v1287_v28 }
  0xb7   : > { %1076 = vmatmul.bf16.gmra.mxu3 %v1335_v33 }
  0xb8   : > { %1486 = vmatmul.msk.bf16.gmra.mxu0 %vm953_vm0, %v1319_v32 }
  0xc5   : > { %1042 = vmatmul.bf16.gmra.mxu2 %v1311_v36  ;;  %1013 = vmatmul.bf16.gmra.mxu1 %v1307_v39 }
  0xc8   : > { %1487 = vmatmul.msk.bf16.gmra.mxu0 %vm953_vm0, %v1339_v42 }
  0xd2   : > { %v620_v31 = vpop.permute.xlu2 %619 }
  0xd5   : > { %1047 = vmatmul.bf16.gmra.mxu2 %v1331_v45  ;;  %1018 = vmatmul.bf16.gmra.mxu1 %v1327_v48 }
  0xda   : > { %v625_v44 = vpop.permute.xlu2 %624 }
  0xdb   : > { %v610_v9 = vpop.permute.xlu1 %609 }
  0xde   : > { %v600_v59 = vpop.permute.xlu0 %599 }
  0xe3   : > { %v615_v22 = vpop.permute.xlu1 %614 }
  0xe6   : > { %v605_v3 = vpop.permute.xlu0 %604 }
 0x102   : > { %v980_v49 = vpop.f32.mrf.mxu1 }
 0x103   : > { %v981_v16 = vadd.f32 %v980_v49, %v610_v9 }
 0x105   : > { %v975_v50 = vpop.f32.mrf.mxu0 }
 0x106   : > { %v976_v60 = vadd.f32 %v975_v50, %v600_v59 }
 0x108   : > { %v2018_v54 = vpop.f32.mrf.mxu2 }
 0x10a   : > { %v982_v51 = vpop.f32.mrf.mxu1  ;;  %v1062_v55 = vpop.f32.mrf.mxu3 }
 0x10b   : > { %v983_v26 = vadd.f32 %v982_v51, %v615_v22 }
 0x10d   : > { %v977_v52 = vpop.f32.mrf.mxu0 }
 0x10e   : > { %v978_v5 = vadd.f32 %v977_v52, %v605_v3  ;;  %v635_v3 = vpop.permute.xlu1 %634 }
 0x110   : > { %v2020_v58 = vpop.f32.mrf.mxu2 }
 0x112   : > { %v985_v53 = vpop.f32.mrf.mxu1  ;;  %v1064_v63 = vpop.f32.mrf.mxu3 }
 0x113   : > { %v986_v36 = vadd.f32 %v985_v53, %v620_v31 }
 0x115   : > { %v1091_v57 = vpop.f32.mrf.mxu0 }
 0x11a   : > { %v987_v56 = vpop.f32.mrf.mxu1  ;;  %v1067_v12 = vpop.f32.mrf.mxu3 }
 0x11b   : > { %v988_v47 = vadd.f32 %v987_v56, %v625_v44 }
 0x11d   : > { %v1093_v1 = vpop.f32.mrf.mxu0 }
 0x122   : > { %v1004_v61 = vpop.f32.mrf.mxu1  ;;  %v1069_v24 = vpop.f32.mrf.mxu3 }
 0x123   : > { %v1005_v62 = vadd.f32 %v1004_v61, %v976_v60 }
 0x125   : > { %v1096_v14 = vpop.f32.mrf.mxu0 }
 0x128   : > { %v1033_v0 = vpop.f32.mrf.mxu2 }
 0x129   : > { %v1034_v2 = vadd.f32 %v1033_v0, %v1005_v62 }
 0x12a   : > { %v1006_v7 = vpop.f32.mrf.mxu1  ;;  %v1072_v37 = vpop.f32.mrf.mxu3 }
 0x12b   : > { %v1063_v4 = vadd.f32 %v1062_v55, %v1034_v2  ;;  %v1007_v8 = vadd.f32 %v1006_v7, %v978_v5  ;;  %v993_v7 = vadd.f32 %v2020_v58, %v635_v3 }
 0x12d   : > { %v1092_v6 = vadd.f32 %v1091_v57, %v1063_v4  ;;  %v1098_v27 = vpop.f32.mrf.mxu0  ;;  %v630_v57 = vpop.permute.xlu0 %629 }
 0x12e   : > { %v991_v61 = vadd.f32 %v2018_v54, %v630_v57 }
 0x12f   : > { %v1111_v10 = vmax.f32 %v1092_v6, 0.0 }
 0x130   : > { %v1035_v11 = vpop.f32.mrf.mxu2 }
 0x131   : > { %1119 = vst [vmem:[%s2024_s8] sm:$0xff] %v1111_v10  ;;  %v1036_v13 = vadd.f32 %v1035_v11, %v1007_v8 }
 0x132   : > { %v1009_v18 = vpop.f32.mrf.mxu1  ;;  %v1074_v50 = vpop.f32.mrf.mxu3 }
 0x133   : > { %v1065_v15 = vadd.f32 %v1064_v63, %v1036_v13  ;;  %v1010_v19 = vadd.f32 %v1009_v18, %v981_v16 }
 0x135   : > { %v1094_v17 = vadd.f32 %v1093_v1, %v1065_v15  ;;  %v1101_v40 = vpop.f32.mrf.mxu0 }
 0x137   : > { %v1112_v20 = vmax.f32 %v1094_v17, 0.0 }
 0x138   : > { %v1038_v21 = vpop.f32.mrf.mxu2  ;;  %v1178_v58 = vld [vmem:[%s2024_s8] sm:$0xff] (%p1669_p5) }
 0x139   : > { %1120 = vst [vmem:[%s2024_s8 + $0x8] sm:$0xff] %v1112_v20  ;;  %v1039_v23 = vadd.f32 %v1038_v21, %v1010_v19 }
 0x13a   : > { %v1011_v29 = vpop.f32.mrf.mxu1  ;;  %v1077_v56 = vpop.f32.mrf.mxu3  ;;  %1179 = vst [vmem:[%s1135_s10] sm:$0xff] (%p1669_p5), %v1178_v58 }
 0x13b   : > { %v1068_v25 = vadd.f32 %v1067_v12, %v1039_v23  ;;  %v1012_v30 = vadd.f32 %v1011_v29, %v983_v26 }
 0x13d   : > { %v1097_v28 = vadd.f32 %v1096_v14, %v1068_v25  ;;  %v1103_v53 = vpop.f32.mrf.mxu0 }
 0x13f   : > { %v1113_v32 = vmax.f32 %v1097_v28, 0.0 }
 0x140   : > { %v1040_v33 = vpop.f32.mrf.mxu2  ;;  %v1180_v18 = vld [vmem:[%s2024_s8 + $0x8] sm:$0xff] (%p1669_p5) }
 0x141   : > { %1121 = vst [vmem:[%s2024_s8 + $0x10] sm:$0xff] %v1113_v32  ;;  %v1041_v34 = vadd.f32 %v1040_v33, %v1012_v30 }
 0x142   : > { %v1014_v39 = vpop.f32.mrf.mxu1  ;;  %v1079_v13 = vpop.f32.mrf.mxu3  ;;  %1181 = vst [vmem:[%s1135_s10 + $0x10] sm:$0xff] (%p1669_p5), %v1180_v18 }
 0x143   : > { %v1070_v35 = vadd.f32 %v1069_v24, %v1041_v34  ;;  %v1015_v41 = vadd.f32 %v1014_v39, %v986_v36 }
 0x145   : > { %v1099_v38 = vadd.f32 %v1098_v27, %v1070_v35  ;;  %v1106_v5 = vpop.f32.mrf.mxu0 }
 0x147   : > { %v1114_v42 = vmax.f32 %v1099_v38, 0.0 }
 0x148   : > { %v1043_v43 = vpop.f32.mrf.mxu2  ;;  %v1182_v19 = vld [vmem:[%s2024_s8 + $0x10] sm:$0xff] (%p1669_p5) }
 0x149   : > { %1122 = vst [vmem:[%s2024_s8 + $0x18] sm:$0xff] %v1114_v42  ;;  %v1044_v45 = vadd.f32 %v1043_v43, %v1015_v41 }
 0x14a   : > { %v1016_v49 = vpop.f32.mrf.mxu1  ;;  %1183 = vst [vmem:[%s1135_s10 + $0x20] sm:$0xff] (%p1669_p5), %v1182_v19 }
 0x14b   : > { %v1073_v46 = vadd.f32 %v1072_v37, %v1044_v45  ;;  %v1017_v51 = vadd.f32 %v1016_v49, %v988_v47 }
 0x14d   : > { %v1102_v48 = vadd.f32 %v1101_v40, %v1073_v46  ;;  %v1108_v15 = vpop.f32.mrf.mxu0 }
 0x14f   : > { %v1115_v52 = vmax.f32 %v1102_v48, 0.0 }
 0x150   : > { %v1045_v55 = vpop.f32.mrf.mxu2  ;;  %v1184_v20 = vld [vmem:[%s2024_s8 + $0x18] sm:$0xff] (%p1669_p5) }
 0x151   : > { %1123 = vst [vmem:[%s2024_s8 + $0x20] sm:$0xff] %v1115_v52  ;;  %v1046_v59 = vadd.f32 %v1045_v55, %v1017_v51 }
 0x152   : > { %v1019_v63 = vpop.f32.mrf.mxu1  ;;  %1185 = vst [vmem:[%s1135_s10 + $0x30] sm:$0xff] (%p1669_p5), %v1184_v20 }
 0x153   : > { %v1075_v60 = vadd.f32 %v1074_v50, %v1046_v59  ;;  %v1020_v0 = vadd.f32 %v1019_v63, %v991_v61 }
 0x155   : > { %v1104_v62 = vadd.f32 %v1103_v53, %v1075_v60 }
 0x157   : > { %v1116_v1 = vmax.f32 %v1104_v62, 0.0 }
 0x158   : > { %v1048_v2 = vpop.f32.mrf.mxu2  ;;  %v1186_v21 = vld [vmem:[%s2024_s8 + $0x20] sm:$0xff] (%p1669_p5) }
 0x159   : > { %1124 = vst [vmem:[%s2024_s8 + $0x28] sm:$0xff] %v1116_v1  ;;  %v1049_v4 = vadd.f32 %v1048_v2, %v1020_v0 }
 0x15a   : > { %v1021_v9 = vpop.f32.mrf.mxu1  ;;  %1187 = vst [vmem:[%s1135_s10 + $0x40] sm:$0xff] (%p1669_p5), %v1186_v21 }
 0x15b   : > { %v1078_v6 = vadd.f32 %v1077_v56, %v1049_v4  ;;  %v1022_v10 = vadd.f32 %v1021_v9, %v993_v7 }
 0x15d   : > { %v1107_v8 = vadd.f32 %v1106_v5, %v1078_v6 }
 0x15f   : > { %v1117_v11 = vmax.f32 %v1107_v8, 0.0 }
 0x160   : > { %v1050_v54 = vpop.f32.mrf.mxu2  ;;  %v1188_v22 = vld [vmem:[%s2024_s8 + $0x28] sm:$0xff] (%p1669_p5) }
 0x161   : > { %1125 = vst [vmem:[%s2024_s8 + $0x30] sm:$0xff] %v1117_v11  ;;  %v1051_v12 = vadd.f32 %v1050_v54, %v1022_v10 }
 0x162   : > { %1189 = vst [vmem:[%s1135_s10 + $0x50] sm:$0xff] (%p1669_p5), %v1188_v22 }
 0x163   : > { %v1080_v14 = vadd.f32 %v1079_v13, %v1051_v12 }
 0x165   : > { %v1109_v16 = vadd.f32 %v1108_v15, %v1080_v14  ;;  %1133 = sbr.rel (!%p1669_p5) target bundleno = 370 (0x172), region = 77 }
 0x167   : > { %v1118_v17 = vmax.f32 %v1109_v16, 0.0 }
 0x168   : > { %v1190_v23 = vld [vmem:[%s2024_s8 + $0x30] sm:$0xff] (%p1669_p5) }
 0x169   : > { %1126 = vst [vmem:[%s2024_s8 + $0x38] sm:$0xff] %v1118_v17 }
 0x16a   : > { %1191 = vst [vmem:[%s1135_s10 + $0x60] sm:$0xff] %v1190_v23 }
 0x170   : > { %v1192_v24 = vld [vmem:[%s2024_s8 + $0x38] sm:$0xff] }
 0x171   : > { %1193 = vst [vmem:[%s1135_s10 + $0x70] sm:$0xff] %v1192_v24 }
 0x172 PF: > { %p10_p10 = scmp.ge.s32.totalorder %s1656_s16, 4   ;;  %s2066_s12 = smov %s1612_s13 }
 0x173   : > { %s2067_s13 = smov %s1667_s19  ;;  %s2068_s14 = smov %s1656_s16 }
 0x174   :  { %12 = sbr.rel (!%p10_p10) target bundleno = 2 (0x2), region = 146 }

// kernel: framewise_forward_pallas.11
= control target key start
LH: loop header
LB: loop body
LE: loop exit
PB: predicated region body
PF: predicated region fallthrough
CT: control target
= control target key end

     0   :  { %v958_v6 = vmov 0   ;;  %vm475_vm0 = vcmask 523264   ;;  %vm641_vm1 = vcmask 392192   ;;  %s1273_s1 = inlined_call_operand.vmem [shape: bf16[576,48], index: 1, kind: input, shape index: {}]   ;;  %s1274_s2 = inlined_call_operand.vmem [shape: f32[64,1], index: 2, kind: input, shape index: {}]   ;;  %s1275_s0 = inlined_call_operand.vmem [shape: bf16[64,576], index: 0, kind: input, shape index: {}]   ;;  %s1276_s3 = inlined_call_operand.vmem [shape: f32[64,48], index: 3, kind: output, shape index: {}]  }
   0x1   :  { %v909_v0 = vld [vmem:[%s1273_s1 + $0x38] sm:$0xff]  ;;  %v908_v1 = vld [vmem:[%s1273_s1 + $0x30] sm:$0xff]  ;;  %v907_v4 = vld [vmem:[%s1273_s1 + $0x28] sm:$0xff]  ;;  %956 = vset.pattern.permute.xlu1 %v958_v6  ;;  %955 = vset.pattern.permute.xlu0 %v958_v6 }
   0x2   :  { %938 = vmatpush.bf16.msra.mxu1 %v909_v0  ;;  %939 = vmatpush.bf16.msra.mxu2 %v909_v0  ;;  %v933_v2 = vld [vmem:[%s1273_s1 + $0xf8] sm:$0xff]  ;;  %v932_v3 = vld [vmem:[%s1273_s1 + $0xf0] sm:$0xff]  ;;  %v931_v5 = vld [vmem:[%s1273_s1 + $0xe8] sm:$0xff] }
   0x3   :  { %488 = vmatpush.bf16.msra.mxu0 %v909_v0  ;;  %575 = vmatpush.bf16.msra.mxu3 %v933_v2  ;;  %v906_v7 = vld [vmem:[%s1273_s1 + $0x20] sm:$0xff]  ;;  %v113_v8 = vld [vmem:[%s1274_s2 + $0x10] sm:$0xff]  ;;  %v905_v11 = vld [vmem:[%s1273_s1 + $0x18] sm:$0xff] }
   0x4   :  { %957 = vset.pattern.permute.xlu2 %v958_v6  ;;  %v930_v9 = vld [vmem:[%s1273_s1 + $0xe0] sm:$0xff]  ;;  %131 = vperm.xlu1 %956, %v113_v8   ;;  %v929_v12 = vld [vmem:[%s1273_s1 + $0xd8] sm:$0xff]  ;;  %v904_v13 = vld [vmem:[%s1273_s1 + $0x10] sm:$0xff] }
   0x5   :  { %v111_v10 = vld [vmem:[%s1274_s2] sm:$0xff]  ;;  %v114_v14 = vld [vmem:[%s1274_s2 + $0x18] sm:$0xff]  ;;  %v928_v15 = vld [vmem:[%s1273_s1 + $0xd0] sm:$0xff] }
   0x6   :  { %940 = vmatpush.bf16.msra.mxu1 %v908_v1  ;;  %941 = vmatpush.bf16.msra.mxu2 %v908_v1  ;;  %v112_v16 = vld [vmem:[%s1274_s2 + $0x8] sm:$0xff]  ;;  %v902_v19 = vld [vmem:[%s1273_s1] sm:$0xff]  ;;  %v889_v21 = vld [vmem:[%s1275_s0 + $0x38] sm:$0xf0] }
   0x7   :  { %489 = vmatpush.bf16.msra.mxu0 %v908_v1  ;;  %576 = vmatpush.bf16.msra.mxu3 %v932_v3  ;;  %v903_v17 = vld [vmem:[%s1273_s1 + $0x8] sm:$0xff]  ;;  %v716_v22 = vld [vmem:[%s1275_s0 + $0x78] sm:$0xf]  ;;  %v656_v26 = vld [vmem:[%s1275_s0] sm:$0xf] }
   0x8   :  { %121 = vperm.xlu0 %955, %v111_v10   ;;  %v927_v18 = vld [vmem:[%s1273_s1 + $0xc8] sm:$0xff]  ;;  %v925_v24 = vld [vmem:[%s1273_s1 + $0xb8] sm:$0xff]  ;;  %v926_v27 = vld [vmem:[%s1273_s1 + $0xc0] sm:$0xff] }
   0x9   :  { %v676_v20 = vld [vmem:[%s1275_s0 + $0x28] sm:$0xf]  ;;  %v899_v23 = vld [vmem:[%s1275_s0 + $0x88] sm:$0xf0]  ;;  %v917_v25 = vld [vmem:[%s1273_s1 + $0x78] sm:$0xff] }
   0xa   :  { %942 = vmatpush.bf16.msra.mxu1 %v907_v4  ;;  %943 = vmatpush.bf16.msra.mxu2 %v907_v4  ;;  %v677_v28 = vor.u32 %v889_v21, %v676_v20  ;;  %v717_v29 = vor.u32 %v899_v23, %v716_v22  ;;  %v884_v30 = vld [vmem:[%s1275_s0 + $0x10] sm:$0xf0]  ;;  %v883_v31 = vld [vmem:[%s1275_s0 + $0xc] sm:$0xf]  ;;  %v666_v32 = vld [vmem:[%s1275_s0 + $0x1c] sm:$0xf0] }
   0xb   :  { %490 = vmatpush.bf16.msra.mxu0 %v907_v4  ;;  %577 = vmatpush.bf16.msra.mxu3 %v931_v5  ;;  %v937_v33 = vld [vmem:[%s1273_s1 + $0x118] sm:$0xff]  ;;  %v924_v34 = vld [vmem:[%s1273_s1 + $0xb0] sm:$0xff]  ;;  %v657_v37 = vor.u32 %v884_v30, %v656_v26  ;;  %v669_v38 = vor.u32 %v883_v31, %v666_v32  ;;  %v923_v41 = vld [vmem:[%s1273_s1 + $0xa8] sm:$0xff] }
   0xc   :  { %136 = vperm.xlu1 %956, %v114_v14   ;;  %v916_v35 = vld [vmem:[%s1273_s1 + $0x70] sm:$0xff]  ;;  %v118_v36 = vld [vmem:[%s1274_s2 + $0x38] sm:$0xff]  ;;  %v915_v42 = vld [vmem:[%s1273_s1 + $0x68] sm:$0xff] }
   0xd   :  { %v936_v39 = vld [vmem:[%s1273_s1 + $0x110] sm:$0xff]  ;;  %v935_v43 = vld [vmem:[%s1273_s1 + $0x108] sm:$0xff]  ;;  %v922_v44 = vld [vmem:[%s1273_s1 + $0xa0] sm:$0xff] }
   0xe   :  { %944 = vmatpush.bf16.msra.mxu1 %v906_v7  ;;  %945 = vmatpush.bf16.msra.mxu2 %v906_v7  ;;  %v117_v40 = vld [vmem:[%s1274_s2 + $0x30] sm:$0xff]  ;;  %v914_v45 = vld [vmem:[%s1273_s1 + $0x60] sm:$0xff]  ;;  %v921_v49 = vld [vmem:[%s1273_s1 + $0x98] sm:$0xff] }
   0xf   :  { %491 = vmatpush.bf16.msra.mxu0 %v906_v7  ;;  %578 = vmatpush.bf16.msra.mxu3 %v930_v9  ;;  %v696_v46 = vld [vmem:[%s1275_s0 + $0x50] sm:$0xf]  ;;  %v894_v47 = vld [vmem:[%s1275_s0 + $0x60] sm:$0xf0]  ;;  %v913_v50 = vld [vmem:[%s1273_s1 + $0x58] sm:$0xff] }
  0x10   :  { %126 = vperm.xlu0 %955, %v112_v16   ;;  %v934_v48 = vld [vmem:[%s1273_s1 + $0x100] sm:$0xff]  ;;  %v672_v51 = vld [vmem:[%s1275_s0 + $0x10] sm:$0xf]  ;;  %v697_v52 = vor.u32 %v894_v47, %v696_v46  ;;  %v888_v54 = vld [vmem:[%s1275_s0 + $0x34] sm:$0xf] }
  0x11   :  { %v886_v53 = vld [vmem:[%s1275_s0 + $0x20] sm:$0xf0]  ;;  %v686_v55 = vld [vmem:[%s1275_s0 + $0x44] sm:$0xf0]  ;;  %v920_v56 = vld [vmem:[%s1273_s1 + $0x90] sm:$0xff] }
  0x12   :  { %946 = vmatpush.bf16.msra.mxu1 %v905_v11  ;;  %947 = vmatpush.bf16.msra.mxu2 %v905_v11  ;;  %v912_v57 = vld [vmem:[%s1273_s1 + $0x50] sm:$0xff]  ;;  %v673_v58 = vor.u32 %v886_v53, %v672_v51  ;;  %v689_v59 = vor.u32 %v888_v54, %v686_v55  ;;  %v115_v60 = vld [vmem:[%s1274_s2 + $0x20] sm:$0xff]  ;;  %v919_v61 = vld [vmem:[%s1273_s1 + $0x88] sm:$0xff] }
  0x13   :  { %492 = vmatpush.bf16.msra.mxu0 %v905_v11  ;;  %579 = vmatpush.bf16.msra.mxu3 %v929_v12  ;;  %v911_v62 = vld [vmem:[%s1273_s1 + $0x48] sm:$0xff]  ;;  %v918_v63 = vld [vmem:[%s1273_s1 + $0x80] sm:$0xff]  ;;  %v885_v2 = vld [vmem:[%s1275_s0 + $0x18] sm:$0xf0] }
  0x14   :  { %156 = vperm.xlu1 %956, %v118_v36   ;;  %141 = vperm.xlu2 %957, %v115_v60   ;;  %v910_v0 = vld [vmem:[%s1273_s1 + $0x40] sm:$0xff]  ;;  %v664_v1 = vld [vmem:[%s1275_s0 + $0x8] sm:$0xf]  ;;  %v658_v6 = vld [vmem:[%s1275_s0 + $0x14] sm:$0xf0] }
  0x15   :  { %v116_v3 = vld [vmem:[%s1274_s2 + $0x28] sm:$0xff]  ;;  %v665_v4 = vor.u32 %v885_v2, %v664_v1  ;;  %v882_v5 = vld [vmem:[%s1275_s0 + $0x4] sm:$0xf]  ;;  %v692_v7 = vld [vmem:[%s1275_s0 + $0x38] sm:$0xf] }
  0x16   :  { %948 = vmatpush.bf16.msra.mxu1 %v904_v13  ;;  %949 = vmatpush.bf16.msra.mxu2 %v904_v13  ;;  %v661_v8 = vor.u32 %v882_v5, %v658_v6  ;;  %v891_v9 = vld [vmem:[%s1275_s0 + $0x48] sm:$0xf0]  ;;  %v893_v10 = vld [vmem:[%s1275_s0 + $0x5c] sm:$0xf]  ;;  %v706_v11 = vld [vmem:[%s1275_s0 + $0x6c] sm:$0xf0] }
  0x17   :  { %493 = vmatpush.bf16.msra.mxu0 %v904_v13  ;;  %580 = vmatpush.bf16.msra.mxu3 %v928_v15  ;;  %v693_v12 = vor.u32 %v891_v9, %v692_v7  ;;  %v709_v13 = vor.u32 %v893_v10, %v706_v11  ;;  %v684_v14 = vld [vmem:[%s1275_s0 + $0x30] sm:$0xf]  ;;  %v890_v15 = vld [vmem:[%s1275_s0 + $0x40] sm:$0xf0]  ;;  %v896_v21 = vld [vmem:[%s1275_s0 + $0x70] sm:$0xf0] }
  0x18   :  { %151 = vperm.xlu0 %955, %v117_v40   ;;  %v685_v16 = vor.u32 %v890_v15, %v684_v14  ;;  %v898_v22 = vld [vmem:[%s1275_s0 + $0x84] sm:$0xf]  ;;  %v726_v23 = vld [vmem:[%s1275_s0 + $0x94] sm:$0xf0]  ;;  %v698_v30 = vld [vmem:[%s1275_s0 + $0x64] sm:$0xf0] }
  0x19   :  { %v704_v26 = vld [vmem:[%s1275_s0 + $0x58] sm:$0xf]  ;;  %v732_v32 = vld [vmem:[%s1275_s0 + $0x88] sm:$0xf]  ;;  %v900_v36 = vld [vmem:[%s1275_s0 + $0x90] sm:$0xf0] }
  0x1a   :  { %950 = vmatpush.bf16.msra.mxu1 %v903_v17  ;;  %951 = vmatpush.bf16.msra.mxu2 %v903_v17 }
  0x1b   :  { %494 = vmatpush.bf16.msra.mxu0 %v903_v17  ;;  %581 = vmatpush.bf16.msra.mxu3 %v927_v18  ;;  %v887_v17 = vld [vmem:[%s1275_s0 + $0x2c] sm:$0xf]  ;;  %v678_v18 = vld [vmem:[%s1275_s0 + $0x3c] sm:$0xf0] }
  0x1c   :  { %146 = vperm.xlu2 %957, %v116_v3   ;;  %v681_v20 = vor.u32 %v887_v17, %v678_v18 }
  0x1e   :  { %952 = vmatpush.bf16.msra.mxu1 %v902_v19  ;;  %953 = vmatpush.bf16.msra.mxu2 %v902_v19 }
  0x1f   :  { %495 = vmatpush.bf16.msra.mxu0 %v902_v19  ;;  %582 = vmatpush.bf16.msra.mxu3 %v926_v27  ;;  %v712_v19 = vld [vmem:[%s1275_s0 + $0x60] sm:$0xf]  ;;  %v895_v27 = vld [vmem:[%s1275_s0 + $0x68] sm:$0xf0] }
  0x21   :  { %501 = vmatmul.bf16.vlgmr.msra.gmra.mxu1 %v677_v28  ;;  %511 = vmatmul.bf16.vlgmr.msra.gmra.mxu2 %v717_v29  ;;  %v705_v28 = vor.u32 %v895_v27, %v704_v26  ;;  %v892_v29 = vld [vmem:[%s1275_s0 + $0x54] sm:$0xf] }
  0x22   :  { %546 = vmatpush.bf16.msrb.mxu2 %v925_v24  ;;  %517 = vmatpush.bf16.msrb.mxu1 %v917_v25  ;;  %v713_v24 = vor.u32 %v896_v21, %v712_v19  ;;  %v729_v25 = vor.u32 %v898_v22, %v726_v23  ;;  %v701_v31 = vor.u32 %v892_v29, %v698_v30 }
  0x23   :  { %608 = vmatpush.bf16.msrb.mxu0 %v937_v33  ;;  %583 = vmatmul.bf16.vlgmr.msra.gmra.mxu3 %v669_v38  ;;  %v901_v33 = vld [vmem:[%s1275_s0 + $0x98] sm:$0xf0] }
  0x24   :  { %496 = vmatmul.bf16.vlgmr.msra.gmra.mxu0 %v657_v37  ;;  %v897_v38 = vld [vmem:[%s1275_s0 + $0x7c] sm:$0xf] }
  0x26   :  { %547 = vmatpush.bf16.msrb.mxu2 %v924_v34  ;;  %518 = vmatpush.bf16.msrb.mxu1 %v916_v35  ;;  %v733_v34 = vor.u32 %v901_v33, %v732_v32  ;;  %v724_v35 = vld [vmem:[%s1275_s0 + $0x80] sm:$0xf] }
  0x27   :  { %609 = vmatpush.bf16.msrb.mxu0 %v936_v39  ;;  %v725_v37 = vor.u32 %v900_v36, %v724_v35  ;;  %v718_v39 = vld [vmem:[%s1275_s0 + $0x8c] sm:$0xf0] }
  0x28   :  { %v721_v40 = vor.u32 %v897_v38, %v718_v39 }
  0x2a   :  { %548 = vmatpush.bf16.msrb.mxu2 %v923_v41  ;;  %519 = vmatpush.bf16.msrb.mxu1 %v915_v42 }
  0x2b   :  { %610 = vmatpush.bf16.msrb.mxu0 %v935_v43 }
  0x2e   :  { %549 = vmatpush.bf16.msrb.mxu2 %v922_v44  ;;  %520 = vmatpush.bf16.msrb.mxu1 %v914_v45 }
  0x2f   :  { %611 = vmatpush.bf16.msrb.mxu0 %v934_v48 }
  0x31   :  { %506 = vmatmul.bf16.gmra.mxu1 %v697_v52 }
  0x32   :  { %550 = vmatpush.bf16.msrb.mxu2 %v921_v49  ;;  %521 = vmatpush.bf16.msrb.mxu1 %v913_v50 }
  0x33   :  { %588 = vmatmul.bf16.gmra.mxu3 %v689_v59 }
  0x34   :  { %878 = vmatmul.msk.bf16.vlgmr.msrb.gmra.mxu0 %vm475_vm0, %v673_v58 }
  0x36   :  { %551 = vmatpush.bf16.msrb.mxu2 %v920_v56  ;;  %522 = vmatpush.bf16.msrb.mxu1 %v912_v57 }
  0x3a   :  { %552 = vmatpush.bf16.msrb.mxu2 %v919_v61  ;;  %523 = vmatpush.bf16.msrb.mxu1 %v911_v62 }
  0x3e   :  { %553 = vmatpush.bf16.msrb.mxu2 %v918_v63  ;;  %524 = vmatpush.bf16.msrb.mxu1 %v910_v0 }
  0x41   :  { %554 = vmatmul.bf16.vlgmr.msrb.gmra.mxu2 %v665_v4  ;;  %525 = vmatmul.bf16.vlgmr.msrb.gmra.mxu1 %v661_v8 }
  0x43   :  { %593 = vmatmul.bf16.gmra.mxu3 %v709_v13 }
  0x44   :  { %879 = vmatmul.msk.bf16.gmra.mxu0 %vm475_vm0, %v693_v12 }
  0x51   :  { %559 = vmatmul.bf16.gmra.mxu2 %v685_v16  ;;  %530 = vmatmul.bf16.gmra.mxu1 %v681_v20 }
  0x53   :  { %598 = vmatmul.bf16.gmra.mxu3 %v729_v25 }
  0x54   :  { %880 = vmatmul.msk.bf16.gmra.mxu0 %vm475_vm0, %v713_v24 }
  0x61   :  { %564 = vmatmul.bf16.gmra.mxu2 %v705_v28  ;;  %535 = vmatmul.bf16.gmra.mxu1 %v701_v31 }
  0x64   :  { %881 = vmatmul.msk.bf16.gmra.mxu0 %vm475_vm0, %v733_v34 }
  0x6e   :  { %v142_v23 = vpop.permute.xlu2 %141 }
  0x71   :  { %569 = vmatmul.bf16.gmra.mxu2 %v725_v37  ;;  %540 = vmatmul.bf16.gmra.mxu1 %v721_v40 }
  0x76   :  { %v132_v1 = vpop.permute.xlu1 %131  ;;  %v147_v36 = vpop.permute.xlu2 %146 }
  0x7a   :  { %v122_v51 = vpop.permute.xlu0 %121 }
  0x7e   :  { %v137_v14 = vpop.permute.xlu1 %136 }
  0x82   :  { %v127_v59 = vpop.permute.xlu0 %126 }
  0x9e   :  { %v502_v41 = vpop.f32.mrf.mxu1 }
  0x9f   :  { %v503_v8 = vadd.f32 %v502_v41, %v132_v1 }
  0xa1   :  { %v497_v42 = vpop.f32.mrf.mxu0 }
  0xa2   :  { %v498_v52 = vadd.f32 %v497_v42, %v122_v51 }
  0xa4   :  { %v1235_v46 = vpop.f32.mrf.mxu2 }
  0xa6   :  { %v504_v43 = vpop.f32.mrf.mxu1  ;;  %v584_v47 = vpop.f32.mrf.mxu3 }
  0xa7   :  { %v505_v18 = vadd.f32 %v504_v43, %v137_v14 }
  0xa9   :  { %v499_v44 = vpop.f32.mrf.mxu0 }
  0xaa   :  { %v500_v61 = vadd.f32 %v499_v44, %v127_v59  ;;  %v157_v59 = vpop.permute.xlu1 %156 }
  0xac   :  { %v1237_v50 = vpop.f32.mrf.mxu2 }
  0xae   :  { %v507_v45 = vpop.f32.mrf.mxu1  ;;  %v586_v55 = vpop.f32.mrf.mxu3 }
  0xaf   :  { %v508_v28 = vadd.f32 %v507_v45, %v142_v23 }
  0xb1   :  { %v613_v49 = vpop.f32.mrf.mxu0 }
  0xb6   :  { %v509_v48 = vpop.f32.mrf.mxu1  ;;  %v589_v4 = vpop.f32.mrf.mxu3 }
  0xb7   :  { %v510_v39 = vadd.f32 %v509_v48, %v147_v36 }
  0xb9   :  { %v615_v57 = vpop.f32.mrf.mxu0 }
  0xbe   :  { %v526_v53 = vpop.f32.mrf.mxu1  ;;  %v591_v16 = vpop.f32.mrf.mxu3 }
  0xbf   :  { %v527_v54 = vadd.f32 %v526_v53, %v498_v52 }
  0xc1   :  { %v618_v6 = vpop.f32.mrf.mxu0 }
  0xc4   :  { %v555_v56 = vpop.f32.mrf.mxu2 }
  0xc5   :  { %v556_v58 = vadd.f32 %v555_v56, %v527_v54 }
  0xc6   :  { %v528_v63 = vpop.f32.mrf.mxu1  ;;  %v594_v29 = vpop.f32.mrf.mxu3 }
  0xc7   :  { %v585_v60 = vadd.f32 %v584_v47, %v556_v58  ;;  %v529_v0 = vadd.f32 %v528_v63, %v500_v61  ;;  %v515_v63 = vadd.f32 %v1237_v50, %v157_v59 }
  0xc9   :  { %v614_v62 = vadd.f32 %v613_v49, %v585_v60  ;;  %v620_v19 = vpop.f32.mrf.mxu0  ;;  %v152_v49 = vpop.permute.xlu0 %151 }
  0xca   :  { %v513_v53 = vadd.f32 %v1235_v46, %v152_v49 }
  0xcb   :  { %v633_v2 = vmax.f32 %v614_v62, 0.0 }
  0xcc   :  { %v557_v3 = vpop.f32.mrf.mxu2 }
  0xcd   :  { %642 = vst.msk [vmem:[%s1276_s3] sm:$0xff] %vm641_vm1, %v633_v2  ;;  %v558_v5 = vadd.f32 %v557_v3, %v529_v0 }
  0xce   :  { %v531_v10 = vpop.f32.mrf.mxu1  ;;  %v596_v42 = vpop.f32.mrf.mxu3 }
  0xcf   :  { %v587_v7 = vadd.f32 %v586_v55, %v558_v5  ;;  %v532_v11 = vadd.f32 %v531_v10, %v503_v8 }
  0xd1   :  { %v616_v9 = vadd.f32 %v615_v57, %v587_v7  ;;  %v623_v32 = vpop.f32.mrf.mxu0 }
  0xd3   :  { %v634_v12 = vmax.f32 %v616_v9, 0.0 }
  0xd4   :  { %v560_v13 = vpop.f32.mrf.mxu2 }
  0xd5   :  { %643 = vst.msk [vmem:[%s1276_s3 + $0x8] sm:$0xff] %vm641_vm1, %v634_v12  ;;  %v561_v15 = vadd.f32 %v560_v13, %v532_v11 }
  0xd6   :  { %v533_v21 = vpop.f32.mrf.mxu1  ;;  %v599_v57 = vpop.f32.mrf.mxu3 }
  0xd7   :  { %v590_v17 = vadd.f32 %v589_v4, %v561_v15  ;;  %v534_v22 = vadd.f32 %v533_v21, %v505_v18 }
  0xd9   :  { %v619_v20 = vadd.f32 %v618_v6, %v590_v17  ;;  %v625_v45 = vpop.f32.mrf.mxu0 }
  0xdb   :  { %v635_v24 = vmax.f32 %v619_v20, 0.0 }
  0xdc   :  { %v562_v25 = vpop.f32.mrf.mxu2 }
  0xdd   :  { %644 = vst.msk [vmem:[%s1276_s3 + $0x10] sm:$0xff] %vm641_vm1, %v635_v24  ;;  %v563_v26 = vadd.f32 %v562_v25, %v534_v22 }
  0xde   :  { %v536_v31 = vpop.f32.mrf.mxu1  ;;  %v601_v5 = vpop.f32.mrf.mxu3 }
  0xdf   :  { %v592_v27 = vadd.f32 %v591_v16, %v563_v26  ;;  %v537_v33 = vadd.f32 %v536_v31, %v508_v28 }
  0xe1   :  { %v621_v30 = vadd.f32 %v620_v19, %v592_v27  ;;  %v628_v61 = vpop.f32.mrf.mxu0 }
  0xe3   :  { %v636_v34 = vmax.f32 %v621_v30, 0.0 }
  0xe4   :  { %v565_v35 = vpop.f32.mrf.mxu2 }
  0xe5   :  { %645 = vst.msk [vmem:[%s1276_s3 + $0x18] sm:$0xff] %vm641_vm1, %v636_v34  ;;  %v566_v37 = vadd.f32 %v565_v35, %v537_v33 }
  0xe6   :  { %v538_v41 = vpop.f32.mrf.mxu1 }
  0xe7   :  { %v595_v38 = vadd.f32 %v594_v29, %v566_v37  ;;  %v539_v43 = vadd.f32 %v538_v41, %v510_v39 }
  0xe9   :  { %v624_v40 = vadd.f32 %v623_v32, %v595_v38  ;;  %v630_v7 = vpop.f32.mrf.mxu0 }
  0xeb   :  { %v637_v44 = vmax.f32 %v624_v40, 0.0 }
  0xec   :  { %v567_v47 = vpop.f32.mrf.mxu2 }
  0xed   :  { %646 = vst.msk [vmem:[%s1276_s3 + $0x20] sm:$0xff] %vm641_vm1, %v637_v44  ;;  %v568_v51 = vadd.f32 %v567_v47, %v539_v43 }
  0xee   :  { %v541_v55 = vpop.f32.mrf.mxu1 }
  0xef   :  { %v597_v52 = vadd.f32 %v596_v42, %v568_v51  ;;  %v542_v48 = vadd.f32 %v541_v55, %v513_v53 }
  0xf1   :  { %v626_v54 = vadd.f32 %v625_v45, %v597_v52 }
  0xf3   :  { %v638_v56 = vmax.f32 %v626_v54, 0.0 }
  0xf4   :  { %v570_v58 = vpop.f32.mrf.mxu2 }
  0xf5   :  { %647 = vst.msk [vmem:[%s1276_s3 + $0x28] sm:$0xff] %vm641_vm1, %v638_v56  ;;  %v571_v60 = vadd.f32 %v570_v58, %v542_v48 }
  0xf6   :  { %v543_v1 = vpop.f32.mrf.mxu1 }
  0xf7   :  { %v600_v62 = vadd.f32 %v599_v57, %v571_v60  ;;  %v544_v46 = vadd.f32 %v543_v1, %v515_v63 }
  0xf9   :  { %v629_v0 = vadd.f32 %v628_v61, %v600_v62 }
  0xfb   :  { %v639_v2 = vmax.f32 %v629_v0, 0.0 }
  0xfc   :  { %v572_v3 = vpop.f32.mrf.mxu2 }
  0xfd   :  { %648 = vst.msk [vmem:[%s1276_s3 + $0x30] sm:$0xff] %vm641_vm1, %v639_v2  ;;  %v573_v4 = vadd.f32 %v572_v3, %v544_v46 }
  0xff   :  { %v602_v6 = vadd.f32 %v601_v5, %v573_v4 }
 0x101   :  { %v631_v8 = vadd.f32 %v630_v7, %v602_v6 }
 0x103   :  { %v640_v9 = vmax.f32 %v631_v8, 0.0 }
 0x105   :  { %649 = vst.msk [vmem:[%s1276_s3 + $0x38] sm:$0xff] %vm641_vm1, %v640_v9 }

</bundles_post_ra>
